<compile_context>
chip_gen: v7x
topology: tpu7x:2x2x1
jax: 0.10.0
libtpu: 0.0.40
codegen_flags: <defaults>
</compile_context>

<pallas_src>
import functools

import jax
import jax.numpy as jnp
from jax.experimental import pallas as pl
from jax.experimental.pallas import tpu as pltpu


def _round_up(x, m):
    return (x + m - 1) // m * m


def _cdiv(a, b):
    return -(-a // b)


def _pick_vmem_limit():
    # Generation-aware scoped-VMEM budget: generous on v5e/v6e (128 MiB physical),
    # conservative on v7x (64 MiB per TC, both TCs need buffers once N is sharded).
    try:
        cap = pltpu.get_tpu_info().vmem_capacity_bytes
    except Exception:
        return None                     # compiler default (safe everywhere)
    if cap >= 100 * 1024 * 1024:
        return 96 * 1024 * 1024         # v5e / v6e
    return 48 * 1024 * 1024             # v7x


_VMEM_LIMIT = _pick_vmem_limit()


# ---------------------------------------------------------------------------
# Pallas kernel 1: K-streamed GEMM + bias + activation
#   bf16 operands, f32 VMEM accumulator, epilogue in f32, single cast at store.
# ---------------------------------------------------------------------------
def _fused_matmul_kernel(*refs, activation, has_bias):
    if has_bias:
        a_ref, b_ref, bias_ref, o_ref, acc_ref = refs
    else:
        a_ref, b_ref, o_ref, acc_ref = refs
    k = pl.program_id(2)

    @pl.when(k == 0)
    def _():
        acc_ref[...] = jnp.zeros_like(acc_ref)

    acc_ref[...] += jnp.dot(a_ref[...], b_ref[...],
                            preferred_element_type=jnp.float32)

    @pl.when(k == pl.num_programs(2) - 1)
    def _():
        acc = acc_ref[...]                       # f32 epilogue (v5e has no bf16 VALU)
        if has_bias:
            acc = acc + bias_ref[...]
        if activation == "leaky_relu":
            acc = jnp.where(acc >= 0, acc, 0.1 * acc)   # nn.LeakyReLU(0.1)
        elif activation == "relu":
            acc = jnp.maximum(acc, 0.0)
        o_ref[...] = acc.astype(o_ref.dtype)


def fused_matmul(a, b, bias=None, activation="none", out_dtype=jnp.float32,
                 tm_max=256, tn_max=512, tk_max=512):
    """activation(a @ b + bias); a:(M,K), b:(K,N), bias:(N,) -> (M,N) out_dtype."""
    M, K = a.shape
    K2, N = b.shape
    assert K == K2
    a = a.astype(jnp.bfloat16)
    b = b.astype(jnp.bfloat16)

    # --- M tiling (parallel); tiles derived from grid count -> bounded pad waste ---
    if M <= tm_max:
        tm, Mp = M, M
    else:
        tm = _round_up(_cdiv(M, _cdiv(M, tm_max)), 16)
        Mp = _round_up(M, tm)
    gm = Mp // tm

    # --- N tiling (parallel); >=2 tiles when N >= 256 so both v7x TCs get work,
    #     lane-sparse N padded to 128 for dense (unmasked) stores ---
    Np = _round_up(N, 128)
    if Np >= 256:
        gn = max(2, _cdiv(Np, tn_max))
        tn = _round_up(_cdiv(Np, gn), 128)
        Np = _round_up(Np, tn)
    else:
        tn = Np
    gn = Np // tn

    # --- K tiling ("arbitrary" reduction axis; weight streamed tile-by-tile) ---
    if K <= tk_max:
        tk, Kp = K, K
    else:
        tk = _round_up(_cdiv(K, _cdiv(K, tk_max)), 128)
        Kp = _round_up(K, tk)
    gk = Kp // tk

    if (Mp, Kp) != (M, K):
        a = jnp.pad(a, ((0, Mp - M), (0, Kp - K)))
    if (Kp, Np) != (K, N):
        b = jnp.pad(b, ((0, Kp - K), (0, Np - N)))

    has_bias = bias is not None
    # NOTE: the weight block index varies with k (streamed), so its default
    # double-buffering is what provides DMA/MXU overlap; the (1, tn) f32 bias block
    # is too small for single-buffering (pl.Buffered(1)) to matter.
    in_specs = [
        pl.BlockSpec((tm, tk), lambda i, j, k: (i, k)),
        pl.BlockSpec((tk, tn), lambda i, j, k: (k, j)),
    ]
    args = [a, b]
    if has_bias:
        bias_p = bias.astype(jnp.float32).reshape(1, N)
        if Np != N:
            bias_p = jnp.pad(bias_p, ((0, 0), (0, Np - N)))
        in_specs.append(pl.BlockSpec((1, tn), lambda i, j, k: (0, j)))
        args.append(bias_p)

    out = pl.pallas_call(
        functools.partial(_fused_matmul_kernel,
                          activation=activation, has_bias=has_bias),
        out_shape=jax.ShapeDtypeStruct((Mp, Np), out_dtype),
        grid=(gm, gn, gk),
        in_specs=in_specs,
        out_specs=pl.BlockSpec((tm, tn), lambda i, j, k: (i, j)),
        scratch_shapes=[pltpu.VMEM((tm, tn), jnp.float32)],
        compiler_params=pltpu.CompilerParams(
            dimension_semantics=("parallel", "parallel", "arbitrary"),
            vmem_limit_bytes=_VMEM_LIMIT),
    )(*args)
    if (Mp, Np) != (M, N):
        out = out[:M, :N]
    return out


# ---------------------------------------------------------------------------
# Pallas kernel 2: fully fused, batched SAGAN self-attention
#   one (B*N, C) qkv GEMM + batched energy/softmax/value-mix + gamma residual.
# ---------------------------------------------------------------------------
def _self_attention_kernel(x_ref, w_ref, b_ref, g_ref, o_ref, *, batch, n, cq):
    BN, C = x_ref.shape
    x = x_ref[...]
    qkv = jnp.dot(x.astype(jnp.bfloat16), w_ref[...],
                  preferred_element_type=jnp.float32) + b_ref[...]      # (BN, D)
    q = qkv[:, :cq].reshape(batch, n, cq)
    k = qkv[:, cq:2 * cq].reshape(batch, n, cq)
    v = qkv[:, 2 * cq:].reshape(batch, n, C)
    energy = jax.lax.dot_general(q, k, (((2,), (2,)), ((0,), (0,))),
                                 preferred_element_type=jnp.float32)    # (B, N, N)
    m = jnp.max(energy, axis=-1, keepdims=True)
    e = jnp.exp(energy - m)
    attn = e / jnp.sum(e, axis=-1, keepdims=True)
    out = jax.lax.dot_general(attn, v, (((2,), (1,)), ((0,), (0,))),
                              preferred_element_type=jnp.float32)       # (B, N, C)
    gamma = g_ref[0, 0]
    o_ref[...] = gamma * out.reshape(BN, C) + x.astype(jnp.float32)


def self_attention(x_nhwc, p):
    B, H, W, C = x_nhwc.shape
    N = H * W
    if N == 1:
        # 1x1 spatial map: softmax over a single key is identically 1, so the block
        # reduces to out = gamma * (x @ Wv + bv) + x  (q/k/energy/softmax are dead).
        xf = x_nhwc.reshape(B, C)
        proj = fused_matmul(xf, p["wv"].reshape(C, C).T, p["bv"],
                            activation="none", out_dtype=jnp.float32)
        out = p["gamma"] * proj + xf.astype(jnp.float32)
        return out.reshape(B, H, W, C)

    cq = C // 8
    D = 2 * cq + C
    xf = x_nhwc.reshape(B * N, C)
    w_qkv = jnp.concatenate(
        [p["wq"].reshape(cq, C).T, p["wk"].reshape(cq, C).T, p["wv"].reshape(C, C).T],
        axis=1)                                                   # (C, D)
    b_qkv = jnp.concatenate([p["bq"], p["bk"], p["bv"]]).reshape(1, D)
    out = pl.pallas_call(
        functools.partial(_self_attention_kernel, batch=B, n=N, cq=cq),
        out_shape=jax.ShapeDtypeStruct((B * N, C), jnp.float32),
        grid=(1,),
        in_specs=[
            pl.BlockSpec((B * N, C), lambda i: (0, 0)),
            pl.BlockSpec((C, D), lambda i: (0, 0)),
            pl.BlockSpec((1, D), lambda i: (0, 0)),
            pl.BlockSpec(memory_space=pltpu.MemorySpace.SMEM),    # gamma scalar
        ],
        out_specs=pl.BlockSpec((B * N, C), lambda i: (0, 0)),
        compiler_params=pltpu.CompilerParams(
            dimension_semantics=("arbitrary",),
            vmem_limit_bytes=_VMEM_LIMIT),
    )(xf,
      w_qkv.astype(jnp.bfloat16),
      b_qkv.astype(jnp.float32),
      p["gamma"].reshape(1, 1).astype(jnp.float32))
    return out.reshape(B, H, W, C)


# ---------------------------------------------------------------------------
# JAX glue: NHWC im2col (bf16), conv / sub-pixel conv-transpose wrappers
# ---------------------------------------------------------------------------
def _im2col_nhwc(x, kh, kw, stride, pad):
    x = x.astype(jnp.bfloat16)          # fold MXU-operand cast into im2col (one pass)
    B, H, W, C = x.shape
    xp = jnp.pad(x, ((0, 0), (pad, pad), (pad, pad), (0, 0)))
    Ho = (H + 2 * pad - kh) // stride + 1
    Wo = (W + 2 * pad - kw) // stride + 1
    cols = []
    for dy in range(kh):
        for dx in range(kw):
            cols.append(xp[:, dy:dy + stride * (Ho - 1) + 1:stride,
                           dx:dx + stride * (Wo - 1) + 1:stride, :])
    a = jnp.concatenate(cols, axis=-1)          # (B, Ho, Wo, kh*kw*C), (dy, dx, c) order
    return a.reshape(B * Ho * Wo, kh * kw * C), Ho, Wo
    # TODO(synk): at larger img_size/batch, build these columns inside the kernel from
    # an HBM-resident x (memory_space=pl.ANY) instead of materializing A in HBM.


def conv2d(x, w, b, stride, pad, activation="none", out_dtype=jnp.float32):
    """x: NHWC; w: PyTorch Conv2d layout (Co, Ci, kh, kw)."""
    Co, Ci, kh, kw = w.shape
    a, Ho, Wo = _im2col_nhwc(x, kh, kw, stride, pad)
    wm = jnp.transpose(w, (2, 3, 1, 0)).reshape(kh * kw * Ci, Co)
    out = fused_matmul(a, wm, b, activation, out_dtype=out_dtype)   # (B*Ho*Wo, Co)
    return out.reshape(x.shape[0], Ho, Wo, Co)


def _conv_transpose_phase_weight(w):
    """(Ci, Co, 4, 4) ConvTranspose2d(4,2,1) weight -> (9*Ci, 4*Co) sub-pixel GEMM weight.

    Output columns are ordered (phase_y, phase_x, co); rows (dy, dx, ci) match the
    3x3-window im2col of the *un-dilated* input (pad 1)."""
    Ci, Co, kh, kw = w.shape
    wp = jnp.pad(w, ((0, 0), (0, 0), (1, 1), (1, 1)))            # out-of-range taps -> 0
    idx = jnp.arange(2)[:, None] + 4 - 2 * jnp.arange(3)[None, :]   # [phase, d] -> padded k idx
    wm = wp[:, :, idx[:, :, None, None], idx[None, None, :, :]]     # (Ci, Co, py, dy, px, dx)
    wm = jnp.transpose(wm, (3, 5, 0, 2, 4, 1))                      # (dy, dx, Ci, py, px, Co)
    return wm.reshape(9 * Ci, 4 * Co)


def conv_transpose2d(x, w, b):
    """ConvTranspose2d(Ci, Co, 4, stride=2, pad=1) on NHWC x via one sub-pixel GEMM."""
    B, H, W, Ci = x.shape
    _, Co, _, _ = w.shape
    a, _, _ = _im2col_nhwc(x, 3, 3, 1, 1)                        # (B*H*W, 9*Ci) bf16
    wm = _conv_transpose_phase_weight(w)                         # (9*Ci, 4*Co)
    # f32 output: these tensors enter the residual / feature-matching adds.
    out = fused_matmul(a, wm, jnp.tile(b, 4), "none", out_dtype=jnp.float32)
    out = out.reshape(B, H, W, 2, 2, Co)                         # (..., py, px, Co)
    out = jnp.transpose(out, (0, 1, 3, 2, 4, 5)).reshape(B, 2 * H, 2 * W, Co)
    return out


def _conv2d_xla(x, w, b, stride=1, pad=0):
    # Lane-starved output (Co = 1): kept in plain XLA per perf review.
    out = jax.lax.conv_general_dilated(
        x, jnp.transpose(w, (2, 3, 1, 0)),
        window_strides=(stride, stride),
        padding=[(pad, pad), (pad, pad)],
        dimension_numbers=("NHWC", "HWIO", "NHWC"))
    return out + b.reshape(1, 1, 1, -1)


# ---------------------------------------------------------------------------
# Full forward pass (matches FeatureMatchDiscriminator.forward)
# ---------------------------------------------------------------------------
def forward(x_nchw, params):
    x = jnp.transpose(x_nchw, (0, 2, 3, 1))                      # NHWC, once
    # f1 / f2 enter residual & feature-matching adds -> f32 outputs.
    f1 = conv2d(x, params["l1_w"], params["l1_b"], 2, 1, "leaky_relu",
                out_dtype=jnp.float32)
    f2 = conv2d(f1, params["l2_w"], params["l2_b"], 2, 1, "leaky_relu",
                out_dtype=jnp.float32)
    # l3 / l4 outputs feed only the attention blocks -> bf16 writeback (halved HBM).
    out = conv2d(f2, params["l3_w"], params["l3_b"], 2, 1, "leaky_relu",
                 out_dtype=jnp.bfloat16)
    f3 = self_attention(out, params["attn1"])                    # f32
    out = conv2d(f3, params["l4_w"], params["l4_b"], 2, 1, "leaky_relu",
                 out_dtype=jnp.bfloat16)
    f4 = self_attention(out, params["attn2"])                    # f32 (N==1 fast path)

    # ---- lane-starved head (N in {1, 4, 64}): plain XLA per perf review ----
    pred = _conv2d_xla(f4, params["last_w"], params["last_b"]).reshape(f4.shape[0], -1)
    h = jnp.maximum(pred @ params["mlp_w1"].T + params["mlp_b1"], 0.0)
    mlp_o = h @ params["mlp_w2"].T + params["mlp_b2"]

    # ---- feature-matching upsample path (Pallas sub-pixel GEMMs) ----
    f4_up = conv_transpose2d(f4, params["up1_w"], params["up1_b"])
    f3c = f3 + f4_up
    f3_up = conv_transpose2d(f3c, params["up2_w"], params["up2_b"])
    f2c = f2 + f3_up
    f2_up = conv_transpose2d(f2c, params["up3_w"], params["up3_b"])
    f1c = f1 + f2_up

    feat_avg = jnp.mean(f1c, axis=(1, 2))                        # AdaptiveAvgPool2d(1)
    feat_attn = jax.nn.softmax(feat_avg @ params["w_w"].T + params["w_b"], axis=-1)

    fmaps = [f1, f2, f3, f4]
    fmaps = [f * feat_attn[:, i].reshape(-1, 1, 1, 1) for i, f in enumerate(fmaps)]
    fmaps = [jnp.transpose(f, (0, 3, 1, 2)) for f in fmaps]      # NCHW at the interface
    return fmaps + [pred, mlp_o]                                 # pred/mlp_o unscaled (as in PyTorch)


# ---------------------------------------------------------------------------
# Deterministic parameter init (PyTorch weight layouts)
# ---------------------------------------------------------------------------
def spectral_normalize(w, iters=20):
    # Converged spectral norm via power iteration (stand-in for PyTorch's
    # per-forward power-iteration parametrization).
    w2 = w.reshape(w.shape[0], -1)
    v = jnp.ones((w2.shape[1],), jnp.float32) / jnp.sqrt(float(w2.shape[1]))
    for _ in range(iters):
        u = w2 @ v
        u = u / (jnp.linalg.norm(u) + 1e-12)
        v = w2.T @ u
        v = v / (jnp.linalg.norm(v) + 1e-12)
    sigma = jnp.dot(u, w2 @ v)
    return w / sigma
    # TODO(synk): PyTorch SpectralNorm keeps a stateful `u` updated once per
    # forward; here we use the converged sigma since weights are synthetic.


def init_params(key, conv_dim=64, img_size=16):
    ks = list(jax.random.split(key, 48))
    it = iter(ks)

    def nrm(shape, scale=0.02):
        return scale * jax.random.normal(next(it), shape, dtype=jnp.float32)

    c = conv_dim
    p = {}
    p["l1_w"] = spectral_normalize(nrm((c, 3, 4, 4)));         p["l1_b"] = nrm((c,))
    p["l2_w"] = spectral_normalize(nrm((2 * c, c, 4, 4)));     p["l2_b"] = nrm((2 * c,))
    p["l3_w"] = spectral_normalize(nrm((4 * c, 2 * c, 4, 4))); p["l3_b"] = nrm((4 * c,))
    p["l4_w"] = spectral_normalize(nrm((8 * c, 4 * c, 4, 4))); p["l4_b"] = nrm((8 * c,))
    k_last = img_size // 16
    p["last_w"] = nrm((1, 8 * c, k_last, k_last));             p["last_b"] = nrm((1,))

    def attn_params(C):
        return {
            "wq": nrm((C // 8, C, 1, 1)), "bq": nrm((C // 8,)),
            "wk": nrm((C // 8, C, 1, 1)), "bk": nrm((C // 8,)),
            "wv": nrm((C, C, 1, 1)),      "bv": nrm((C,)),
            "gamma": jnp.zeros((), jnp.float32),   # SAGAN init: gamma = 0
        }

    p["attn1"] = attn_params(4 * c)
    p["attn2"] = attn_params(8 * c)

    p["mlp_w1"] = nrm((256, 1));    p["mlp_b1"] = nrm((256,))
    p["mlp_w2"] = nrm((64, 256));   p["mlp_b2"] = nrm((64,))

    p["up1_w"] = nrm((8 * c, 4 * c, 4, 4)); p["up1_b"] = nrm((4 * c,))
    p["up2_w"] = nrm((4 * c, 2 * c, 4, 4)); p["up2_b"] = nrm((2 * c,))
    p["up3_w"] = nrm((2 * c, c, 4, 4));     p["up3_b"] = nrm((c,))

    p["w_w"] = nrm((4, 64)); p["w_b"] = nrm((4,))
    return p


if __name__ == "__main__":
    key = jax.random.PRNGKey(0)
    pk, xk = jax.random.split(key)
    # img_size=16 (so last-conv kernel = 1 and layer4 output is 1x1); conv_dim=64
    # because the Upsample/MLP/weights dimensions are hard-coded in the module.
    params = init_params(pk, conv_dim=64, img_size=16)
    x = jax.random.normal(xk, (2, 3, 16, 16), dtype=jnp.float32)

    feats = jax.jit(forward)(x, params)
    for f in feats:
        jax.block_until_ready(f)

    # Sanity on output shapes (matching the PyTorch module's return list).
    assert feats[0].shape == (2, 64, 8, 8)
    assert feats[1].shape == (2, 128, 4, 4)
    assert feats[2].shape == (2, 256, 2, 2)
    assert feats[3].shape == (2, 512, 1, 1)
    assert feats[4].shape == (2, 1)
    assert feats[5].shape == (2, 64)
    print("KERNEL_OK")
</pallas_src>

<mosaic_0001>
module attributes {stable_mosaic.version = 11 : i64} {
  func.func @_fused_matmul_kernel(%arg0: i32, %arg1: i32, %arg2: i32, %arg3: memref<128x48xbf16, #tpu.memory_space<vmem>>, %arg4: memref<48x128xbf16, #tpu.memory_space<vmem>>, %arg5: memref<1x128xf32, #tpu.memory_space<vmem>>, %arg6: memref<128x128xf32, #tpu.memory_space<vmem>>, %arg7: memref<128x128xf32, #tpu.memory_space<vmem>>) attributes {dimension_semantics = [#tpu.dimension_semantics<parallel>, #tpu.dimension_semantics<parallel>, #tpu.dimension_semantics<arbitrary>], iteration_bounds = array<i64: 1, 1, 1>, scalar_prefetch = 0 : i64, scratch_operands = 1 : i64, tpu.core_type = #tpu.core_type<tc>, window_params = [{transform_indices = @transform_0, window_bounds = array<i64: 128, 48>}, {transform_indices = @transform_1, window_bounds = array<i64: 48, 128>}, {transform_indices = @transform_2, window_bounds = array<i64: 1, 128>}, {transform_indices = @transform_3, window_bounds = array<i64: 128, 128>}]} {
    %c0_i32 = arith.constant 0 : i32
    %0 = arith.cmpi eq, %arg2, %c0_i32 : i32
    %1 = arith.extui %0 : i1 to i32
    %c0_i32_0 = arith.constant 0 : i32
    %2 = arith.cmpi ne, %1, %c0_i32_0 : i32
    scf.if %2 {
      %cst_10 = arith.constant 0.000000e+00 : f32
      %12 = vector.broadcast %cst_10 : f32 to vector<128x128xf32>
      %c0_11 = arith.constant 0 : index
      %c0_12 = arith.constant 0 : index
      %13 = vector.load %arg7[%c0_11, %c0_12] : memref<128x128xf32, #tpu.memory_space<vmem>>, vector<128x128xf32>
      tpu.vector_store %arg7[%c0_11, %c0_12], %12 {strides = array<i32>} : memref<128x128xf32, #tpu.memory_space<vmem>>, vector<128x128xf32>,
    } else {
    }
    %c0 = arith.constant 0 : index
    %c0_1 = arith.constant 0 : index
    %3 = vector.load %arg7[%c0, %c0_1] : memref<128x128xf32, #tpu.memory_space<vmem>>, vector<128x128xf32>
    %c0_2 = arith.constant 0 : index
    %c0_3 = arith.constant 0 : index
    %4 = vector.load %arg3[%c0_2, %c0_3] : memref<128x48xbf16, #tpu.memory_space<vmem>>, vector<128x48xbf16>
    %c0_4 = arith.constant 0 : index
    %c0_5 = arith.constant 0 : index
    %5 = vector.load %arg4[%c0_4, %c0_5] : memref<48x128xbf16, #tpu.memory_space<vmem>>, vector<48x128xbf16>
    %cst = arith.constant dense<0.000000e+00> : vector<128x128xf32>
    %6 = tpu.matmul %4, %5, %cst {dimension_numbers = #tpu.dot_dimension_numbers<[1], [0], [0], [1], [0, 0, 1, 1], [], []>} : vector<128x48xbf16>, vector<48x128xbf16>, vector<128x128xf32> -> vector<128x128xf32>
    %7 = arith.addf %3, %6 : vector<128x128xf32>
    %c0_6 = arith.constant 0 : index
    %c0_7 = arith.constant 0 : index
    %8 = vector.load %arg7[%c0_6, %c0_7] : memref<128x128xf32, #tpu.memory_space<vmem>>, vector<128x128xf32>
    tpu.vector_store %arg7[%c0_6, %c0_7], %7 {strides = array<i32>} : memref<128x128xf32, #tpu.memory_space<vmem>>, vector<128x128xf32>,
    %c0_i32_8 = arith.constant 0 : i32
    %9 = arith.cmpi eq, %arg2, %c0_i32_8 : i32
    %10 = arith.extui %9 : i1 to i32
    %c0_i32_9 = arith.constant 0 : i32
    %11 = arith.cmpi ne, %10, %c0_i32_9 : i32
    scf.if %11 {
      %c0_10 = arith.constant 0 : index
      %c0_11 = arith.constant 0 : index
      %12 = vector.load %arg7[%c0_10, %c0_11] : memref<128x128xf32, #tpu.memory_space<vmem>>, vector<128x128xf32>
      %c0_12 = arith.constant 0 : index
      %c0_13 = arith.constant 0 : index
      %13 = vector.load %arg5[%c0_12, %c0_13] : memref<1x128xf32, #tpu.memory_space<vmem>>, vector<1x128xf32>
      %14 = vector.broadcast %13 : vector<1x128xf32> to vector<128x128xf32>
      %15 = arith.addf %12, %14 : vector<128x128xf32>
      %cst_14 = arith.constant 0.000000e+00 : f32
      %16 = vector.broadcast %cst_14 : f32 to vector<128x128xf32>
      %17 = arith.cmpf oge, %15, %16 : vector<128x128xf32>
      %cst_15 = arith.constant 1.000000e-01 : f32
      %18 = vector.broadcast %cst_15 : f32 to vector<128x128xf32>
      %19 = arith.mulf %18, %15 : vector<128x128xf32>
      %20 = arith.select %17, %15, %19 : vector<128x128xi1>, vector<128x128xf32>
      %c0_16 = arith.constant 0 : index
      %c0_17 = arith.constant 0 : index
      %21 = vector.load %arg6[%c0_16, %c0_17] : memref<128x128xf32, #tpu.memory_space<vmem>>, vector<128x128xf32>
      tpu.vector_store %arg6[%c0_16, %c0_17], %20 {strides = array<i32>} : memref<128x128xf32, #tpu.memory_space<vmem>>, vector<128x128xf32>,
    } else {
    }
    return
  }
  func.func @transform_0(%arg0: i32, %arg1: i32, %arg2: i32) -> (i32, i32) {
    %c0_i32 = arith.constant 0 : i32
    return %arg0, %arg2 : i32, i32
  }
  func.func @transform_1(%arg0: i32, %arg1: i32, %arg2: i32) -> (i32, i32) {
    %c0_i32 = arith.constant 0 : i32
    return %arg2, %arg1 : i32, i32
  }
  func.func @transform_2(%arg0: i32, %arg1: i32, %arg2: i32) -> (i32, i32) {
    %c0_i32 = arith.constant 0 : i32
    %c0_i32_0 = arith.constant 0 : i32
    return %c0_i32, %arg1 : i32, i32
  }
  func.func @transform_3(%arg0: i32, %arg1: i32, %arg2: i32) -> (i32, i32) {
    %c0_i32 = arith.constant 0 : i32
    return %arg0, %arg1 : i32, i32
  }
}

module attributes {stable_mosaic.version = 11 : i64} {
  func.func @_fused_matmul_kernel(%arg0: i32, %arg1: i32, %arg2: i32, %arg3: memref<32x512xbf16, #tpu.memory_space<vmem>>, %arg4: memref<512x128xbf16, #tpu.memory_space<vmem>>, %arg5: memref<1x128xf32, #tpu.memory_space<vmem>>, %arg6: memref<32x128xf32, #tpu.memory_space<vmem>>, %arg7: memref<32x128xf32, #tpu.memory_space<vmem>>) attributes {dimension_semantics = [#tpu.dimension_semantics<parallel>, #tpu.dimension_semantics<parallel>, #tpu.dimension_semantics<arbitrary>], iteration_bounds = array<i64: 1, 1, 2>, scalar_prefetch = 0 : i64, scratch_operands = 1 : i64, tpu.core_type = #tpu.core_type<tc>, window_params = [{transform_indices = @transform_0, window_bounds = array<i64: 32, 512>}, {transform_indices = @transform_1, window_bounds = array<i64: 512, 128>}, {transform_indices = @transform_2, window_bounds = array<i64: 1, 128>}, {transform_indices = @transform_3, window_bounds = array<i64: 32, 128>}]} {
    %c0_i32 = arith.constant 0 : i32
    %0 = arith.cmpi eq, %arg2, %c0_i32 : i32
    %1 = arith.extui %0 : i1 to i32
    %c0_i32_0 = arith.constant 0 : i32
    %2 = arith.cmpi ne, %1, %c0_i32_0 : i32
    scf.if %2 {
      %cst_9 = arith.constant 0.000000e+00 : f32
      %12 = vector.broadcast %cst_9 : f32 to vector<32x128xf32>
      %c0_10 = arith.constant 0 : index
      %c0_11 = arith.constant 0 : index
      %13 = vector.load %arg7[%c0_10, %c0_11] : memref<32x128xf32, #tpu.memory_space<vmem>>, vector<32x128xf32>
      tpu.vector_store %arg7[%c0_10, %c0_11], %12 {strides = array<i32>} : memref<32x128xf32, #tpu.memory_space<vmem>>, vector<32x128xf32>,
    } else {
    }
    %c0 = arith.constant 0 : index
    %c0_1 = arith.constant 0 : index
    %3 = vector.load %arg7[%c0, %c0_1] : memref<32x128xf32, #tpu.memory_space<vmem>>, vector<32x128xf32>
    %c0_2 = arith.constant 0 : index
    %c0_3 = arith.constant 0 : index
    %4 = vector.load %arg3[%c0_2, %c0_3] : memref<32x512xbf16, #tpu.memory_space<vmem>>, vector<32x512xbf16>
    %c0_4 = arith.constant 0 : index
    %c0_5 = arith.constant 0 : index
    %5 = vector.load %arg4[%c0_4, %c0_5] : memref<512x128xbf16, #tpu.memory_space<vmem>>, vector<512x128xbf16>
    %cst = arith.constant dense<0.000000e+00> : vector<32x128xf32>
    %6 = tpu.matmul %4, %5, %cst {dimension_numbers = #tpu.dot_dimension_numbers<[1], [0], [0], [1], [0, 0, 1, 1], [], []>} : vector<32x512xbf16>, vector<512x128xbf16>, vector<32x128xf32> -> vector<32x128xf32>
    %7 = arith.addf %3, %6 : vector<32x128xf32>
    %c0_6 = arith.constant 0 : index
    %c0_7 = arith.constant 0 : index
    %8 = vector.load %arg7[%c0_6, %c0_7] : memref<32x128xf32, #tpu.memory_space<vmem>>, vector<32x128xf32>
    tpu.vector_store %arg7[%c0_6, %c0_7], %7 {strides = array<i32>} : memref<32x128xf32, #tpu.memory_space<vmem>>, vector<32x128xf32>,
    %c1_i32 = arith.constant 1 : i32
    %9 = arith.cmpi eq, %arg2, %c1_i32 : i32
    %10 = arith.extui %9 : i1 to i32
    %c0_i32_8 = arith.constant 0 : i32
    %11 = arith.cmpi ne, %10, %c0_i32_8 : i32
    scf.if %11 {
      %c0_9 = arith.constant 0 : index
      %c0_10 = arith.constant 0 : index
      %12 = vector.load %arg7[%c0_9, %c0_10] : memref<32x128xf32, #tpu.memory_space<vmem>>, vector<32x128xf32>
      %c0_11 = arith.constant 0 : index
      %c0_12 = arith.constant 0 : index
      %13 = vector.load %arg5[%c0_11, %c0_12] : memref<1x128xf32, #tpu.memory_space<vmem>>, vector<1x128xf32>
      %14 = vector.broadcast %13 : vector<1x128xf32> to vector<32x128xf32>
      %15 = arith.addf %12, %14 : vector<32x128xf32>
      %cst_13 = arith.constant 0.000000e+00 : f32
      %16 = vector.broadcast %cst_13 : f32 to vector<32x128xf32>
      %17 = arith.cmpf oge, %15, %16 : vector<32x128xf32>
      %cst_14 = arith.constant 1.000000e-01 : f32
      %18 = vector.broadcast %cst_14 : f32 to vector<32x128xf32>
      %19 = arith.mulf %18, %15 : vector<32x128xf32>
      %20 = arith.select %17, %15, %19 : vector<32x128xi1>, vector<32x128xf32>
      %c0_15 = arith.constant 0 : index
      %c0_16 = arith.constant 0 : index
      %21 = vector.load %arg6[%c0_15, %c0_16] : memref<32x128xf32, #tpu.memory_space<vmem>>, vector<32x128xf32>
      tpu.vector_store %arg6[%c0_15, %c0_16], %20 {strides = array<i32>} : memref<32x128xf32, #tpu.memory_space<vmem>>, vector<32x128xf32>,
    } else {
    }
    return
  }
  func.func @transform_0(%arg0: i32, %arg1: i32, %arg2: i32) -> (i32, i32) {
    %c0_i32 = arith.constant 0 : i32
    return %arg0, %arg2 : i32, i32
  }
  func.func @transform_1(%arg0: i32, %arg1: i32, %arg2: i32) -> (i32, i32) {
    %c0_i32 = arith.constant 0 : i32
    return %arg2, %arg1 : i32, i32
  }
  func.func @transform_2(%arg0: i32, %arg1: i32, %arg2: i32) -> (i32, i32) {
    %c0_i32 = arith.constant 0 : i32
    %c0_i32_0 = arith.constant 0 : i32
    return %c0_i32, %arg1 : i32, i32
  }
  func.func @transform_3(%arg0: i32, %arg1: i32, %arg2: i32) -> (i32, i32) {
    %c0_i32 = arith.constant 0 : i32
    return %arg0, %arg1 : i32, i32
  }
}

module attributes {stable_mosaic.version = 11 : i64} {
  func.func @_fused_matmul_kernel(%arg0: i32, %arg1: i32, %arg2: i32, %arg3: memref<8x512xbf16, #tpu.memory_space<vmem>>, %arg4: memref<512x128xbf16, #tpu.memory_space<vmem>>, %arg5: memref<1x128xf32, #tpu.memory_space<vmem>>, %arg6: memref<8x128xbf16, #tpu.memory_space<vmem>>, %arg7: memref<8x128xf32, #tpu.memory_space<vmem>>) attributes {dimension_semantics = [#tpu.dimension_semantics<parallel>, #tpu.dimension_semantics<parallel>, #tpu.dimension_semantics<arbitrary>], iteration_bounds = array<i64: 1, 2, 4>, scalar_prefetch = 0 : i64, scratch_operands = 1 : i64, tpu.core_type = #tpu.core_type<tc>, window_params = [{transform_indices = @transform_0, window_bounds = array<i64: 8, 512>}, {transform_indices = @transform_1, window_bounds = array<i64: 512, 128>}, {transform_indices = @transform_2, window_bounds = array<i64: 1, 128>}, {transform_indices = @transform_3, window_bounds = array<i64: 8, 128>}]} {
    %c0_i32 = arith.constant 0 : i32
    %0 = arith.cmpi eq, %arg2, %c0_i32 : i32
    %1 = arith.extui %0 : i1 to i32
    %c0_i32_0 = arith.constant 0 : i32
    %2 = arith.cmpi ne, %1, %c0_i32_0 : i32
    scf.if %2 {
      %cst_9 = arith.constant 0.000000e+00 : f32
      %12 = vector.broadcast %cst_9 : f32 to vector<8x128xf32>
      %c0_10 = arith.constant 0 : index
      %c0_11 = arith.constant 0 : index
      %13 = vector.load %arg7[%c0_10, %c0_11] : memref<8x128xf32, #tpu.memory_space<vmem>>, vector<8x128xf32>
      tpu.vector_store %arg7[%c0_10, %c0_11], %12 {strides = array<i32>} : memref<8x128xf32, #tpu.memory_space<vmem>>, vector<8x128xf32>,
    } else {
    }
    %c0 = arith.constant 0 : index
    %c0_1 = arith.constant 0 : index
    %3 = vector.load %arg7[%c0, %c0_1] : memref<8x128xf32, #tpu.memory_space<vmem>>, vector<8x128xf32>
    %c0_2 = arith.constant 0 : index
    %c0_3 = arith.constant 0 : index
    %4 = vector.load %arg3[%c0_2, %c0_3] : memref<8x512xbf16, #tpu.memory_space<vmem>>, vector<8x512xbf16>
    %c0_4 = arith.constant 0 : index
    %c0_5 = arith.constant 0 : index
    %5 = vector.load %arg4[%c0_4, %c0_5] : memref<512x128xbf16, #tpu.memory_space<vmem>>, vector<512x128xbf16>
    %cst = arith.constant dense<0.000000e+00> : vector<8x128xf32>
    %6 = tpu.matmul %4, %5, %cst {dimension_numbers = #tpu.dot_dimension_numbers<[1], [0], [0], [1], [0, 0, 1, 1], [], []>} : vector<8x512xbf16>, vector<512x128xbf16>, vector<8x128xf32> -> vector<8x128xf32>
    %7 = arith.addf %3, %6 : vector<8x128xf32>
    %c0_6 = arith.constant 0 : index
    %c0_7 = arith.constant 0 : index
    %8 = vector.load %arg7[%c0_6, %c0_7] : memref<8x128xf32, #tpu.memory_space<vmem>>, vector<8x128xf32>
    tpu.vector_store %arg7[%c0_6, %c0_7], %7 {strides = array<i32>} : memref<8x128xf32, #tpu.memory_space<vmem>>, vector<8x128xf32>,
    %c3_i32 = arith.constant 3 : i32
    %9 = arith.cmpi eq, %arg2, %c3_i32 : i32
    %10 = arith.extui %9 : i1 to i32
    %c0_i32_8 = arith.constant 0 : i32
    %11 = arith.cmpi ne, %10, %c0_i32_8 : i32
    scf.if %11 {
      %c0_9 = arith.constant 0 : index
      %c0_10 = arith.constant 0 : index
      %12 = vector.load %arg7[%c0_9, %c0_10] : memref<8x128xf32, #tpu.memory_space<vmem>>, vector<8x128xf32>
      %c0_11 = arith.constant 0 : index
      %c0_12 = arith.constant 0 : index
      %13 = vector.load %arg5[%c0_11, %c0_12] : memref<1x128xf32, #tpu.memory_space<vmem>>, vector<1x128xf32>
      %14 = vector.broadcast %13 : vector<1x128xf32> to vector<8x128xf32>
      %15 = arith.addf %12, %14 : vector<8x128xf32>
      %cst_13 = arith.constant 0.000000e+00 : f32
      %16 = vector.broadcast %cst_13 : f32 to vector<8x128xf32>
      %17 = arith.cmpf oge, %15, %16 : vector<8x128xf32>
      %cst_14 = arith.constant 1.000000e-01 : f32
      %18 = vector.broadcast %cst_14 : f32 to vector<8x128xf32>
      %19 = arith.mulf %18, %15 : vector<8x128xf32>
      %20 = arith.select %17, %15, %19 : vector<8x128xi1>, vector<8x128xf32>
      %21 = arith.truncf %20 : vector<8x128xf32> to vector<8x128xbf16>
      %c0_15 = arith.constant 0 : index
      %c0_16 = arith.constant 0 : index
      %22 = vector.load %arg6[%c0_15, %c0_16] : memref<8x128xbf16, #tpu.memory_space<vmem>>, vector<8x128xbf16>
      tpu.vector_store %arg6[%c0_15, %c0_16], %21 {strides = array<i32>} : memref<8x128xbf16, #tpu.memory_space<vmem>>, vector<8x128xbf16>,
    } else {
    }
    return
  }
  func.func @transform_0(%arg0: i32, %arg1: i32, %arg2: i32) -> (i32, i32) {
    %c0_i32 = arith.constant 0 : i32
    return %arg0, %arg2 : i32, i32
  }
  func.func @transform_1(%arg0: i32, %arg1: i32, %arg2: i32) -> (i32, i32) {
    %c0_i32 = arith.constant 0 : i32
    return %arg2, %arg1 : i32, i32
  }
  func.func @transform_2(%arg0: i32, %arg1: i32, %arg2: i32) -> (i32, i32) {
    %c0_i32 = arith.constant 0 : i32
    %c0_i32_0 = arith.constant 0 : i32
    return %c0_i32, %arg1 : i32, i32
  }
  func.func @transform_3(%arg0: i32, %arg1: i32, %arg2: i32) -> (i32, i32) {
    %c0_i32 = arith.constant 0 : i32
    return %arg0, %arg1 : i32, i32
  }
}

module attributes {stable_mosaic.version = 11 : i64} {
  func.func @_self_attention_kernel(%arg0: i32, %arg1: memref<8x256xbf16, #tpu.memory_space<vmem>>, %arg2: memref<256x320xbf16, #tpu.memory_space<vmem>>, %arg3: memref<1x320xf32, #tpu.memory_space<vmem>>, %arg4: memref<1x1xf32, #tpu.memory_space<smem>>, %arg5: memref<8x256xf32, #tpu.memory_space<vmem>>) attributes {dimension_semantics = [#tpu.dimension_semantics<arbitrary>], iteration_bounds = array<i64: 1>, scalar_prefetch = 0 : i64, scratch_operands = 0 : i64, tpu.core_type = #tpu.core_type<tc>, window_params = [{pipeline_mode = #tpu.pipeline_mode<synchronous>, transform_indices = @transform_0, window_bounds = array<i64: 8, 256>}, {pipeline_mode = #tpu.pipeline_mode<synchronous>, transform_indices = @transform_1, window_bounds = array<i64: 256, 320>}, {pipeline_mode = #tpu.pipeline_mode<synchronous>, transform_indices = @transform_2, window_bounds = array<i64: 1, 320>}, {transform_indices = @transform_3, window_bounds = array<i64: 1, 1>}, {pipeline_mode = #tpu.pipeline_mode<synchronous>, transform_indices = @transform_4, window_bounds = array<i64: 8, 256>}]} {
    %c0 = arith.constant 0 : index
    %c0_0 = arith.constant 0 : index
    %0 = vector.load %arg1[%c0, %c0_0] : memref<8x256xbf16, #tpu.memory_space<vmem>>, vector<8x256xbf16>
    %c0_1 = arith.constant 0 : index
    %c0_2 = arith.constant 0 : index
    %1 = vector.load %arg2[%c0_1, %c0_2] : memref<256x320xbf16, #tpu.memory_space<vmem>>, vector<256x320xbf16>
    %cst = arith.constant dense<0.000000e+00> : vector<8x320xf32>
    %2 = tpu.matmul %0, %1, %cst {dimension_numbers = #tpu.dot_dimension_numbers<[1], [0], [0], [1], [0, 0, 1, 1], [], []>} : vector<8x256xbf16>, vector<256x320xbf16>, vector<8x320xf32> -> vector<8x320xf32>
    %c0_3 = arith.constant 0 : index
    %c0_4 = arith.constant 0 : index
    %3 = vector.load %arg3[%c0_3, %c0_4] : memref<1x320xf32, #tpu.memory_space<vmem>>, vector<1x320xf32>
    %4 = vector.broadcast %3 : vector<1x320xf32> to vector<8x320xf32>
    %5 = arith.addf %2, %4 : vector<8x320xf32>
    %6 = vector.extract_strided_slice %5 {offsets = [0, 0], sizes = [8, 32], strides = [1, 1]} : vector<8x320xf32> to vector<8x32xf32>
    %7 = vector.shape_cast %6 : vector<8x32xf32> to vector<2x4x32xf32>
    %8 = vector.extract_strided_slice %5 {offsets = [0, 32], sizes = [8, 32], strides = [1, 1]} : vector<8x320xf32> to vector<8x32xf32>
    %9 = vector.shape_cast %8 : vector<8x32xf32> to vector<2x4x32xf32>
    %10 = vector.extract_strided_slice %5 {offsets = [0, 64], sizes = [8, 256], strides = [1, 1]} : vector<8x320xf32> to vector<8x256xf32>
    %11 = vector.shape_cast %10 : vector<8x256xf32> to vector<2x4x256xf32>
    %cst_5 = arith.constant dense<0.000000e+00> : vector<2x4x4xf32>
    %12 = tpu.matmul %7, %9, %cst_5 {dimension_numbers = #tpu.dot_dimension_numbers<[2], [2], [1], [1], [0, 0, 0, 1, 1, 1], [0], [0]>} : vector<2x4x32xf32>, vector<2x4x32xf32>, vector<2x4x4xf32> -> vector<2x4x4xf32>
    %cst_6 = arith.constant dense<0xFF800000> : vector<2x4xf32>
    %13 = vector.multi_reduction <maximumf>, %12, %cst_6 [2] : vector<2x4x4xf32> to vector<2x4xf32>
    %14 = vector.shape_cast %13 : vector<2x4xf32> to vector<2x4x1xf32>
    %15 = vector.broadcast %14 : vector<2x4x1xf32> to vector<2x4x4xf32>
    %16 = arith.subf %12, %15 : vector<2x4x4xf32>
    %17 = math.exp %16 : vector<2x4x4xf32>
    %cst_7 = arith.constant dense<0.000000e+00> : vector<2x4xf32>
    %18 = vector.multi_reduction <add>, %17, %cst_7 [2] : vector<2x4x4xf32> to vector<2x4xf32>
    %19 = vector.shape_cast %18 : vector<2x4xf32> to vector<2x4x1xf32>
    %20 = vector.broadcast %19 : vector<2x4x1xf32> to vector<2x4x4xf32>
    %21 = arith.divf %17, %20 : vector<2x4x4xf32>
    %cst_8 = arith.constant dense<0.000000e+00> : vector<2x4x256xf32>
    %22 = tpu.matmul %21, %11, %cst_8 {dimension_numbers = #tpu.dot_dimension_numbers<[2], [1], [1], [2], [0, 0, 0, 1, 1, 2], [0], [0]>} : vector<2x4x4xf32>, vector<2x4x256xf32>, vector<2x4x256xf32> -> vector<2x4x256xf32>
    %c0_9 = arith.constant 0 : index
    %c0_10 = arith.constant 0 : index
    %23 = memref.load %arg4[%c0_9, %c0_10] : memref<1x1xf32, #tpu.memory_space<smem>>
    %24 = vector.shape_cast %22 : vector<2x4x256xf32> to vector<8x256xf32>
    %25 = vector.broadcast %23 : f32 to vector<8x256xf32>
    %26 = arith.mulf %25, %24 : vector<8x256xf32>
    %27 = arith.extf %0 : vector<8x256xbf16> to vector<8x256xf32>
    %28 = arith.addf %26, %27 : vector<8x256xf32>
    %c0_11 = arith.constant 0 : index
    %c0_12 = arith.constant 0 : index
    %29 = vector.load %arg5[%c0_11, %c0_12] : memref<8x256xf32, #tpu.memory_space<vmem>>, vector<8x256xf32>
    tpu.vector_store %arg5[%c0_11, %c0_12], %28 {strides = array<i32>} : memref<8x256xf32, #tpu.memory_space<vmem>>, vector<8x256xf32>,
    return
  }
  func.func @transform_0(%arg0: i32) -> (i32, i32) {
    %c0_i32 = arith.constant 0 : i32
    %c0_i32_0 = arith.constant 0 : i32
    %c0_i32_1 = arith.constant 0 : i32
    return %c0_i32, %c0_i32_0 : i32, i32
  }
  func.func @transform_1(%arg0: i32) -> (i32, i32) {
    %c0_i32 = arith.constant 0 : i32
    %c0_i32_0 = arith.constant 0 : i32
    %c0_i32_1 = arith.constant 0 : i32
    return %c0_i32, %c0_i32_0 : i32, i32
  }
  func.func @transform_2(%arg0: i32) -> (i32, i32) {
    %c0_i32 = arith.constant 0 : i32
    %c0_i32_0 = arith.constant 0 : i32
    %c0_i32_1 = arith.constant 0 : i32
    return %c0_i32, %c0_i32_0 : i32, i32
  }
  func.func @transform_3(%arg0: i32) -> (i32, i32) {
    %c0_i32 = arith.constant 0 : i32
    %c0_i32_0 = arith.constant 0 : i32
    %c0_i32_1 = arith.constant 0 : i32
    return %c0_i32, %c0_i32_0 : i32, i32
  }
  func.func @transform_4(%arg0: i32) -> (i32, i32) {
    %c0_i32 = arith.constant 0 : i32
    %c0_i32_0 = arith.constant 0 : i32
    %c0_i32_1 = arith.constant 0 : i32
    return %c0_i32, %c0_i32_0 : i32, i32
  }
}

module attributes {stable_mosaic.version = 11 : i64} {
  func.func @_fused_matmul_kernel(%arg0: i32, %arg1: i32, %arg2: i32, %arg3: memref<2x512xbf16, #tpu.memory_space<vmem>>, %arg4: memref<512x256xbf16, #tpu.memory_space<vmem>>, %arg5: memref<1x256xf32, #tpu.memory_space<vmem>>, %arg6: memref<2x256xbf16, #tpu.memory_space<vmem>>, %arg7: memref<2x256xf32, #tpu.memory_space<vmem>>) attributes {dimension_semantics = [#tpu.dimension_semantics<parallel>, #tpu.dimension_semantics<parallel>, #tpu.dimension_semantics<arbitrary>], iteration_bounds = array<i64: 1, 2, 8>, scalar_prefetch = 0 : i64, scratch_operands = 1 : i64, tpu.core_type = #tpu.core_type<tc>, window_params = [{transform_indices = @transform_0, window_bounds = array<i64: 2, 512>}, {transform_indices = @transform_1, window_bounds = array<i64: 512, 256>}, {transform_indices = @transform_2, window_bounds = array<i64: 1, 256>}, {transform_indices = @transform_3, window_bounds = array<i64: 2, 256>}]} {
    %c0_i32 = arith.constant 0 : i32
    %0 = arith.cmpi eq, %arg2, %c0_i32 : i32
    %1 = arith.extui %0 : i1 to i32
    %c0_i32_0 = arith.constant 0 : i32
    %2 = arith.cmpi ne, %1, %c0_i32_0 : i32
    scf.if %2 {
      %cst_9 = arith.constant 0.000000e+00 : f32
      %12 = vector.broadcast %cst_9 : f32 to vector<2x256xf32>
      %c0_10 = arith.constant 0 : index
      %c0_11 = arith.constant 0 : index
      %13 = vector.load %arg7[%c0_10, %c0_11] : memref<2x256xf32, #tpu.memory_space<vmem>>, vector<2x256xf32>
      tpu.vector_store %arg7[%c0_10, %c0_11], %12 {strides = array<i32>} : memref<2x256xf32, #tpu.memory_space<vmem>>, vector<2x256xf32>,
    } else {
    }
    %c0 = arith.constant 0 : index
    %c0_1 = arith.constant 0 : index
    %3 = vector.load %arg7[%c0, %c0_1] : memref<2x256xf32, #tpu.memory_space<vmem>>, vector<2x256xf32>
    %c0_2 = arith.constant 0 : index
    %c0_3 = arith.constant 0 : index
    %4 = vector.load %arg3[%c0_2, %c0_3] : memref<2x512xbf16, #tpu.memory_space<vmem>>, vector<2x512xbf16>
    %c0_4 = arith.constant 0 : index
    %c0_5 = arith.constant 0 : index
    %5 = vector.load %arg4[%c0_4, %c0_5] : memref<512x256xbf16, #tpu.memory_space<vmem>>, vector<512x256xbf16>
    %cst = arith.constant dense<0.000000e+00> : vector<2x256xf32>
    %6 = tpu.matmul %4, %5, %cst {dimension_numbers = #tpu.dot_dimension_numbers<[1], [0], [0], [1], [0, 0, 1, 1], [], []>} : vector<2x512xbf16>, vector<512x256xbf16>, vector<2x256xf32> -> vector<2x256xf32>
    %7 = arith.addf %3, %6 : vector<2x256xf32>
    %c0_6 = arith.constant 0 : index
    %c0_7 = arith.constant 0 : index
    %8 = vector.load %arg7[%c0_6, %c0_7] : memref<2x256xf32, #tpu.memory_space<vmem>>, vector<2x256xf32>
    tpu.vector_store %arg7[%c0_6, %c0_7], %7 {strides = array<i32>} : memref<2x256xf32, #tpu.memory_space<vmem>>, vector<2x256xf32>,
    %c7_i32 = arith.constant 7 : i32
    %9 = arith.cmpi eq, %arg2, %c7_i32 : i32
    %10 = arith.extui %9 : i1 to i32
    %c0_i32_8 = arith.constant 0 : i32
    %11 = arith.cmpi ne, %10, %c0_i32_8 : i32
    scf.if %11 {
      %c0_9 = arith.constant 0 : index
      %c0_10 = arith.constant 0 : index
      %12 = vector.load %arg7[%c0_9, %c0_10] : memref<2x256xf32, #tpu.memory_space<vmem>>, vector<2x256xf32>
      %c0_11 = arith.constant 0 : index
      %c0_12 = arith.constant 0 : index
      %13 = vector.load %arg5[%c0_11, %c0_12] : memref<1x256xf32, #tpu.memory_space<vmem>>, vector<1x256xf32>
      %14 = vector.broadcast %13 : vector<1x256xf32> to vector<2x256xf32>
      %15 = arith.addf %12, %14 : vector<2x256xf32>
      %cst_13 = arith.constant 0.000000e+00 : f32
      %16 = vector.broadcast %cst_13 : f32 to vector<2x256xf32>
      %17 = arith.cmpf oge, %15, %16 : vector<2x256xf32>
      %cst_14 = arith.constant 1.000000e-01 : f32
      %18 = vector.broadcast %cst_14 : f32 to vector<2x256xf32>
      %19 = arith.mulf %18, %15 : vector<2x256xf32>
      %20 = arith.select %17, %15, %19 : vector<2x256xi1>, vector<2x256xf32>
      %21 = arith.truncf %20 : vector<2x256xf32> to vector<2x256xbf16>
      %c0_15 = arith.constant 0 : index
      %c0_16 = arith.constant 0 : index
      %22 = vector.load %arg6[%c0_15, %c0_16] : memref<2x256xbf16, #tpu.memory_space<vmem>>, vector<2x256xbf16>
      tpu.vector_store %arg6[%c0_15, %c0_16], %21 {strides = array<i32>} : memref<2x256xbf16, #tpu.memory_space<vmem>>, vector<2x256xbf16>,
    } else {
    }
    return
  }
  func.func @transform_0(%arg0: i32, %arg1: i32, %arg2: i32) -> (i32, i32) {
    %c0_i32 = arith.constant 0 : i32
    return %arg0, %arg2 : i32, i32
  }
  func.func @transform_1(%arg0: i32, %arg1: i32, %arg2: i32) -> (i32, i32) {
    %c0_i32 = arith.constant 0 : i32
    return %arg2, %arg1 : i32, i32
  }
  func.func @transform_2(%arg0: i32, %arg1: i32, %arg2: i32) -> (i32, i32) {
    %c0_i32 = arith.constant 0 : i32
    %c0_i32_0 = arith.constant 0 : i32
    return %c0_i32, %arg1 : i32, i32
  }
  func.func @transform_3(%arg0: i32, %arg1: i32, %arg2: i32) -> (i32, i32) {
    %c0_i32 = arith.constant 0 : i32
    return %arg0, %arg1 : i32, i32
  }
}

module attributes {stable_mosaic.version = 11 : i64} {
  func.func @_fused_matmul_kernel(%arg0: i32, %arg1: i32, %arg2: i32, %arg3: memref<2x512xbf16, #tpu.memory_space<vmem>>, %arg4: memref<512x256xbf16, #tpu.memory_space<vmem>>, %arg5: memref<1x256xf32, #tpu.memory_space<vmem>>, %arg6: memref<2x256xf32, #tpu.memory_space<vmem>>, %arg7: memref<2x256xf32, #tpu.memory_space<vmem>>) attributes {dimension_semantics = [#tpu.dimension_semantics<parallel>, #tpu.dimension_semantics<parallel>, #tpu.dimension_semantics<arbitrary>], iteration_bounds = array<i64: 1, 2, 1>, scalar_prefetch = 0 : i64, scratch_operands = 1 : i64, tpu.core_type = #tpu.core_type<tc>, window_params = [{transform_indices = @transform_0, window_bounds = array<i64: 2, 512>}, {transform_indices = @transform_1, window_bounds = array<i64: 512, 256>}, {transform_indices = @transform_2, window_bounds = array<i64: 1, 256>}, {transform_indices = @transform_3, window_bounds = array<i64: 2, 256>}]} {
    %c0_i32 = arith.constant 0 : i32
    %0 = arith.cmpi eq, %arg2, %c0_i32 : i32
    %1 = arith.extui %0 : i1 to i32
    %c0_i32_0 = arith.constant 0 : i32
    %2 = arith.cmpi ne, %1, %c0_i32_0 : i32
    scf.if %2 {
      %cst_10 = arith.constant 0.000000e+00 : f32
      %12 = vector.broadcast %cst_10 : f32 to vector<2x256xf32>
      %c0_11 = arith.constant 0 : index
      %c0_12 = arith.constant 0 : index
      %13 = vector.load %arg7[%c0_11, %c0_12] : memref<2x256xf32, #tpu.memory_space<vmem>>, vector<2x256xf32>
      tpu.vector_store %arg7[%c0_11, %c0_12], %12 {strides = array<i32>} : memref<2x256xf32, #tpu.memory_space<vmem>>, vector<2x256xf32>,
    } else {
    }
    %c0 = arith.constant 0 : index
    %c0_1 = arith.constant 0 : index
    %3 = vector.load %arg7[%c0, %c0_1] : memref<2x256xf32, #tpu.memory_space<vmem>>, vector<2x256xf32>
    %c0_2 = arith.constant 0 : index
    %c0_3 = arith.constant 0 : index
    %4 = vector.load %arg3[%c0_2, %c0_3] : memref<2x512xbf16, #tpu.memory_space<vmem>>, vector<2x512xbf16>
    %c0_4 = arith.constant 0 : index
    %c0_5 = arith.constant 0 : index
    %5 = vector.load %arg4[%c0_4, %c0_5] : memref<512x256xbf16, #tpu.memory_space<vmem>>, vector<512x256xbf16>
    %cst = arith.constant dense<0.000000e+00> : vector<2x256xf32>
    %6 = tpu.matmul %4, %5, %cst {dimension_numbers = #tpu.dot_dimension_numbers<[1], [0], [0], [1], [0, 0, 1, 1], [], []>} : vector<2x512xbf16>, vector<512x256xbf16>, vector<2x256xf32> -> vector<2x256xf32>
    %7 = arith.addf %3, %6 : vector<2x256xf32>
    %c0_6 = arith.constant 0 : index
    %c0_7 = arith.constant 0 : index
    %8 = vector.load %arg7[%c0_6, %c0_7] : memref<2x256xf32, #tpu.memory_space<vmem>>, vector<2x256xf32>
    tpu.vector_store %arg7[%c0_6, %c0_7], %7 {strides = array<i32>} : memref<2x256xf32, #tpu.memory_space<vmem>>, vector<2x256xf32>,
    %c0_i32_8 = arith.constant 0 : i32
    %9 = arith.cmpi eq, %arg2, %c0_i32_8 : i32
    %10 = arith.extui %9 : i1 to i32
    %c0_i32_9 = arith.constant 0 : i32
    %11 = arith.cmpi ne, %10, %c0_i32_9 : i32
    scf.if %11 {
      %c0_10 = arith.constant 0 : index
      %c0_11 = arith.constant 0 : index
      %12 = vector.load %arg7[%c0_10, %c0_11] : memref<2x256xf32, #tpu.memory_space<vmem>>, vector<2x256xf32>
      %c0_12 = arith.constant 0 : index
      %c0_13 = arith.constant 0 : index
      %13 = vector.load %arg5[%c0_12, %c0_13] : memref<1x256xf32, #tpu.memory_space<vmem>>, vector<1x256xf32>
      %14 = vector.broadcast %13 : vector<1x256xf32> to vector<2x256xf32>
      %15 = arith.addf %12, %14 : vector<2x256xf32>
      %c0_14 = arith.constant 0 : index
      %c0_15 = arith.constant 0 : index
      %16 = vector.load %arg6[%c0_14, %c0_15] : memref<2x256xf32, #tpu.memory_space<vmem>>, vector<2x256xf32>
      tpu.vector_store %arg6[%c0_14, %c0_15], %15 {strides = array<i32>} : memref<2x256xf32, #tpu.memory_space<vmem>>, vector<2x256xf32>,
    } else {
    }
    return
  }
  func.func @transform_0(%arg0: i32, %arg1: i32, %arg2: i32) -> (i32, i32) {
    %c0_i32 = arith.constant 0 : i32
    return %arg0, %arg2 : i32, i32
  }
  func.func @transform_1(%arg0: i32, %arg1: i32, %arg2: i32) -> (i32, i32) {
    %c0_i32 = arith.constant 0 : i32
    return %arg2, %arg1 : i32, i32
  }
  func.func @transform_2(%arg0: i32, %arg1: i32, %arg2: i32) -> (i32, i32) {
    %c0_i32 = arith.constant 0 : i32
    %c0_i32_0 = arith.constant 0 : i32
    return %c0_i32, %arg1 : i32, i32
  }
  func.func @transform_3(%arg0: i32, %arg1: i32, %arg2: i32) -> (i32, i32) {
    %c0_i32 = arith.constant 0 : i32
    return %arg0, %arg1 : i32, i32
  }
}

module attributes {stable_mosaic.version = 11 : i64} {
  func.func @_fused_matmul_kernel(%arg0: i32, %arg1: i32, %arg2: i32, %arg3: memref<2x512xbf16, #tpu.memory_space<vmem>>, %arg4: memref<512x512xbf16, #tpu.memory_space<vmem>>, %arg5: memref<1x512xf32, #tpu.memory_space<vmem>>, %arg6: memref<2x512xf32, #tpu.memory_space<vmem>>, %arg7: memref<2x512xf32, #tpu.memory_space<vmem>>) attributes {dimension_semantics = [#tpu.dimension_semantics<parallel>, #tpu.dimension_semantics<parallel>, #tpu.dimension_semantics<arbitrary>], iteration_bounds = array<i64: 1, 2, 9>, scalar_prefetch = 0 : i64, scratch_operands = 1 : i64, tpu.core_type = #tpu.core_type<tc>, window_params = [{transform_indices = @transform_0, window_bounds = array<i64: 2, 512>}, {transform_indices = @transform_1, window_bounds = array<i64: 512, 512>}, {transform_indices = @transform_2, window_bounds = array<i64: 1, 512>}, {transform_indices = @transform_3, window_bounds = array<i64: 2, 512>}]} {
    %c0_i32 = arith.constant 0 : i32
    %0 = arith.cmpi eq, %arg2, %c0_i32 : i32
    %1 = arith.extui %0 : i1 to i32
    %c0_i32_0 = arith.constant 0 : i32
    %2 = arith.cmpi ne, %1, %c0_i32_0 : i32
    scf.if %2 {
      %cst_9 = arith.constant 0.000000e+00 : f32
      %12 = vector.broadcast %cst_9 : f32 to vector<2x512xf32>
      %c0_10 = arith.constant 0 : index
      %c0_11 = arith.constant 0 : index
      %13 = vector.load %arg7[%c0_10, %c0_11] : memref<2x512xf32, #tpu.memory_space<vmem>>, vector<2x512xf32>
      tpu.vector_store %arg7[%c0_10, %c0_11], %12 {strides = array<i32>} : memref<2x512xf32, #tpu.memory_space<vmem>>, vector<2x512xf32>,
    } else {
    }
    %c0 = arith.constant 0 : index
    %c0_1 = arith.constant 0 : index
    %3 = vector.load %arg7[%c0, %c0_1] : memref<2x512xf32, #tpu.memory_space<vmem>>, vector<2x512xf32>
    %c0_2 = arith.constant 0 : index
    %c0_3 = arith.constant 0 : index
    %4 = vector.load %arg3[%c0_2, %c0_3] : memref<2x512xbf16, #tpu.memory_space<vmem>>, vector<2x512xbf16>
    %c0_4 = arith.constant 0 : index
    %c0_5 = arith.constant 0 : index
    %5 = vector.load %arg4[%c0_4, %c0_5] : memref<512x512xbf16, #tpu.memory_space<vmem>>, vector<512x512xbf16>
    %cst = arith.constant dense<0.000000e+00> : vector<2x512xf32>
    %6 = tpu.matmul %4, %5, %cst {dimension_numbers = #tpu.dot_dimension_numbers<[1], [0], [0], [1], [0, 0, 1, 1], [], []>} : vector<2x512xbf16>, vector<512x512xbf16>, vector<2x512xf32> -> vector<2x512xf32>
    %7 = arith.addf %3, %6 : vector<2x512xf32>
    %c0_6 = arith.constant 0 : index
    %c0_7 = arith.constant 0 : index
    %8 = vector.load %arg7[%c0_6, %c0_7] : memref<2x512xf32, #tpu.memory_space<vmem>>, vector<2x512xf32>
    tpu.vector_store %arg7[%c0_6, %c0_7], %7 {strides = array<i32>} : memref<2x512xf32, #tpu.memory_space<vmem>>, vector<2x512xf32>,
    %c8_i32 = arith.constant 8 : i32
    %9 = arith.cmpi eq, %arg2, %c8_i32 : i32
    %10 = arith.extui %9 : i1 to i32
    %c0_i32_8 = arith.constant 0 : i32
    %11 = arith.cmpi ne, %10, %c0_i32_8 : i32
    scf.if %11 {
      %c0_9 = arith.constant 0 : index
      %c0_10 = arith.constant 0 : index
      %12 = vector.load %arg7[%c0_9, %c0_10] : memref<2x512xf32, #tpu.memory_space<vmem>>, vector<2x512xf32>
      %c0_11 = arith.constant 0 : index
      %c0_12 = arith.constant 0 : index
      %13 = vector.load %arg5[%c0_11, %c0_12] : memref<1x512xf32, #tpu.memory_space<vmem>>, vector<1x512xf32>
      %14 = vector.broadcast %13 : vector<1x512xf32> to vector<2x512xf32>
      %15 = arith.addf %12, %14 : vector<2x512xf32>
      %c0_13 = arith.constant 0 : index
      %c0_14 = arith.constant 0 : index
      %16 = vector.load %arg6[%c0_13, %c0_14] : memref<2x512xf32, #tpu.memory_space<vmem>>, vector<2x512xf32>
      tpu.vector_store %arg6[%c0_13, %c0_14], %15 {strides = array<i32>} : memref<2x512xf32, #tpu.memory_space<vmem>>, vector<2x512xf32>,
    } else {
    }
    return
  }
  func.func @transform_0(%arg0: i32, %arg1: i32, %arg2: i32) -> (i32, i32) {
    %c0_i32 = arith.constant 0 : i32
    return %arg0, %arg2 : i32, i32
  }
  func.func @transform_1(%arg0: i32, %arg1: i32, %arg2: i32) -> (i32, i32) {
    %c0_i32 = arith.constant 0 : i32
    return %arg2, %arg1 : i32, i32
  }
  func.func @transform_2(%arg0: i32, %arg1: i32, %arg2: i32) -> (i32, i32) {
    %c0_i32 = arith.constant 0 : i32
    %c0_i32_0 = arith.constant 0 : i32
    return %c0_i32, %arg1 : i32, i32
  }
  func.func @transform_3(%arg0: i32, %arg1: i32, %arg2: i32) -> (i32, i32) {
    %c0_i32 = arith.constant 0 : i32
    return %arg0, %arg1 : i32, i32
  }
}

module attributes {stable_mosaic.version = 11 : i64} {
  func.func @_fused_matmul_kernel(%arg0: i32, %arg1: i32, %arg2: i32, %arg3: memref<8x512xbf16, #tpu.memory_space<vmem>>, %arg4: memref<512x256xbf16, #tpu.memory_space<vmem>>, %arg5: memref<1x256xf32, #tpu.memory_space<vmem>>, %arg6: memref<8x256xf32, #tpu.memory_space<vmem>>, %arg7: memref<8x256xf32, #tpu.memory_space<vmem>>) attributes {dimension_semantics = [#tpu.dimension_semantics<parallel>, #tpu.dimension_semantics<parallel>, #tpu.dimension_semantics<arbitrary>], iteration_bounds = array<i64: 1, 2, 5>, scalar_prefetch = 0 : i64, scratch_operands = 1 : i64, tpu.core_type = #tpu.core_type<tc>, window_params = [{transform_indices = @transform_0, window_bounds = array<i64: 8, 512>}, {transform_indices = @transform_1, window_bounds = array<i64: 512, 256>}, {transform_indices = @transform_2, window_bounds = array<i64: 1, 256>}, {transform_indices = @transform_3, window_bounds = array<i64: 8, 256>}]} {
    %c0_i32 = arith.constant 0 : i32
    %0 = arith.cmpi eq, %arg2, %c0_i32 : i32
    %1 = arith.extui %0 : i1 to i32
    %c0_i32_0 = arith.constant 0 : i32
    %2 = arith.cmpi ne, %1, %c0_i32_0 : i32
    scf.if %2 {
      %cst_9 = arith.constant 0.000000e+00 : f32
      %12 = vector.broadcast %cst_9 : f32 to vector<8x256xf32>
      %c0_10 = arith.constant 0 : index
      %c0_11 = arith.constant 0 : index
      %13 = vector.load %arg7[%c0_10, %c0_11] : memref<8x256xf32, #tpu.memory_space<vmem>>, vector<8x256xf32>
      tpu.vector_store %arg7[%c0_10, %c0_11], %12 {strides = array<i32>} : memref<8x256xf32, #tpu.memory_space<vmem>>, vector<8x256xf32>,
    } else {
    }
    %c0 = arith.constant 0 : index
    %c0_1 = arith.constant 0 : index
    %3 = vector.load %arg7[%c0, %c0_1] : memref<8x256xf32, #tpu.memory_space<vmem>>, vector<8x256xf32>
    %c0_2 = arith.constant 0 : index
    %c0_3 = arith.constant 0 : index
    %4 = vector.load %arg3[%c0_2, %c0_3] : memref<8x512xbf16, #tpu.memory_space<vmem>>, vector<8x512xbf16>
    %c0_4 = arith.constant 0 : index
    %c0_5 = arith.constant 0 : index
    %5 = vector.load %arg4[%c0_4, %c0_5] : memref<512x256xbf16, #tpu.memory_space<vmem>>, vector<512x256xbf16>
    %cst = arith.constant dense<0.000000e+00> : vector<8x256xf32>
    %6 = tpu.matmul %4, %5, %cst {dimension_numbers = #tpu.dot_dimension_numbers<[1], [0], [0], [1], [0, 0, 1, 1], [], []>} : vector<8x512xbf16>, vector<512x256xbf16>, vector<8x256xf32> -> vector<8x256xf32>
    %7 = arith.addf %3, %6 : vector<8x256xf32>
    %c0_6 = arith.constant 0 : index
    %c0_7 = arith.constant 0 : index
    %8 = vector.load %arg7[%c0_6, %c0_7] : memref<8x256xf32, #tpu.memory_space<vmem>>, vector<8x256xf32>
    tpu.vector_store %arg7[%c0_6, %c0_7], %7 {strides = array<i32>} : memref<8x256xf32, #tpu.memory_space<vmem>>, vector<8x256xf32>,
    %c4_i32 = arith.constant 4 : i32
    %9 = arith.cmpi eq, %arg2, %c4_i32 : i32
    %10 = arith.extui %9 : i1 to i32
    %c0_i32_8 = arith.constant 0 : i32
    %11 = arith.cmpi ne, %10, %c0_i32_8 : i32
    scf.if %11 {
      %c0_9 = arith.constant 0 : index
      %c0_10 = arith.constant 0 : index
      %12 = vector.load %arg7[%c0_9, %c0_10] : memref<8x256xf32, #tpu.memory_space<vmem>>, vector<8x256xf32>
      %c0_11 = arith.constant 0 : index
      %c0_12 = arith.constant 0 : index
      %13 = vector.load %arg5[%c0_11, %c0_12] : memref<1x256xf32, #tpu.memory_space<vmem>>, vector<1x256xf32>
      %14 = vector.broadcast %13 : vector<1x256xf32> to vector<8x256xf32>
      %15 = arith.addf %12, %14 : vector<8x256xf32>
      %c0_13 = arith.constant 0 : index
      %c0_14 = arith.constant 0 : index
      %16 = vector.load %arg6[%c0_13, %c0_14] : memref<8x256xf32, #tpu.memory_space<vmem>>, vector<8x256xf32>
      tpu.vector_store %arg6[%c0_13, %c0_14], %15 {strides = array<i32>} : memref<8x256xf32, #tpu.memory_space<vmem>>, vector<8x256xf32>,
    } else {
    }
    return
  }
  func.func @transform_0(%arg0: i32, %arg1: i32, %arg2: i32) -> (i32, i32) {
    %c0_i32 = arith.constant 0 : i32
    return %arg0, %arg2 : i32, i32
  }
  func.func @transform_1(%arg0: i32, %arg1: i32, %arg2: i32) -> (i32, i32) {
    %c0_i32 = arith.constant 0 : i32
    return %arg2, %arg1 : i32, i32
  }
  func.func @transform_2(%arg0: i32, %arg1: i32, %arg2: i32) -> (i32, i32) {
    %c0_i32 = arith.constant 0 : i32
    %c0_i32_0 = arith.constant 0 : i32
    return %c0_i32, %arg1 : i32, i32
  }
  func.func @transform_3(%arg0: i32, %arg1: i32, %arg2: i32) -> (i32, i32) {
    %c0_i32 = arith.constant 0 : i32
    return %arg0, %arg1 : i32, i32
  }
}

module attributes {stable_mosaic.version = 11 : i64} {
  func.func @_fused_matmul_kernel(%arg0: i32, %arg1: i32, %arg2: i32, %arg3: memref<32x384xbf16, #tpu.memory_space<vmem>>, %arg4: memref<384x128xbf16, #tpu.memory_space<vmem>>, %arg5: memref<1x128xf32, #tpu.memory_space<vmem>>, %arg6: memref<32x128xf32, #tpu.memory_space<vmem>>, %arg7: memref<32x128xf32, #tpu.memory_space<vmem>>) attributes {dimension_semantics = [#tpu.dimension_semantics<parallel>, #tpu.dimension_semantics<parallel>, #tpu.dimension_semantics<arbitrary>], iteration_bounds = array<i64: 1, 2, 3>, scalar_prefetch = 0 : i64, scratch_operands = 1 : i64, tpu.core_type = #tpu.core_type<tc>, window_params = [{transform_indices = @transform_0, window_bounds = array<i64: 32, 384>}, {transform_indices = @transform_1, window_bounds = array<i64: 384, 128>}, {transform_indices = @transform_2, window_bounds = array<i64: 1, 128>}, {transform_indices = @transform_3, window_bounds = array<i64: 32, 128>}]} {
    %c0_i32 = arith.constant 0 : i32
    %0 = arith.cmpi eq, %arg2, %c0_i32 : i32
    %1 = arith.extui %0 : i1 to i32
    %c0_i32_0 = arith.constant 0 : i32
    %2 = arith.cmpi ne, %1, %c0_i32_0 : i32
    scf.if %2 {
      %cst_9 = arith.constant 0.000000e+00 : f32
      %12 = vector.broadcast %cst_9 : f32 to vector<32x128xf32>
      %c0_10 = arith.constant 0 : index
      %c0_11 = arith.constant 0 : index
      %13 = vector.load %arg7[%c0_10, %c0_11] : memref<32x128xf32, #tpu.memory_space<vmem>>, vector<32x128xf32>
      tpu.vector_store %arg7[%c0_10, %c0_11], %12 {strides = array<i32>} : memref<32x128xf32, #tpu.memory_space<vmem>>, vector<32x128xf32>,
    } else {
    }
    %c0 = arith.constant 0 : index
    %c0_1 = arith.constant 0 : index
    %3 = vector.load %arg7[%c0, %c0_1] : memref<32x128xf32, #tpu.memory_space<vmem>>, vector<32x128xf32>
    %c0_2 = arith.constant 0 : index
    %c0_3 = arith.constant 0 : index
    %4 = vector.load %arg3[%c0_2, %c0_3] : memref<32x384xbf16, #tpu.memory_space<vmem>>, vector<32x384xbf16>
    %c0_4 = arith.constant 0 : index
    %c0_5 = arith.constant 0 : index
    %5 = vector.load %arg4[%c0_4, %c0_5] : memref<384x128xbf16, #tpu.memory_space<vmem>>, vector<384x128xbf16>
    %cst = arith.constant dense<0.000000e+00> : vector<32x128xf32>
    %6 = tpu.matmul %4, %5, %cst {dimension_numbers = #tpu.dot_dimension_numbers<[1], [0], [0], [1], [0, 0, 1, 1], [], []>} : vector<32x384xbf16>, vector<384x128xbf16>, vector<32x128xf32> -> vector<32x128xf32>
    %7 = arith.addf %3, %6 : vector<32x128xf32>
    %c0_6 = arith.constant 0 : index
    %c0_7 = arith.constant 0 : index
    %8 = vector.load %arg7[%c0_6, %c0_7] : memref<32x128xf32, #tpu.memory_space<vmem>>, vector<32x128xf32>
    tpu.vector_store %arg7[%c0_6, %c0_7], %7 {strides = array<i32>} : memref<32x128xf32, #tpu.memory_space<vmem>>, vector<32x128xf32>,
    %c2_i32 = arith.constant 2 : i32
    %9 = arith.cmpi eq, %arg2, %c2_i32 : i32
    %10 = arith.extui %9 : i1 to i32
    %c0_i32_8 = arith.constant 0 : i32
    %11 = arith.cmpi ne, %10, %c0_i32_8 : i32
    scf.if %11 {
      %c0_9 = arith.constant 0 : index
      %c0_10 = arith.constant 0 : index
      %12 = vector.load %arg7[%c0_9, %c0_10] : memref<32x128xf32, #tpu.memory_space<vmem>>, vector<32x128xf32>
      %c0_11 = arith.constant 0 : index
      %c0_12 = arith.constant 0 : index
      %13 = vector.load %arg5[%c0_11, %c0_12] : memref<1x128xf32, #tpu.memory_space<vmem>>, vector<1x128xf32>
      %14 = vector.broadcast %13 : vector<1x128xf32> to vector<32x128xf32>
      %15 = arith.addf %12, %14 : vector<32x128xf32>
      %c0_13 = arith.constant 0 : index
      %c0_14 = arith.constant 0 : index
      %16 = vector.load %arg6[%c0_13, %c0_14] : memref<32x128xf32, #tpu.memory_space<vmem>>, vector<32x128xf32>
      tpu.vector_store %arg6[%c0_13, %c0_14], %15 {strides = array<i32>} : memref<32x128xf32, #tpu.memory_space<vmem>>, vector<32x128xf32>,
    } else {
    }
    return
  }
  func.func @transform_0(%arg0: i32, %arg1: i32, %arg2: i32) -> (i32, i32) {
    %c0_i32 = arith.constant 0 : i32
    return %arg0, %arg2 : i32, i32
  }
  func.func @transform_1(%arg0: i32, %arg1: i32, %arg2: i32) -> (i32, i32) {
    %c0_i32 = arith.constant 0 : i32
    return %arg2, %arg1 : i32, i32
  }
  func.func @transform_2(%arg0: i32, %arg1: i32, %arg2: i32) -> (i32, i32) {
    %c0_i32 = arith.constant 0 : i32
    %c0_i32_0 = arith.constant 0 : i32
    return %c0_i32, %arg1 : i32, i32
  }
  func.func @transform_3(%arg0: i32, %arg1: i32, %arg2: i32) -> (i32, i32) {
    %c0_i32 = arith.constant 0 : i32
    return %arg0, %arg1 : i32, i32
  }
}

</mosaic_0001>

<bundles_post_ra>
// kernel: forward.9
= control target key start
LH: loop header
LB: loop body
LE: loop exit
PB: predicated region body
PF: predicated region fallthrough
CT: control target
= control target key end

     0   :  { %vm131_vm0 = vcmask 392192   ;;  %s595_s1 = inlined_call_operand.vmem [shape: bf16[48,128], index: 1, kind: input, shape index: {}]   ;;  %s596_s0 = inlined_call_operand.vmem [shape: bf16[128,48], index: 0, kind: input, shape index: {}]   ;;  %s597_s2 = inlined_call_operand.vmem [shape: f32[1,128], index: 2, kind: input, shape index: {}]   ;;  %s598_s3 = inlined_call_operand.vmem [shape: f32[128,128], index: 3, kind: output, shape index: {}]  }
   0x1   :  { %v454_v0 = vld [vmem:[%s595_s1] sm:$0xff]   ;;  %v455_v1 = vld [vmem:[%s595_s1 + $0x8] sm:$0xff]   ;;  %v456_v2 = vld [vmem:[%s595_s1 + $0x10] sm:$0xff]  }
   0x2   :  { %426 = vmatprep.subr.bf16.mxu0 %v454_v0  ;;  %448 = vmatprep.subr.bf16.mxu1 %v454_v0  ;;  %v457_v3 = vld [vmem:[%s596_s0] sm:$0xff]   ;;  %v459_v5 = vld [vmem:[%s596_s0 + $0x8] sm:$0xff]   ;;  %v461_v7 = vld [vmem:[%s596_s0 + $0x10] sm:$0xff]  }
   0x3   :  { %427 = vmatpush3.bf16.msra.mxu0 %v454_v0  ;;  %451 = vmatpush3.bf16.msra.mxu1 %v454_v0  ;;  %v458_v4 = vld [vmem:[%s596_s0 + $0x20] sm:$0xff]   ;;  %v460_v6 = vld [vmem:[%s596_s0 + $0x28] sm:$0xff]   ;;  %v462_v8 = vld [vmem:[%s596_s0 + $0x30] sm:$0xff]  }
   0x4   :  { %428 = vmatprep.subr.bf16.mxu0 %v455_v1  ;;  %449 = vmatprep.subr.bf16.mxu1 %v455_v1  ;;  %v463_v9 = vld [vmem:[%s596_s0 + $0x18] sm:$0xff]   ;;  %v529_v11 = vld [vmem:[%s597_s2] ss:$0 sm:$0xff] }
   0x5   :  { %432 = vmatprep.mubr.msk.bf16.mxu0 %vm131_vm0, %v457_v3  ;;  %440 = vmatprep.mubr.msk.bf16.mxu1 %vm131_vm0, %v458_v4  ;;  %v464_v10 = vld [vmem:[%s596_s0 + $0x38] sm:$0xff]  }
   0x7   :  { %429 = vmatpush3.bf16.msra.mxu0 %v455_v1  ;;  %452 = vmatpush3.bf16.msra.mxu1 %v455_v1 }
   0x8   :  { %430 = vmatprep.subr.bf16.mxu0 %v456_v2  ;;  %450 = vmatprep.subr.bf16.mxu1 %v456_v2 }
   0xb   :  { %431 = vmatpush3.bf16.msra.mxu0 %v456_v2  ;;  %453 = vmatpush3.bf16.msra.mxu1 %v456_v2 }
   0xe   :  { %433 = vmatmul.mubr.msk.bf16.vlgmr.msra.gmra.mrb[0].mxu0 %vm131_vm0, %v459_v5  ;;  %441 = vmatmul.mubr.msk.bf16.vlgmr.msra.gmra.mrb[0].mxu1 %vm131_vm0, %v460_v6 }
   0xf   :  { %436 = vmatprep.mubr.msk.bf16.mxu0 %vm131_vm0, %v461_v7  ;;  %444 = vmatprep.mubr.msk.bf16.mxu1 %vm131_vm0, %v462_v8 }
  0x16   :  { %437 = vmatmul.mubr.msk.bf16.gmra.mrb[4].mxu0 %vm131_vm0, %v463_v9  ;;  %445 = vmatmul.mubr.msk.bf16.gmra.mrb[4].mxu1 %vm131_vm0, %v464_v10 }
  0xe1   :  { %v434_v12 = vpop.f32.mrb[0].mxu0  ;;  %v442_v13 = vpop.f32.mrb[0].mxu1 }
  0xe2   :  { %v313_v14 = vadd.f32 %v434_v12, %v529_v11  ;;  %v321_v15 = vadd.f32 %v442_v13, %v529_v11  ;;  %v190_v16 = vpop.f32.mrb[1].mxu0  ;;  %v222_v17 = vpop.f32.mrb[1].mxu1 }
  0xe3   :  { %v311_v18 = vadd.f32 %v529_v11, %v190_v16  ;;  %v319_v19 = vadd.f32 %v529_v11, %v222_v17  ;;  %v435_v20 = vpop.f32.mrb[2].mxu0  ;;  %v443_v21 = vpop.f32.mrb[2].mxu1 }
  0xe4   :  { %vm329_vm1 = vcmp.ge.f32.partialorder %v313_v14, 0.0  ;;  %v345_v22 = vmul.f32 0.1, %v313_v14  ;;  %vm337_vm2 = vcmp.ge.f32.partialorder %v321_v15, 0.0  ;;  %v353_v23 = vmul.f32 0.1, %v321_v15 }
  0xe5   :  { %vm327_vm3 = vcmp.ge.f32.partialorder %v311_v18, 0.0  ;;  %v343_v24 = vmul.f32 0.1, %v311_v18  ;;  %vm335_vm4 = vcmp.ge.f32.partialorder %v319_v19, 0.0  ;;  %v351_v25 = vmul.f32 0.1, %v319_v19 }
  0xe6   :  { %v361_v26 = vsel %vm329_vm1, %v313_v14, %v345_v22  ;;  %v369_v27 = vsel %vm337_vm2, %v321_v15, %v353_v23  ;;  %v314_v28 = vadd.f32 %v435_v20, %v529_v11  ;;  %v322_v29 = vadd.f32 %v443_v21, %v529_v11  ;;  %v193_v30 = vpop.f32.mrb[3].mxu0  ;;  %v225_v31 = vpop.f32.mrb[3].mxu1 }
  0xe7   :  { %377 = vst [vmem:[%s598_s3 + $0x10] sm:$0xff] %v361_v26  ;;  %385 = vst [vmem:[%s598_s3 + $0x50] sm:$0xff] %v369_v27  ;;  %v359_v32 = vsel %vm327_vm3, %v311_v18, %v343_v24  ;;  %v367_v33 = vsel %vm335_vm4, %v319_v19, %v351_v25  ;;  %v312_v34 = vadd.f32 %v529_v11, %v193_v30 }
  0xe8   :  { %v320_v35 = vadd.f32 %v529_v11, %v225_v31  ;;  %375 = vst [vmem:[%s598_s3] sm:$0xff] %v359_v32  ;;  %383 = vst [vmem:[%s598_s3 + $0x40] sm:$0xff] %v367_v33  ;;  %vm330_vm5 = vcmp.ge.f32.partialorder %v314_v28, 0.0  ;;  %v346_v36 = vmul.f32 0.1, %v314_v28  ;;  %vm338_vm6 = vcmp.ge.f32.partialorder %v322_v29, 0.0 }
  0xe9   :  { %v354_v37 = vmul.f32 0.1, %v322_v29  ;;  %vm328_vm7 = vcmp.ge.f32.partialorder %v312_v34, 0.0  ;;  %v344_v38 = vmul.f32 0.1, %v312_v34  ;;  %v438_v42 = vpop.f32.mrb[4].mxu0 }
  0xea   :  { %vm336_vm8 = vcmp.ge.f32.partialorder %v320_v35, 0.0  ;;  %v352_v39 = vmul.f32 0.1, %v320_v35  ;;  %v362_v40 = vsel %vm330_vm5, %v314_v28, %v346_v36  ;;  %v446_v43 = vpop.f32.mrb[4].mxu1  ;;  %v317_v46 = vadd.f32 %v438_v42, %v529_v11  ;;  %v206_v48 = vpop.f32.mrb[5].mxu0 }
  0xeb   :  { %v370_v41 = vsel %vm338_vm6, %v322_v29, %v354_v37  ;;  %378 = vst [vmem:[%s598_s3 + $0x18] sm:$0xff] %v362_v40  ;;  %v360_v44 = vsel %vm328_vm7, %v312_v34, %v344_v38  ;;  %v325_v47 = vadd.f32 %v446_v43, %v529_v11  ;;  %v238_v49 = vpop.f32.mrb[5].mxu1  ;;  %v315_v50 = vadd.f32 %v529_v11, %v206_v48  ;;  %v439_v52 = vpop.f32.mrb[6].mxu0 }
  0xec   :  { %386 = vst [vmem:[%s598_s3 + $0x58] sm:$0xff] %v370_v41  ;;  %v368_v45 = vsel %vm336_vm8, %v320_v35, %v352_v39  ;;  %376 = vst [vmem:[%s598_s3 + $0x8] sm:$0xff] %v360_v44  ;;  %v323_v51 = vadd.f32 %v529_v11, %v238_v49  ;;  %v447_v53 = vpop.f32.mrb[6].mxu1  ;;  %vm333_vm9 = vcmp.ge.f32.partialorder %v317_v46, 0.0  ;;  %v349_v54 = vmul.f32 0.1, %v317_v46 }
  0xed   :  { %384 = vst [vmem:[%s598_s3 + $0x48] sm:$0xff] %v368_v45  ;;  %vm341_vm10 = vcmp.ge.f32.partialorder %v325_v47, 0.0  ;;  %v357_v55 = vmul.f32 0.1, %v325_v47  ;;  %vm331_vm11 = vcmp.ge.f32.partialorder %v315_v50, 0.0  ;;  %v318_v60 = vadd.f32 %v439_v52, %v529_v11  ;;  %v209_v62 = vpop.f32.mrb[7].mxu0 }
  0xee   :  { %v347_v56 = vmul.f32 0.1, %v315_v50  ;;  %vm339_vm12 = vcmp.ge.f32.partialorder %v323_v51, 0.0  ;;  %v355_v57 = vmul.f32 0.1, %v323_v51  ;;  %v365_v58 = vsel %vm333_vm9, %v317_v46, %v349_v54  ;;  %v241_v63 = vpop.f32.mrb[7].mxu1 }
  0xef   :  { %v373_v59 = vsel %vm341_vm10, %v325_v47, %v357_v55  ;;  %v326_v61 = vadd.f32 %v447_v53, %v529_v11  ;;  %381 = vst [vmem:[%s598_s3 + $0x30] sm:$0xff] %v365_v58  ;;  %v316_v2 = vadd.f32 %v529_v11, %v209_v62  ;;  %v324_v3 = vadd.f32 %v529_v11, %v241_v63 }
  0xf0   :  { %389 = vst [vmem:[%s598_s3 + $0x70] sm:$0xff] %v373_v59  ;;  %v363_v0 = vsel %vm331_vm11, %v315_v50, %v347_v56  ;;  %v371_v1 = vsel %vm339_vm12, %v323_v51, %v355_v57  ;;  %vm334_vm13 = vcmp.ge.f32.partialorder %v318_v60, 0.0  ;;  %v350_v4 = vmul.f32 0.1, %v318_v60 }
  0xf1   :  { %379 = vst [vmem:[%s598_s3 + $0x20] sm:$0xff] %v363_v0  ;;  %387 = vst [vmem:[%s598_s3 + $0x60] sm:$0xff] %v371_v1  ;;  %vm342_vm14 = vcmp.ge.f32.partialorder %v326_v61, 0.0  ;;  %v358_v5 = vmul.f32 0.1, %v326_v61  ;;  %vm332_vm15 = vcmp.ge.f32.partialorder %v316_v2, 0.0 }
  0xf2   :  { %v348_v6 = vmul.f32 0.1, %v316_v2  ;;  %vm340_vm0 = vcmp.ge.f32.partialorder %v324_v3, 0.0  ;;  %v356_v7 = vmul.f32 0.1, %v324_v3  ;;  %v366_v8 = vsel %vm334_vm13, %v318_v60, %v350_v4 }
  0xf3   :  { %v374_v9 = vsel %vm342_vm14, %v326_v61, %v358_v5  ;;  %382 = vst [vmem:[%s598_s3 + $0x38] sm:$0xff] %v366_v8 }
  0xf4   :  { %390 = vst [vmem:[%s598_s3 + $0x78] sm:$0xff] %v374_v9  ;;  %v364_v10 = vsel %vm332_vm15, %v316_v2, %v348_v6  ;;  %v372_v11 = vsel %vm340_vm0, %v324_v3, %v356_v7 }
  0xf5   :  { %380 = vst [vmem:[%s598_s3 + $0x28] sm:$0xff] %v364_v10  ;;  %388 = vst [vmem:[%s598_s3 + $0x68] sm:$0xff] %v372_v11 }

// kernel: forward.10
= control target key start
LH: loop header
LB: loop body
LE: loop exit
PB: predicated region body
PF: predicated region fallthrough
CT: control target
= control target key end

     0   :  { %s1117_s12 = smov 0   ;;  %s1119_s13 = smov 0   ;;  %s1243_s0 = inlined_call_operand.vmem [shape: bf16[32,1024], index: 0, kind: input, shape index: {}]   ;;  %s1244_s1 = inlined_call_operand.vmem [shape: bf16[1024,128], index: 1, kind: input, shape index: {}]   ;;  %s1245_s2 = inlined_call_operand.vmem [shape: f32[1,128], index: 2, kind: input, shape index: {}]   ;;  %s1246_s3 = inlined_call_operand.vmem [shape: f32[32,128], index: 3, kind: output, shape index: {}]  }
   0x1   :  { %s1121_s14 = smov 0   ;;  %s1123_s15 = smov 0  }
   0x2   :  { %s1125_s16 = smov 0  }
   0x3 LB: > { %s25_s17 = sadd.s32 1, %s1090_s15  ;;  %p48_p1 = scmp.ne.s32.totalorder %s1082_s13, %s1078_s12  ;;  %s1094_s16 = sphi %s1125_s16, %s13_s16   ;;  %s1090_s15 = sphi %s1123_s15, %s1250_s15   ;;  %s1086_s14 = sphi %s1121_s14, %s1249_s14   ;;  %s1082_s13 = sphi %s1119_s13, %s1248_s13   ;;  %s1078_s12 = sphi %s1117_s12, %s1247_s12  }
   0x4   : > { %p26_p0 = scmp.ge.s32.totalorder %s25_s17, 2  ;;  %p49_p2 = scmp.eq.s32.totalorder %s1094_s16, 0 }
   0x5   : > { %s41_s19 = sadd.s32 1, %s1082_s13  ;;  %p859_p5 = scmp.ge.s32.totalorder %s1094_s16, 2 }
   0x6   : > { %s1252_s17 = smov (%p26_p0, %s25_s17), 0  ;;  %p50_p3 = por %p49_p2, %p48_p1 }
   0x7   : > { %s37_s18 = ssub.s32 %s1090_s15, %s1252_s17  ;;  %162 = sbr.rel (%p859_p5) target bundleno = 22 (0x16), region = 20 }
   0x8   : > { %p39_p4 = scmp.eq.s32.totalorder %s37_s18, 0 }
   0xa   : > { %s1152_s20 = scalar_select %p39_p4, %s1082_s13, %s41_s19  }
   0xe   : > { %165 = sbr.rel (!%p50_p3) target bundleno = 22 (0x16), region = 24  ;;  %s167_s21 = sand.u32 (%p50_p3), 1, %s1082_s13  }
   0xf   : > { %s914_s22 = sshll.u32 (%p50_p3), %s1090_s15, 4  ;;  %s860_s23 = sshll.u32 (%p50_p3), %s167_s21, 6 }
  0x10   : > { %s175_s26 = scalar_lea.vmem (%p50_p3), %s1243_s0, %s914_s22  ;;  %s169_s27 = scalar_lea.vmem (%p50_p3), [#allocation3], %s860_s23 }
  0x11   : > { %v188_v0 = vld [vmem:[%s175_s26] sm:$0xff] (%p50_p3)  ;;  %v190_v1 = vld [vmem:[%s175_s26 + $0x8] sm:$0xff] (%p50_p3) }
  0x12   : > { %v192_v2 = vld [vmem:[%s175_s26 + $0x20] sm:$0xff] (%p50_p3)  ;;  %189 = vst [vmem:[%s169_s27] sm:$0xff] (%p50_p3), %v188_v0  ;;  %191 = vst [vmem:[%s169_s27 + $0x8] sm:$0xff] (%p50_p3), %v190_v1  ;;  %v194_v3 = vld [vmem:[%s175_s26 + $0x28] sm:$0xff] (%p50_p3) }
  0x13   : > { %193 = vst [vmem:[%s169_s27 + $0x10] sm:$0xff] (%p50_p3), %v192_v2  ;;  %v196_v4 = vld [vmem:[%s175_s26 + $0x40] sm:$0xff] (%p50_p3)  ;;  %v198_v5 = vld [vmem:[%s175_s26 + $0x48] sm:$0xff] (%p50_p3)  ;;  %195 = vst [vmem:[%s169_s27 + $0x18] sm:$0xff] (%p50_p3), %v194_v3 }
  0x14   : > { %197 = vst [vmem:[%s169_s27 + $0x20] sm:$0xff] (%p50_p3), %v196_v4  ;;  %199 = vst [vmem:[%s169_s27 + $0x28] sm:$0xff] (%p50_p3), %v198_v5  ;;  %v200_v6 = vld [vmem:[%s175_s26 + $0x60] sm:$0xff] (%p50_p3)  ;;  %v202_v7 = vld [vmem:[%s175_s26 + $0x68] sm:$0xff] (%p50_p3) }
  0x15   : > { %201 = vst [vmem:[%s169_s27 + $0x30] sm:$0xff] %v200_v6  ;;  %203 = vst [vmem:[%s169_s27 + $0x38] sm:$0xff] %v202_v7 }
  0x16 PF: > { %p863_p6 = scmp.ge.s32.totalorder %s1094_s16, 1  ;;  %p220_p7 = scmp.lt.s32.totalorder %s1094_s16, 3 }
  0x18   : > { %p221_p8 = pnand %p863_p6, %p220_p7 }
  0x19   : > { %s227_s28 = sand.u32 (!%p221_p8), 1, %s1078_s12   ;;  %s865_s29 = sshll.u32 (!%p221_p8), %s1086_s14, 6 }
  0x1a   : > { %224 = sbr.rel (%p221_p8) target bundleno = 318 (0x13e), region = 51  ;;  %s864_s30 = sshll.u32 (!%p221_p8), %s227_s28, 6 }
  0x1b   : > { %p267_p9 = scmp.lt.s32.totalorder (!%p221_p8), %s865_s29, 127  ;;  %s1169_s8 = scalar_lea.vmem (!%p221_p8), [#allocation3], %s864_s30 }
  0x1c   : > { %p867_p10 = scmp.ne.s32.totalorder (!%p221_p8), %s1086_s14, 0 }
  0x21   : > { %s1254_s29 = smov (!%p267_p9, %s865_s29), 127  ;;  %291 = sbr.rel (%p867_p10) target bundleno = 40 (0x28), region = 59 }
  0x22   : > { %s866_s4 = sshll.u32 %s1254_s29, 2  ;;  %v1096_v8 = vmov (!%p867_p10), 0.0  }
  0x23   : > { %s1167_s7 = scalar_lea.vmem %s1244_s1, %s866_s4  ;;  %292 = vst [vmem:[#allocation2] sm:$0xff] (!%p867_p10), %v1096_v8  ;;  %293 = vst [vmem:[#allocation2 + $0x8] sm:$0xff] (!%p867_p10), %v1096_v8 }
  0x24   : > { %294 = vst [vmem:[#allocation2 + $0x10] sm:$0xff] (!%p867_p10), %v1096_v8  ;;  %295 = vst [vmem:[#allocation2 + $0x18] sm:$0xff] (!%p867_p10), %v1096_v8 }
  0x28 PF: > { %v1012_v9 = vld [vmem:[%s1167_s7 + $0x40] sm:$0xff]   ;;  %v1016_v13 = vld [vmem:[%s1167_s7 + $0x48] sm:$0xff]   ;;  %v1020_v17 = vld [vmem:[%s1167_s7 + $0x50] sm:$0xff]   ;;  %p908_p11 = scmp.ne.s32.totalorder %s1086_s14, 1 }
  0x29   : > { %v1013_v10 = vld [vmem:[%s1167_s7 + $0xc0] sm:$0xff]   ;;  %915 = vmatprep.subr.bf16.mxu0 %v1012_v9  ;;  %v1017_v14 = vld [vmem:[%s1167_s7 + $0xc8] sm:$0xff]   ;;  %v1021_v18 = vld [vmem:[%s1167_s7 + $0xd0] sm:$0xff]  }
  0x2a   : > { %v1014_v11 = vld [vmem:[%s1167_s7] sm:$0xff]   ;;  %943 = vmatprep.subr.bf16.mxu1 %v1013_v10  ;;  %v1018_v15 = vld [vmem:[%s1167_s7 + $0x8] sm:$0xff]   ;;  %v1022_v19 = vld [vmem:[%s1167_s7 + $0x10] sm:$0xff]  }
  0x2b   : > { %v1015_v12 = vld [vmem:[%s1167_s7 + $0x80] sm:$0xff]   ;;  %916 = vmatpush3.bf16.msra.mxu0 %v1014_v11  ;;  %v1019_v16 = vld [vmem:[%s1167_s7 + $0x88] sm:$0xff]   ;;  %v1023_v20 = vld [vmem:[%s1167_s7 + $0x90] sm:$0xff]  }
  0x2c   : > { %944 = vmatpush3.bf16.msra.mxu1 %v1015_v12  ;;  %917 = vmatprep.subr.bf16.mxu0 %v1016_v13  ;;  %v1024_v21 = vld [vmem:[%s1167_s7 + $0x58] sm:$0xff]   ;;  %v1028_v25 = vld [vmem:[%s1167_s7 + $0x60] sm:$0xff]   ;;  %v1032_v29 = vld [vmem:[%s1167_s7 + $0x68] sm:$0xff]  }
  0x2d   : > { %945 = vmatprep.subr.bf16.mxu1 %v1017_v14  ;;  %v1025_v22 = vld [vmem:[%s1167_s7 + $0xd8] sm:$0xff]   ;;  %v1029_v26 = vld [vmem:[%s1167_s7 + $0xe0] sm:$0xff]   ;;  %v1033_v30 = vld [vmem:[%s1167_s7 + $0xe8] sm:$0xff]  }
  0x2e   : > { %v1026_v23 = vld [vmem:[%s1167_s7 + $0x18] sm:$0xff]   ;;  %v1030_v27 = vld [vmem:[%s1167_s7 + $0x20] sm:$0xff]   ;;  %v1034_v31 = vld [vmem:[%s1167_s7 + $0x28] sm:$0xff]  }
  0x2f   : > { %918 = vmatpush3.bf16.msra.mxu0 %v1018_v15  ;;  %v1027_v24 = vld [vmem:[%s1167_s7 + $0x98] sm:$0xff]   ;;  %v1031_v28 = vld [vmem:[%s1167_s7 + $0xa0] sm:$0xff]   ;;  %v1035_v32 = vld [vmem:[%s1167_s7 + $0xa8] sm:$0xff]  }
  0x30   : > { %946 = vmatpush3.bf16.msra.mxu1 %v1019_v16  ;;  %919 = vmatprep.subr.bf16.mxu0 %v1020_v17  ;;  %v1036_v33 = vld [vmem:[%s1167_s7 + $0x70] sm:$0xff]   ;;  %v1040_v37 = vld [vmem:[%s1167_s7 + $0x78] sm:$0xff]   ;;  %v296_v58 = vld [vmem:[#allocation2] sm:$0xff] }
  0x31   : > { %947 = vmatprep.subr.bf16.mxu1 %v1021_v18  ;;  %v1037_v34 = vld [vmem:[%s1167_s7 + $0xf0] sm:$0xff]   ;;  %v1041_v38 = vld [vmem:[%s1167_s7 + $0xf8] sm:$0xff]   ;;  %v297_v63 = vld [vmem:[#allocation2 + $0x8] sm:$0xff] }
  0x32   : > { %v1038_v35 = vld [vmem:[%s1167_s7 + $0x30] sm:$0xff]   ;;  %v1042_v39 = vld [vmem:[%s1167_s7 + $0x38] sm:$0xff]  }
  0x33   : > { %920 = vmatpush3.bf16.msra.mxu0 %v1022_v19  ;;  %v1039_v36 = vld [vmem:[%s1167_s7 + $0xb0] sm:$0xff]   ;;  %v1043_v40 = vld [vmem:[%s1167_s7 + $0xb8] sm:$0xff]  }
  0x34   : > { %948 = vmatpush3.bf16.msra.mxu1 %v1023_v20  ;;  %921 = vmatprep.subr.bf16.mxu0 %v1024_v21  ;;  %v1044_v41 = vld [vmem:[%s1169_s8] ss:$16 sps:$4 sm:$0xff]   ;;  %v1046_v42 = vld [vmem:[%s1169_s8 + $0x4] ss:$16 sps:$4 sm:$0xff]   ;;  %v1047_v43 = vld [vmem:[%s1169_s8 + $0x8] ss:$16 sps:$4 sm:$0xff]  }
  0x35   : > { %949 = vmatprep.subr.bf16.mxu1 %v1025_v22  ;;  %v1049_v44 = vld [vmem:[%s1169_s8 + $0xc] ss:$16 sps:$4 sm:$0xff]   ;;  %636 = vmatprep.mubr.bf16.mxu0 %v1046_v42  ;;  %v1050_v45 = vld [vmem:[%s1169_s8 + $0x24] ss:$16 sps:$4 sm:$0xff]   ;;  %v1054_v47 = vld [vmem:[%s1169_s8 + $0x20] ss:$16 sps:$4 sm:$0xff]  }
  0x36   : > { %685 = vmatprep.mubr.bf16.mxu1 %v1049_v44  ;;  %v1052_v46 = vld [vmem:[%s1169_s8 + $0x2c] ss:$16 sps:$4 sm:$0xff]   ;;  %v1055_v48 = vld [vmem:[%s1169_s8 + $0x28] ss:$16 sps:$4 sm:$0xff]   ;;  %v298_v12 = vld [vmem:[#allocation2 + $0x10] sm:$0xff] }
  0x37   : > { %922 = vmatpush3.bf16.msra.mxu0 %v1026_v23  ;;  %v299_v17 = vld [vmem:[#allocation2 + $0x18] sm:$0xff]  ;;  %v909_v22 = vld [vmem:[%s1245_s2] ss:$0 sm:$0xff] (!%p908_p11) }
  0x38   : > { %950 = vmatpush3.bf16.msra.mxu1 %v1027_v24  ;;  %923 = vmatprep.subr.bf16.mxu0 %v1028_v25 }
  0x39   : > { %951 = vmatprep.subr.bf16.mxu1 %v1029_v26 }
  0x3b   : > { %924 = vmatpush3.bf16.msra.mxu0 %v1030_v27 }
  0x3c   : > { %952 = vmatpush3.bf16.msra.mxu1 %v1031_v28  ;;  %925 = vmatprep.subr.bf16.mxu0 %v1032_v29 }
  0x3d   : > { %953 = vmatprep.subr.bf16.mxu1 %v1033_v30 }
  0x3f   : > { %926 = vmatpush3.bf16.msra.mxu0 %v1034_v31 }
  0x40   : > { %954 = vmatpush3.bf16.msra.mxu1 %v1035_v32  ;;  %927 = vmatprep.subr.bf16.mxu0 %v1036_v33 }
  0x41   : > { %955 = vmatprep.subr.bf16.mxu1 %v1037_v34 }
  0x43   : > { %928 = vmatpush3.bf16.msra.mxu0 %v1038_v35 }
  0x44   : > { %956 = vmatpush3.bf16.msra.mxu1 %v1039_v36  ;;  %929 = vmatprep.subr.bf16.mxu0 %v1040_v37 }
  0x45   : > { %957 = vmatprep.subr.bf16.mxu1 %v1041_v38 }
  0x47   : > { %930 = vmatpush3.bf16.msra.mxu0 %v1042_v39 }
  0x48   : > { %958 = vmatpush3.bf16.msra.mxu1 %v1043_v40 }
  0x4a   : > { %637 = vmatmul.mubr.bf16.vlgmr.msra.gmra.mrb[0].mxu0 %v1044_v41 }
  0x4b   : > { %686 = vmatmul.mubr.bf16.vlgmr.msra.gmra.mrb[0].mxu1 %v1047_v43  ;;  %644 = vmatprep.mubr.bf16.mxu0 %v1050_v45 }
  0x4c   : > { %693 = vmatprep.mubr.bf16.mxu1 %v1052_v46 }
  0x52   : > { %645 = vmatmul.mubr.bf16.gmra.mrb[4].mxu0 %v1054_v47 }
  0x53   : > { %694 = vmatmul.mubr.bf16.gmra.mrb[4].mxu1 %v1055_v48 }
 0x11d   : > { %v931_v49 = vpop.f32.mrb[0].mxu0 }
 0x11e   : > { %v959_v50 = vpop.f32.mrb[0].mxu1  ;;  %v932_v51 = vpop.f32.mrb[1].mxu0 }
 0x11f   : > { %v933_v52 = vadd.f32 %v932_v51, %v931_v49  ;;  %v960_v53 = vpop.f32.mrb[1].mxu1  ;;  %v934_v54 = vpop.f32.mrb[2].mxu0 }
 0x120   : > { %v961_v55 = vadd.f32 %v960_v53, %v959_v50  ;;  %v962_v56 = vpop.f32.mrb[2].mxu1  ;;  %v935_v57 = vpop.f32.mrb[3].mxu0 }
 0x121   : > { %v936_v59 = vadd.f32 %v935_v57, %v934_v54  ;;  %v963_v60 = vpop.f32.mrb[3].mxu1 }
 0x122   : > { %v688_v61 = vadd.f32 %v961_v55, %v933_v52  ;;  %v964_v62 = vadd.f32 %v963_v60, %v962_v56 }
 0x124   : > { %v702_v0 = vadd.f32 %v688_v61, %v296_v58  ;;  %v691_v1 = vadd.f32 %v964_v62, %v936_v59 }
 0x125   : > { %v937_v2 = vpop.f32.mrb[4].mxu0 }
 0x126   : > { %706 = vst [vmem:[#allocation2] sm:$0xff] %v702_v0  ;;  %v703_v3 = vadd.f32 %v691_v1, %v297_v63  ;;  %v965_v4 = vpop.f32.mrb[4].mxu1  ;;  %v938_v5 = vpop.f32.mrb[5].mxu0 }
 0x127   : > { %v939_v6 = vadd.f32 %v938_v5, %v937_v2  ;;  %v966_v7 = vpop.f32.mrb[5].mxu1  ;;  %v940_v8 = vpop.f32.mrb[6].mxu0 }
 0x128   : > { %707 = vst [vmem:[#allocation2 + $0x8] sm:$0xff] %v703_v3  ;;  %v967_v9 = vadd.f32 %v966_v7, %v965_v4  ;;  %v968_v10 = vpop.f32.mrb[6].mxu1  ;;  %v941_v11 = vpop.f32.mrb[7].mxu0 }
 0x129   : > { %v942_v13 = vadd.f32 %v941_v11, %v940_v8  ;;  %v969_v14 = vpop.f32.mrb[7].mxu1 }
 0x12a   : > { %v696_v15 = vadd.f32 %v967_v9, %v939_v6  ;;  %v970_v16 = vadd.f32 %v969_v14, %v968_v10  ;;  %713 = sbr.rel (%p908_p11) target bundleno = 318 (0x13e), region = 63 }
 0x12c   : > { %v704_v18 = vadd.f32 %v696_v15, %v298_v12  ;;  %v699_v19 = vadd.f32 %v970_v16, %v942_v13 }
 0x12d   : > { %v714_v21 = vld [vmem:[#allocation2] sm:$0xff] (!%p908_p11) }
 0x12e   : > { %708 = vst [vmem:[#allocation2 + $0x10] sm:$0xff] %v704_v18  ;;  %v705_v20 = vadd.f32 %v699_v19, %v299_v17  ;;  %v725_v24 = vadd.f32 (!%p908_p11), %v909_v22, %v714_v21 }
 0x12f   : > { %v715_v23 = vld [vmem:[#allocation2 + $0x8] sm:$0xff] (!%p908_p11) }
 0x130   : > { %709 = vst [vmem:[#allocation2 + $0x18] sm:$0xff] %v705_v20  ;;  %v726_v25 = vadd.f32 (!%p908_p11), %v909_v22, %v715_v23  ;;  %vm729_vm0 = vcmp.ge.f32.partialorder (!%p908_p11), %v725_v24, 0.0  ;;  %v733_v30 = vmul.f32 (!%p908_p11), 0.1, %v725_v24 }
 0x132   : > { %vm730_vm1 = vcmp.ge.f32.partialorder %v726_v25, 0.0  ;;  %v734_v31 = vmul.f32 0.1, %v726_v25  ;;  %v737_v34 = vsel %vm729_vm0, %v725_v24, %v733_v30 }
 0x133   : > { %741 = vst [vmem:[%s1246_s3] sm:$0xff] %v737_v34 }
 0x134   : > { %v738_v35 = vsel %vm730_vm1, %v726_v25, %v734_v31 }
 0x135   : > { %v716_v26 = vld [vmem:[#allocation2 + $0x10] sm:$0xff]  ;;  %742 = vst [vmem:[%s1246_s3 + $0x8] sm:$0xff] %v738_v35 }
 0x136   : > { %v727_v28 = vadd.f32 %v909_v22, %v716_v26 }
 0x137   : > { %v717_v27 = vld [vmem:[#allocation2 + $0x18] sm:$0xff] }
 0x138   : > { %v728_v29 = vadd.f32 %v909_v22, %v717_v27  ;;  %vm731_vm2 = vcmp.ge.f32.partialorder %v727_v28, 0.0  ;;  %v735_v32 = vmul.f32 0.1, %v727_v28 }
 0x13a   : > { %vm732_vm3 = vcmp.ge.f32.partialorder %v728_v29, 0.0  ;;  %v736_v33 = vmul.f32 0.1, %v728_v29  ;;  %v739_v36 = vsel %vm731_vm2, %v727_v28, %v735_v32 }
 0x13b   : > { %743 = vst [vmem:[%s1246_s3 + $0x10] sm:$0xff] %v739_v36 }
 0x13c   : > { %v740_v37 = vsel %vm732_vm3, %v728_v29, %v736_v33 }
 0x13d   : > { %744 = vst [vmem:[%s1246_s3 + $0x18] sm:$0xff] %v740_v37 }
 0x13e PF: > { %s13_s16 = sadd.s32 1, %s1094_s16   ;;  %s1247_s12 = smov %s1082_s13 }
 0x13f   : > { %p10_p12 = scmp.ge.s32.totalorder %s13_s16, 4   ;;  %s1248_s13 = smov %s1152_s20 }
 0x140   : > { %s1249_s14 = smov %s1090_s15  ;;  %s1250_s15 = smov %s1252_s17 }
 0x141   :  { %12 = sbr.rel (!%p10_p12) target bundleno = 3 (0x3), region = 104 }

// kernel: forward.11
= control target key start
LH: loop header
LB: loop body
LE: loop exit
PB: predicated region body
PF: predicated region fallthrough
CT: control target
= control target key end

     0   :  { %s1313_s12 = smov 0   ;;  %s1315_s13 = smov 0   ;;  %s1593_s0 = inlined_call_operand.vmem [shape: bf16[8,2048], index: 0, kind: input, shape index: {}]   ;;  %s1594_s1 = inlined_call_operand.vmem [shape: bf16[2048,256], index: 1, kind: input, shape index: {}]   ;;  %s1595_s2 = inlined_call_operand.vmem [shape: f32[1,256], index: 2, kind: input, shape index: {}]   ;;  %s1596_s3 = inlined_call_operand.vmem [shape: bf16[8,256], index: 3, kind: output, shape index: {}]  }
   0x1   :  { %s1317_s14 = smov 0   ;;  %s1319_s15 = smov 0  }
   0x2   :  { %s1321_s16 = smov 0   ;;  %s1323_s17 = smov 0  }
   0x3   :  { %s1325_s18 = smov 0  }
   0x4 LB: > { %s25_s19 = sadd.s32 1, %s1282_s16  ;;  %s28_s20 = sadd.s32 1, %s1286_s17  ;;  %s1290_s18 = sphi %s1325_s18, %s13_s18   ;;  %s1286_s17 = sphi %s1323_s17, %s1602_s17   ;;  %s1282_s16 = sphi %s1321_s16, %s1601_s16   ;;  %s1278_s15 = sphi %s1319_s15, %s1600_s15   ;;  %s1274_s14 = sphi %s1317_s14, %s1599_s14   ;;  %s1270_s13 = sphi %s1315_s13, %s1598_s13   ;;  %s1266_s12 = sphi %s1313_s12, %s1597_s12  }
   0x5   : > { %p26_p0 = scmp.ge.s32.totalorder %s25_s19, 4  ;;  %p76_p1 = scmp.ne.s32.totalorder %s1270_s13, %s1266_s12 }
   0x6   : > { %p77_p2 = scmp.eq.s32.totalorder %s1290_s18, 0  ;;  %s69_s24 = sadd.s32 1, %s1270_s13 }
   0x7   : > { %s1604_s19 = smov (%p26_p0, %s25_s19), 0  ;;  %s1606_s20 = smov (!%p26_p0, %s28_s20), %s1286_s17 }
   0x8   : > { %p78_p3 = por %p77_p2, %p76_p1  ;;  %p30_p4 = scmp.ge.s32.totalorder %s1606_s20, 2 }
   0x9   : > { %s64_s21 = ssub.s32 %s1282_s16, %s1604_s19  ;;  %p1047_p6 = scmp.ge.s32.totalorder %s1290_s18, 8 }
   0xa   : > { %s1608_s20 = smov (%p30_p4, %s1606_s20), 0 }
   0xb   : > { %s65_s22 = ssub.s32 %s1286_s17, %s1608_s20  ;;  %156 = sbr.rel (%p1047_p6) target bundleno = 66 (0x42), region = 16 }
   0xc   : > { %s66_s23 = sor.u32 %s65_s22, %s64_s21 }
   0xd   : > { %p67_p5 = scmp.eq.s32.totalorder %s66_s23, 0 }
   0xf   : > { %s1364_s25 = scalar_select %p67_p5, %s1270_s13, %s69_s24  }
  0x12   : > { %172 = sbr.rel (!%p78_p3) target bundleno = 66 (0x42), region = 24  ;;  %s174_s26 = sand.u32 (%p78_p3), 1, %s1270_s13  }
  0x13   : > { %s1098_s27 = sshll.u32 (%p78_p3), %s1282_s16, 7  ;;  %s1048_s28 = sshll.u32 (%p78_p3), %s174_s26, 8 }
  0x14   : > { %s179_s29 = sadd.s32 (%p78_p3), %s1286_s17, %s1098_s27  ;;  %s1378_s7 = scalar_lea.vmem (%p78_p3), [#allocation3], %s1048_s28 }
  0x15   : > { %s1051_s30 = sshll.u32 (%p78_p3), %s179_s29, 2 }
  0x16   : > { %s1373_s6 = scalar_lea.vmem (%p78_p3), %s1594_s1, %s1051_s30 }
  0x17   : > { %v197_v0 = vld [vmem:[%s1373_s6] sm:$0xf] (%p78_p3)  ;;  %v199_v1 = vld [vmem:[%s1373_s6 + $0x8] sm:$0xf] (%p78_p3)  ;;  %v201_v2 = vld [vmem:[%s1373_s6 + $0x10] sm:$0xf] (%p78_p3) }
  0x18   : > { %198 = vst [vmem:[%s1378_s7] sm:$0xf] (%p78_p3), %v197_v0  ;;  %200 = vst [vmem:[%s1378_s7 + $0x4] sm:$0xf] (%p78_p3), %v199_v1  ;;  %v203_v3 = vld [vmem:[%s1373_s6 + $0x18] sm:$0xf] (%p78_p3) }
  0x19   : > { %202 = vst [vmem:[%s1378_s7 + $0x8] sm:$0xf] %v201_v2  ;;  %v205_v4 = vld [vmem:[%s1373_s6 + $0x20] sm:$0xf]  ;;  %v207_v5 = vld [vmem:[%s1373_s6 + $0x28] sm:$0xf] }
  0x1a   : > { %204 = vst [vmem:[%s1378_s7 + $0xc] sm:$0xf] %v203_v3  ;;  %206 = vst [vmem:[%s1378_s7 + $0x10] sm:$0xf] %v205_v4  ;;  %v209_v6 = vld [vmem:[%s1373_s6 + $0x30] sm:$0xf] }
  0x1b   : > { %208 = vst [vmem:[%s1378_s7 + $0x14] sm:$0xf] %v207_v5  ;;  %v211_v7 = vld [vmem:[%s1373_s6 + $0x38] sm:$0xf]  ;;  %v213_v8 = vld [vmem:[%s1373_s6 + $0x40] sm:$0xf] }
  0x1c   : > { %210 = vst [vmem:[%s1378_s7 + $0x18] sm:$0xf] %v209_v6  ;;  %212 = vst [vmem:[%s1378_s7 + $0x1c] sm:$0xf] %v211_v7  ;;  %v215_v9 = vld [vmem:[%s1373_s6 + $0x48] sm:$0xf] }
  0x1d   : > { %214 = vst [vmem:[%s1378_s7 + $0x20] sm:$0xf] %v213_v8  ;;  %v217_v10 = vld [vmem:[%s1373_s6 + $0x50] sm:$0xf]  ;;  %v219_v11 = vld [vmem:[%s1373_s6 + $0x58] sm:$0xf] }
  0x1e   : > { %216 = vst [vmem:[%s1378_s7 + $0x24] sm:$0xf] %v215_v9  ;;  %218 = vst [vmem:[%s1378_s7 + $0x28] sm:$0xf] %v217_v10  ;;  %v221_v12 = vld [vmem:[%s1373_s6 + $0x60] sm:$0xf] }
  0x1f   : > { %220 = vst [vmem:[%s1378_s7 + $0x2c] sm:$0xf] %v219_v11  ;;  %v223_v13 = vld [vmem:[%s1373_s6 + $0x68] sm:$0xf]  ;;  %v225_v14 = vld [vmem:[%s1373_s6 + $0x70] sm:$0xf] }
  0x20   : > { %222 = vst [vmem:[%s1378_s7 + $0x30] sm:$0xf] %v221_v12  ;;  %224 = vst [vmem:[%s1378_s7 + $0x34] sm:$0xf] %v223_v13  ;;  %v227_v15 = vld [vmem:[%s1373_s6 + $0x78] sm:$0xf] }
  0x21   : > { %226 = vst [vmem:[%s1378_s7 + $0x38] sm:$0xf] %v225_v14  ;;  %v229_v16 = vld [vmem:[%s1373_s6 + $0x80] sm:$0xf]  ;;  %v231_v17 = vld [vmem:[%s1373_s6 + $0x88] sm:$0xf] }
  0x22   : > { %228 = vst [vmem:[%s1378_s7 + $0x3c] sm:$0xf] %v227_v15  ;;  %230 = vst [vmem:[%s1378_s7 + $0x40] sm:$0xf] %v229_v16  ;;  %v233_v18 = vld [vmem:[%s1373_s6 + $0x90] sm:$0xf] }
  0x23   : > { %232 = vst [vmem:[%s1378_s7 + $0x44] sm:$0xf] %v231_v17  ;;  %v235_v19 = vld [vmem:[%s1373_s6 + $0x98] sm:$0xf]  ;;  %v237_v20 = vld [vmem:[%s1373_s6 + $0xa0] sm:$0xf] }
  0x24   : > { %234 = vst [vmem:[%s1378_s7 + $0x48] sm:$0xf] %v233_v18  ;;  %236 = vst [vmem:[%s1378_s7 + $0x4c] sm:$0xf] %v235_v19  ;;  %v239_v21 = vld [vmem:[%s1373_s6 + $0xa8] sm:$0xf] }
  0x25   : > { %238 = vst [vmem:[%s1378_s7 + $0x50] sm:$0xf] %v237_v20  ;;  %v241_v22 = vld [vmem:[%s1373_s6 + $0xb0] sm:$0xf]  ;;  %v243_v23 = vld [vmem:[%s1373_s6 + $0xb8] sm:$0xf] }
  0x26   : > { %240 = vst [vmem:[%s1378_s7 + $0x54] sm:$0xf] %v239_v21  ;;  %242 = vst [vmem:[%s1378_s7 + $0x58] sm:$0xf] %v241_v22  ;;  %v245_v24 = vld [vmem:[%s1373_s6 + $0xc0] sm:$0xf] }
  0x27   : > { %244 = vst [vmem:[%s1378_s7 + $0x5c] sm:$0xf] %v243_v23  ;;  %v247_v25 = vld [vmem:[%s1373_s6 + $0xc8] sm:$0xf]  ;;  %v249_v26 = vld [vmem:[%s1373_s6 + $0xd0] sm:$0xf] }
  0x28   : > { %246 = vst [vmem:[%s1378_s7 + $0x60] sm:$0xf] %v245_v24  ;;  %248 = vst [vmem:[%s1378_s7 + $0x64] sm:$0xf] %v247_v25  ;;  %v251_v27 = vld [vmem:[%s1373_s6 + $0xd8] sm:$0xf] }
  0x29   : > { %250 = vst [vmem:[%s1378_s7 + $0x68] sm:$0xf] %v249_v26  ;;  %v253_v28 = vld [vmem:[%s1373_s6 + $0xe0] sm:$0xf]  ;;  %v255_v29 = vld [vmem:[%s1373_s6 + $0xe8] sm:$0xf] }
  0x2a   : > { %252 = vst [vmem:[%s1378_s7 + $0x6c] sm:$0xf] %v251_v27  ;;  %254 = vst [vmem:[%s1378_s7 + $0x70] sm:$0xf] %v253_v28  ;;  %v257_v30 = vld [vmem:[%s1373_s6 + $0xf0] sm:$0xf] }
  0x2b   : > { %256 = vst [vmem:[%s1378_s7 + $0x74] sm:$0xf] %v255_v29  ;;  %v259_v31 = vld [vmem:[%s1373_s6 + $0xf8] sm:$0xf]  ;;  %v261_v32 = vld [vmem:[%s1373_s6 + $0x100] sm:$0xf] }
  0x2c   : > { %258 = vst [vmem:[%s1378_s7 + $0x78] sm:$0xf] %v257_v30  ;;  %260 = vst [vmem:[%s1378_s7 + $0x7c] sm:$0xf] %v259_v31  ;;  %v263_v33 = vld [vmem:[%s1373_s6 + $0x108] sm:$0xf] }
  0x2d   : > { %262 = vst [vmem:[%s1378_s7 + $0x80] sm:$0xf] %v261_v32  ;;  %v265_v34 = vld [vmem:[%s1373_s6 + $0x110] sm:$0xf]  ;;  %v267_v35 = vld [vmem:[%s1373_s6 + $0x118] sm:$0xf] }
  0x2e   : > { %264 = vst [vmem:[%s1378_s7 + $0x84] sm:$0xf] %v263_v33  ;;  %266 = vst [vmem:[%s1378_s7 + $0x88] sm:$0xf] %v265_v34  ;;  %v269_v36 = vld [vmem:[%s1373_s6 + $0x120] sm:$0xf] }
  0x2f   : > { %268 = vst [vmem:[%s1378_s7 + $0x8c] sm:$0xf] %v267_v35  ;;  %v271_v37 = vld [vmem:[%s1373_s6 + $0x128] sm:$0xf]  ;;  %v273_v38 = vld [vmem:[%s1373_s6 + $0x130] sm:$0xf] }
  0x30   : > { %270 = vst [vmem:[%s1378_s7 + $0x90] sm:$0xf] %v269_v36  ;;  %272 = vst [vmem:[%s1378_s7 + $0x94] sm:$0xf] %v271_v37  ;;  %v275_v39 = vld [vmem:[%s1373_s6 + $0x138] sm:$0xf] }
  0x31   : > { %274 = vst [vmem:[%s1378_s7 + $0x98] sm:$0xf] %v273_v38  ;;  %v277_v40 = vld [vmem:[%s1373_s6 + $0x140] sm:$0xf]  ;;  %v279_v41 = vld [vmem:[%s1373_s6 + $0x148] sm:$0xf] }
  0x32   : > { %276 = vst [vmem:[%s1378_s7 + $0x9c] sm:$0xf] %v275_v39  ;;  %278 = vst [vmem:[%s1378_s7 + $0xa0] sm:$0xf] %v277_v40  ;;  %v281_v42 = vld [vmem:[%s1373_s6 + $0x150] sm:$0xf] }
  0x33   : > { %280 = vst [vmem:[%s1378_s7 + $0xa4] sm:$0xf] %v279_v41  ;;  %v283_v43 = vld [vmem:[%s1373_s6 + $0x158] sm:$0xf]  ;;  %v285_v44 = vld [vmem:[%s1373_s6 + $0x160] sm:$0xf] }
  0x34   : > { %282 = vst [vmem:[%s1378_s7 + $0xa8] sm:$0xf] %v281_v42  ;;  %284 = vst [vmem:[%s1378_s7 + $0xac] sm:$0xf] %v283_v43  ;;  %v287_v45 = vld [vmem:[%s1373_s6 + $0x168] sm:$0xf] }
  0x35   : > { %286 = vst [vmem:[%s1378_s7 + $0xb0] sm:$0xf] %v285_v44  ;;  %v289_v46 = vld [vmem:[%s1373_s6 + $0x170] sm:$0xf]  ;;  %v291_v47 = vld [vmem:[%s1373_s6 + $0x178] sm:$0xf] }
  0x36   : > { %288 = vst [vmem:[%s1378_s7 + $0xb4] sm:$0xf] %v287_v45  ;;  %290 = vst [vmem:[%s1378_s7 + $0xb8] sm:$0xf] %v289_v46  ;;  %v293_v48 = vld [vmem:[%s1373_s6 + $0x180] sm:$0xf] }
  0x37   : > { %292 = vst [vmem:[%s1378_s7 + $0xbc] sm:$0xf] %v291_v47  ;;  %v295_v49 = vld [vmem:[%s1373_s6 + $0x188] sm:$0xf]  ;;  %v297_v50 = vld [vmem:[%s1373_s6 + $0x190] sm:$0xf] }
  0x38   : > { %294 = vst [vmem:[%s1378_s7 + $0xc0] sm:$0xf] %v293_v48  ;;  %296 = vst [vmem:[%s1378_s7 + $0xc4] sm:$0xf] %v295_v49  ;;  %v299_v51 = vld [vmem:[%s1373_s6 + $0x198] sm:$0xf] }
  0x39   : > { %298 = vst [vmem:[%s1378_s7 + $0xc8] sm:$0xf] %v297_v50  ;;  %v301_v52 = vld [vmem:[%s1373_s6 + $0x1a0] sm:$0xf]  ;;  %v303_v53 = vld [vmem:[%s1373_s6 + $0x1a8] sm:$0xf] }
  0x3a   : > { %300 = vst [vmem:[%s1378_s7 + $0xcc] sm:$0xf] %v299_v51  ;;  %302 = vst [vmem:[%s1378_s7 + $0xd0] sm:$0xf] %v301_v52  ;;  %v305_v54 = vld [vmem:[%s1373_s6 + $0x1b0] sm:$0xf] }
  0x3b   : > { %304 = vst [vmem:[%s1378_s7 + $0xd4] sm:$0xf] %v303_v53  ;;  %v307_v55 = vld [vmem:[%s1373_s6 + $0x1b8] sm:$0xf]  ;;  %v309_v56 = vld [vmem:[%s1373_s6 + $0x1c0] sm:$0xf] }
  0x3c   : > { %306 = vst [vmem:[%s1378_s7 + $0xd8] sm:$0xf] %v305_v54  ;;  %308 = vst [vmem:[%s1378_s7 + $0xdc] sm:$0xf] %v307_v55  ;;  %v311_v57 = vld [vmem:[%s1373_s6 + $0x1c8] sm:$0xf] }
  0x3d   : > { %310 = vst [vmem:[%s1378_s7 + $0xe0] sm:$0xf] %v309_v56  ;;  %v313_v58 = vld [vmem:[%s1373_s6 + $0x1d0] sm:$0xf]  ;;  %v315_v59 = vld [vmem:[%s1373_s6 + $0x1d8] sm:$0xf] }
  0x3e   : > { %312 = vst [vmem:[%s1378_s7 + $0xe4] sm:$0xf] %v311_v57  ;;  %314 = vst [vmem:[%s1378_s7 + $0xe8] sm:$0xf] %v313_v58  ;;  %v317_v60 = vld [vmem:[%s1373_s6 + $0x1e0] sm:$0xf] }
  0x3f   : > { %316 = vst [vmem:[%s1378_s7 + $0xec] sm:$0xf] %v315_v59  ;;  %v319_v61 = vld [vmem:[%s1373_s6 + $0x1e8] sm:$0xf]  ;;  %v321_v62 = vld [vmem:[%s1373_s6 + $0x1f0] sm:$0xf] }
  0x40   : > { %318 = vst [vmem:[%s1378_s7 + $0xf0] sm:$0xf] %v317_v60  ;;  %320 = vst [vmem:[%s1378_s7 + $0xf4] sm:$0xf] %v319_v61  ;;  %v323_v63 = vld [vmem:[%s1373_s6 + $0x1f8] sm:$0xf] }
  0x41   : > { %322 = vst [vmem:[%s1378_s7 + $0xf8] sm:$0xf] %v321_v62  ;;  %324 = vst [vmem:[%s1378_s7 + $0xfc] sm:$0xf] %v323_v63 }
  0x42 PF: > { %p1052_p7 = scmp.ge.s32.totalorder %s1290_s18, 1  ;;  %p480_p8 = scmp.lt.s32.totalorder %s1290_s18, 9 }
  0x44   : > { %p481_p9 = pnand %p1052_p7, %p480_p8 }
  0x45   : > { %s487_s8 = sand.u32 (!%p481_p9), 1, %s1266_s12   ;;  %s1054_s9 = sshll.u32 (!%p481_p9), %s1274_s14, 2 }
  0x46   : > { %484 = sbr.rel (%p481_p9) target bundleno = 357 (0x165), region = 69  ;;  %s1053_s10 = sshll.u32 (!%p481_p9), %s487_s8, 8 }
  0x47   : > { %p528_p10 = scmp.lt.s32.totalorder (!%p481_p9), %s1054_s9, 15  ;;  %p536_p11 = scmp.lt.s32.totalorder (!%p481_p9), %s1278_s15, 1 }
  0x48   : > { %s1528_s4 = scalar_lea.vmem (!%p481_p9), [#allocation3], %s1053_s10  ;;  %p1057_p12 = scmp.ne.s32.totalorder (!%p481_p9), %s1274_s14, 0 }
  0x4d   : > { %s1610_s9 = smov (!%p528_p10, %s1054_s9), 15  ;;  %s1612_s15 = smov (!%p536_p11, %s1278_s15), 1 }
  0x4e   : > { %s1055_s11 = sshll.u32 %s1610_s9, 2  ;;  %s538_s27 = scalar_lea.vmem %s1595_s2, %s1612_s15  ;;  %v1292_v0 = vmov (!%p1057_p12), 0.0  }
  0x4f   : > { %s1516_s23 = scalar_lea.vmem %s1593_s0, %s1055_s11  ;;  %s1056_s12 = sshll.u32 %s1612_s15, 2  ;;  %552 = vst [vmem:[#allocation2] sm:$0xff] (!%p1057_p12), %v1292_v0 }
  0x50   : > { %s1526_s30 = scalar_lea.vmem %s1596_s3, %s1056_s12  ;;  %551 = sbr.rel (%p1057_p12) target bundleno = 87 (0x57), region = 77 }
  0x57 PF: > { %v1200_v1 = vld [vmem:[%s1528_s4 + $0x40] sm:$0xff]   ;;  %v1204_v5 = vld [vmem:[%s1528_s4 + $0x48] sm:$0xff]   ;;  %v1208_v9 = vld [vmem:[%s1528_s4 + $0x50] sm:$0xff]   ;;  %p1094_p13 = scmp.ne.s32.totalorder %s1274_s14, 3 }
  0x58   : > { %v1201_v2 = vld [vmem:[%s1528_s4 + $0xc0] sm:$0xff]   ;;  %1099 = vmatprep.subr.bf16.mxu0 %v1200_v1  ;;  %v1205_v6 = vld [vmem:[%s1528_s4 + $0xc8] sm:$0xff]   ;;  %v1209_v10 = vld [vmem:[%s1528_s4 + $0xd0] sm:$0xff]  }
  0x59   : > { %v1202_v3 = vld [vmem:[%s1528_s4] sm:$0xff]   ;;  %1121 = vmatprep.subr.bf16.mxu1 %v1201_v2  ;;  %v1206_v7 = vld [vmem:[%s1528_s4 + $0x8] sm:$0xff]   ;;  %v1210_v11 = vld [vmem:[%s1528_s4 + $0x10] sm:$0xff]  }
  0x5a   : > { %v1203_v4 = vld [vmem:[%s1528_s4 + $0x80] sm:$0xff]   ;;  %1100 = vmatpush3.bf16.msra.mxu0 %v1202_v3  ;;  %v1207_v8 = vld [vmem:[%s1528_s4 + $0x88] sm:$0xff]   ;;  %v1211_v12 = vld [vmem:[%s1528_s4 + $0x90] sm:$0xff]  }
  0x5b   : > { %1122 = vmatpush3.bf16.msra.mxu1 %v1203_v4  ;;  %1101 = vmatprep.subr.bf16.mxu0 %v1204_v5  ;;  %v1212_v13 = vld [vmem:[%s1528_s4 + $0x58] sm:$0xff]   ;;  %v1216_v17 = vld [vmem:[%s1528_s4 + $0x60] sm:$0xff]   ;;  %v1220_v21 = vld [vmem:[%s1528_s4 + $0x68] sm:$0xff]  }
  0x5c   : > { %1123 = vmatprep.subr.bf16.mxu1 %v1205_v6  ;;  %v1213_v14 = vld [vmem:[%s1528_s4 + $0xd8] sm:$0xff]   ;;  %v1217_v18 = vld [vmem:[%s1528_s4 + $0xe0] sm:$0xff]   ;;  %v1221_v22 = vld [vmem:[%s1528_s4 + $0xe8] sm:$0xff]  }
  0x5d   : > { %v1214_v15 = vld [vmem:[%s1528_s4 + $0x18] sm:$0xff]   ;;  %v1218_v19 = vld [vmem:[%s1528_s4 + $0x20] sm:$0xff]   ;;  %v1222_v23 = vld [vmem:[%s1528_s4 + $0x28] sm:$0xff]  }
  0x5e   : > { %1102 = vmatpush3.bf16.msra.mxu0 %v1206_v7  ;;  %v1215_v16 = vld [vmem:[%s1528_s4 + $0x98] sm:$0xff]   ;;  %v1219_v20 = vld [vmem:[%s1528_s4 + $0xa0] sm:$0xff]   ;;  %v1223_v24 = vld [vmem:[%s1528_s4 + $0xa8] sm:$0xff]  }
  0x5f   : > { %1124 = vmatpush3.bf16.msra.mxu1 %v1207_v8  ;;  %1103 = vmatprep.subr.bf16.mxu0 %v1208_v9  ;;  %v1224_v25 = vld [vmem:[%s1528_s4 + $0x70] sm:$0xff]   ;;  %v1228_v29 = vld [vmem:[%s1528_s4 + $0x78] sm:$0xff]   ;;  %v555_v34 = vld [vmem:[%s1516_s23 + $0x8] sm:$0xff] }
  0x60   : > { %1125 = vmatprep.subr.bf16.mxu1 %v1209_v10  ;;  %v1225_v26 = vld [vmem:[%s1528_s4 + $0xf0] sm:$0xff]   ;;  %v1229_v30 = vld [vmem:[%s1528_s4 + $0xf8] sm:$0xff]   ;;  %v1060_v37 = vcombine.low %v555_v34, %v555_v34  ;;  %v1061_v38 = vcombine.high %v555_v34, %v555_v34 }
  0x61   : > { %v1226_v27 = vld [vmem:[%s1528_s4 + $0x30] sm:$0xff]   ;;  %v1230_v31 = vld [vmem:[%s1528_s4 + $0x38] sm:$0xff]  }
  0x62   : > { %1104 = vmatpush3.bf16.msra.mxu0 %v1210_v11  ;;  %v1227_v28 = vld [vmem:[%s1528_s4 + $0xb0] sm:$0xff]   ;;  %v1231_v32 = vld [vmem:[%s1528_s4 + $0xb8] sm:$0xff]   ;;  %898 = vmatprep.mubr.bf16.mxu1 %v1061_v38 }
  0x63   : > { %1126 = vmatpush3.bf16.msra.mxu1 %v1211_v12  ;;  %1105 = vmatprep.subr.bf16.mxu0 %v1212_v13  ;;  %v554_v33 = vld [vmem:[%s1516_s23] sm:$0xff] }
  0x64   : > { %1127 = vmatprep.subr.bf16.mxu1 %v1213_v14  ;;  %v1058_v35 = vcombine.low %v554_v33, %v554_v33  ;;  %v1059_v36 = vcombine.high %v554_v33, %v554_v33  ;;  %v553_v47 = vld [vmem:[#allocation2] sm:$0xff] }
  0x65   : > { %v1095_v53 = vld [vmem:[%s538_s27] ss:$0 sm:$0xff] (!%p1094_p13) }
  0x66   : > { %1106 = vmatpush3.bf16.msra.mxu0 %v1214_v15  ;;  %858 = vmatprep.mubr.bf16.mxu0 %v1059_v36 }
  0x67   : > { %1128 = vmatpush3.bf16.msra.mxu1 %v1215_v16  ;;  %1107 = vmatprep.subr.bf16.mxu0 %v1216_v17 }
  0x68   : > { %1129 = vmatprep.subr.bf16.mxu1 %v1217_v18 }
  0x6a   : > { %1108 = vmatpush3.bf16.msra.mxu0 %v1218_v19 }
  0x6b   : > { %1130 = vmatpush3.bf16.msra.mxu1 %v1219_v20  ;;  %1109 = vmatprep.subr.bf16.mxu0 %v1220_v21 }
  0x6c   : > { %1131 = vmatprep.subr.bf16.mxu1 %v1221_v22 }
  0x6e   : > { %1110 = vmatpush3.bf16.msra.mxu0 %v1222_v23 }
  0x6f   : > { %1132 = vmatpush3.bf16.msra.mxu1 %v1223_v24  ;;  %1111 = vmatprep.subr.bf16.mxu0 %v1224_v25 }
  0x70   : > { %1133 = vmatprep.subr.bf16.mxu1 %v1225_v26 }
  0x72   : > { %1112 = vmatpush3.bf16.msra.mxu0 %v1226_v27 }
  0x73   : > { %1134 = vmatpush3.bf16.msra.mxu1 %v1227_v28  ;;  %1113 = vmatprep.subr.bf16.mxu0 %v1228_v29 }
  0x74   : > { %1135 = vmatprep.subr.bf16.mxu1 %v1229_v30 }
  0x76   : > { %1114 = vmatpush3.bf16.msra.mxu0 %v1230_v31 }
  0x77   : > { %1136 = vmatpush3.bf16.msra.mxu1 %v1231_v32 }
  0x79   : > { %859 = vmatmul.mubr.bf16.vlgmr.msra.gmra.mrb[0].mxu0 %v1058_v35 }
  0x7a   : > { %899 = vmatmul.mubr.bf16.vlgmr.msra.gmra.mrb[0].mxu1 %v1060_v37 }
 0x14c   : > { %v1115_v39 = vpop.f32.mrb[0].mxu0 }
 0x14d   : > { %v1137_v40 = vpop.f32.mrb[0].mxu1  ;;  %v1116_v41 = vpop.f32.mrb[1].mxu0 }
 0x14e   : > { %v1138_v42 = vpop.f32.mrb[1].mxu1  ;;  %v1117_v43 = vadd.f32 %v1116_v41, %v1115_v39  ;;  %v1118_v45 = vpop.f32.mrb[2].mxu0 }
 0x14f   : > { %v1139_v44 = vadd.f32 %v1138_v42, %v1137_v40  ;;  %v1140_v46 = vpop.f32.mrb[2].mxu1  ;;  %v1119_v48 = vpop.f32.mrb[3].mxu0  ;;  %911 = sbr.rel (%p1094_p13) target bundleno = 357 (0x165), region = 81 }
 0x150   : > { %v1141_v49 = vpop.f32.mrb[3].mxu1 }
 0x151   : > { %v901_v50 = vadd.f32 %v1139_v44, %v1117_v43 }
 0x153   : > { %v906_v51 = vadd.f32 %v901_v50, %v553_v47 }
 0x155   : > { %907 = vst [vmem:[#allocation2] sm:$0xff] %v906_v51 }
 0x15c   : > { %v912_v52 = vld [vmem:[#allocation2] sm:$0xff] }
 0x15d   : > { %v920_v54 = vadd.f32 %v1095_v53, %v912_v52 }
 0x15f   : > { %vm921_vm0 = vcmp.ge.f32.partialorder %v920_v54, 0.0  ;;  %v922_v55 = vmul.f32 0.1, %v920_v54 }
 0x161   : > { %v923_v56 = vsel %vm921_vm0, %v920_v54, %v922_v55 }
 0x162   : > { %v924_v57 = vpack.c.bf16 %v923_v56, %v923_v56 }
 0x164   : > { %925 = vst [vmem:[%s1526_s30] sm:$0xf] %v924_v57 }
 0x165 PF: > { %s13_s18 = sadd.s32 1, %s1290_s18   ;;  %s1597_s12 = smov %s1270_s13 }
 0x166   : > { %p10_p0 = scmp.ge.s32.totalorder %s13_s18, 10   ;;  %s1598_s13 = smov %s1364_s25 }
 0x167   : > { %s1599_s14 = smov %s1282_s16  ;;  %s1600_s15 = smov %s1286_s17 }
 0x168   : > { %s1601_s16 = smov %s1604_s19  ;;  %s1602_s17 = smov %s1608_s20 }
 0x169   :  { %12 = sbr.rel (!%p10_p0) target bundleno = 4 (0x4), region = 122 }

// kernel: forward.12
= control target key start
LH: loop header
LB: loop body
LE: loop exit
PB: predicated region body
PF: predicated region fallthrough
CT: control target
= control target key end

     0   :  { %v1015_v51 = vmov 0.0   ;;  %v86_v52 = vlaneseq  ;;  %vm1016_vm0 = vmmov 0   ;;  %vm454_vm1 = vcmask 261120   ;;  %s1245_s1 = inlined_call_operand.vmem [shape: bf16[256,320], index: 1, kind: input, shape index: {}]   ;;  %s1246_s0 = inlined_call_operand.vmem [shape: bf16[8,256], index: 0, kind: input, shape index: {}]   ;;  %s1247_s2 = inlined_call_operand.vmem [shape: f32[1,320], index: 2, kind: input, shape index: {}]   ;;  %s1248_s3 = inlined_call_operand.<no memory space> [shape: f32[1,1], index: 3, kind: input, shape index: {}]   ;;  %s1249_s4 = inlined_call_operand.vmem [shape: f32[8,256], index: 4, kind: output, shape index: {}]  }
   0x1   :  { %v941_v0 = vld [vmem:[%s1245_s1 + $0x4] ss:$12 sps:$4 sm:$0xff]   ;;  %v943_v1 = vld [vmem:[%s1245_s1] ss:$12 sps:$4 sm:$0xff]   ;;  %v944_v2 = vld [vmem:[%s1245_s1 + $0x1c] ss:$12 sps:$4 sm:$0xff]  }
   0x2   :  { %364 = vmatprep.subr.bf16.mxu0 %v941_v0  ;;  %v946_v3 = vld [vmem:[%s1245_s1 + $0x18] ss:$12 sps:$4 sm:$0xff]   ;;  %v947_v4 = vld [vmem:[%s1245_s1 + $0x34] ss:$12 sps:$4 sm:$0xff]   ;;  %v949_v5 = vld [vmem:[%s1245_s1 + $0x30] ss:$12 sps:$4 sm:$0xff]  }
   0x3   :  { %365 = vmatpush1.bf16.msra.mxu0 %v943_v1  ;;  %v950_v6 = vld [vmem:[%s1245_s1 + $0x4c] ss:$12 sps:$4 sm:$0xff]   ;;  %v952_v7 = vld [vmem:[%s1245_s1 + $0x48] ss:$12 sps:$4 sm:$0xff]   ;;  %v953_v8 = vld [vmem:[%s1245_s1 + $0x64] ss:$12 sps:$4 sm:$0xff]  }
   0x4   :  { %366 = vmatprep.subr.bf16.mxu0 %v944_v2  ;;  %v955_v9 = vld [vmem:[%s1245_s1 + $0x60] ss:$12 sps:$4 sm:$0xff]   ;;  %v956_v10 = vld [vmem:[%s1245_s1 + $0x7c] ss:$12 sps:$4 sm:$0xff]   ;;  %v958_v11 = vld [vmem:[%s1245_s1 + $0x78] ss:$12 sps:$4 sm:$0xff]  }
   0x5   :  { %v959_v12 = vld [vmem:[%s1245_s1 + $0x94] ss:$12 sps:$4 sm:$0xff]   ;;  %v961_v13 = vld [vmem:[%s1245_s1 + $0x90] ss:$12 sps:$4 sm:$0xff]   ;;  %v962_v15 = vld [vmem:[%s1245_s1 + $0xac] ss:$12 sps:$4 sm:$0xff]  }
   0x6   :  { %v1089_v14 = vld [vmem:[%s1246_s0] sm:$0xff]  ;;  %v964_v17 = vld [vmem:[%s1245_s1 + $0xa8] ss:$12 sps:$4 sm:$0xff]   ;;  %v973_v23 = vld [vmem:[%s1245_s1 + $0xf0] ss:$12 sps:$4 sm:$0xff]   ;;  %v87_v53 = vshrl.u32 %v86_v52, 7 }
   0x7   :  { %367 = vmatpush1.bf16.msra.mxu0 %v946_v3  ;;  %v840_v16 = vcombine.high %v1089_v14, %v1089_v14  ;;  %v965_v18 = vld [vmem:[%s1245_s1 + $0xc4] ss:$12 sps:$4 sm:$0xff]   ;;  %v967_v19 = vld [vmem:[%s1245_s1 + $0xc0] ss:$12 sps:$4 sm:$0xff]   ;;  %v968_v20 = vld [vmem:[%s1245_s1 + $0xdc] ss:$12 sps:$4 sm:$0xff]   ;;  %v839_v34 = vcombine.low %v1089_v14, %v1089_v14 }
   0x8   :  { %368 = vmatprep.subr.bf16.mxu0 %v947_v4  ;;  %v970_v21 = vld [vmem:[%s1245_s1 + $0xd8] ss:$12 sps:$4 sm:$0xff]   ;;  %v971_v22 = vld [vmem:[%s1245_s1 + $0xf4] ss:$12 sps:$4 sm:$0xff]   ;;  %v980_v28 = vld [vmem:[%s1245_s1 + $0x13c] ss:$12 sps:$4 sm:$0xff]  }
   0x9   :  { %396 = vmatprep.mubr.bf16.mxu0 %v840_v16  ;;  %437 = vmatprep.mubr.bf16.mxu1 %v840_v16  ;;  %v974_v24 = vld [vmem:[%s1245_s1 + $0x10c] ss:$12 sps:$4 sm:$0xff]   ;;  %v976_v25 = vld [vmem:[%s1245_s1 + $0x108] ss:$12 sps:$4 sm:$0xff]   ;;  %v977_v26 = vld [vmem:[%s1245_s1 + $0x124] ss:$12 sps:$4 sm:$0xff]  }
   0xa   :  { %v979_v27 = vld [vmem:[%s1245_s1 + $0x120] ss:$12 sps:$4 sm:$0xff]   ;;  %v982_v29 = vld [vmem:[%s1245_s1 + $0x138] ss:$12 sps:$4 sm:$0xff]   ;;  %v985_v31 = vld [vmem:[%s1245_s1 + $0x150] ss:$12 sps:$4 sm:$0xff]  }
   0xb   :  { %369 = vmatpush1.bf16.msra.mxu0 %v949_v5  ;;  %v983_v30 = vld [vmem:[%s1245_s1 + $0x154] ss:$12 sps:$4 sm:$0xff]   ;;  %v986_v32 = vld [vmem:[%s1245_s1 + $0x16c] ss:$12 sps:$4 sm:$0xff]   ;;  %v997_v41 = vld [vmem:[%s1245_s1 + $0x110] ss:$12 sps:$4 sm:$0xff]  }
   0xc   :  { %370 = vmatprep.subr.bf16.mxu0 %v950_v6  ;;  %v988_v33 = vld [vmem:[%s1245_s1 + $0x168] ss:$12 sps:$4 sm:$0xff]   ;;  %v993_v37 = vld [vmem:[%s1245_s1 + $0xe0] ss:$12 sps:$4 sm:$0xff]   ;;  %v995_v39 = vld [vmem:[%s1245_s1 + $0xf8] ss:$12 sps:$4 sm:$0xff]  }
   0xd   :  { %v991_v35 = vld [vmem:[%s1245_s1 + $0xc8] ss:$12 sps:$4 sm:$0xff]   ;;  %v994_v38 = vld [vmem:[%s1245_s1 + $0x20] ss:$12 sps:$4 sm:$0xff]   ;;  %v996_v40 = vld [vmem:[%s1245_s1 + $0x38] ss:$12 sps:$4 sm:$0xff]  }
   0xe   :  { %v992_v36 = vld [vmem:[%s1245_s1 + $0x8] ss:$12 sps:$4 sm:$0xff]   ;;  %901 = vmatprep.subr.bf16.mxu1 %v991_v35  ;;  %v998_v42 = vld [vmem:[%s1245_s1 + $0x50] ss:$12 sps:$4 sm:$0xff]   ;;  %v1001_v45 = vld [vmem:[%s1245_s1 + $0x140] ss:$12 sps:$4 sm:$0xff]  }
   0xf   :  { %371 = vmatpush1.bf16.msra.mxu0 %v952_v7  ;;  %902 = vmatpush3.bf16.msra.mxu1 %v992_v36  ;;  %v999_v43 = vld [vmem:[%s1245_s1 + $0x128] ss:$12 sps:$4 sm:$0xff]   ;;  %v1002_v46 = vld [vmem:[%s1245_s1 + $0x80] ss:$12 sps:$4 sm:$0xff]   ;;  %v1003_v47 = vld [vmem:[%s1245_s1 + $0x158] ss:$12 sps:$4 sm:$0xff]  }
  0x10   :  { %372 = vmatprep.subr.bf16.mxu0 %v953_v8  ;;  %903 = vmatprep.subr.bf16.mxu1 %v993_v37  ;;  %v1000_v44 = vld [vmem:[%s1245_s1 + $0x68] ss:$12 sps:$4 sm:$0xff]   ;;  %v1004_v48 = vld [vmem:[%s1245_s1 + $0x98] ss:$12 sps:$4 sm:$0xff]   ;;  %v1005_v49 = vld [vmem:[%s1245_s1 + $0x170] ss:$12 sps:$4 sm:$0xff]  }
  0x11   :  { %v1006_v50 = vld [vmem:[%s1245_s1 + $0xb0] ss:$12 sps:$4 sm:$0xff]   ;;  %v88_v54 = vsub.s32 0, %v87_v53  ;;  %v84_v55 = vld [vmem:[%s1247_s2] sm:$0x7]  ;;  %s1017_s1 = smov 96  }
  0x12   :  { %vm605_vm2 = vcmask 27648   ;;  %v96_v16 = vsub.s32 2, %v87_v53  ;;  %s1018_s2 = smov 64   ;;  %vm635_vm3 = vcmask 523264   ;;  %vm642_vm4 = vcmask 1043456  }
  0x13   :  { %373 = vmatpush1.bf16.msra.mxu0 %v955_v9  ;;  %904 = vmatpush3.bf16.msra.mxu1 %v994_v38  ;;  %v89_v56 = vrot.slane %v84_v55, %v88_v54  ;;  %vm638_vm5 = vcmask 31744   ;;  %v817_v54 = vunpack.c.l.bf16 %v1089_v14 }
  0x14   :  { %374 = vmatprep.subr.bf16.mxu0 %v956_v10  ;;  %905 = vmatprep.subr.bf16.mxu1 %v995_v39 }
  0x17   :  { %375 = vmatpush1.bf16.msra.mxu0 %v958_v11  ;;  %906 = vmatpush3.bf16.msra.mxu1 %v996_v40 }
  0x18   :  { %376 = vmatprep.subr.bf16.mxu0 %v959_v12  ;;  %907 = vmatprep.subr.bf16.mxu1 %v997_v41  ;;  %v92_v12 = vsub.s32 1, %v87_v53 }
  0x1b   :  { %377 = vmatpush1.bf16.msra.mxu0 %v961_v13  ;;  %908 = vmatpush3.bf16.msra.mxu1 %v998_v42  ;;  %v93_v13 = vrot.slane %v84_v55, %v92_v12 }
  0x1c   :  { %378 = vmatprep.subr.bf16.mxu0 %v962_v15  ;;  %909 = vmatprep.subr.bf16.mxu1 %v999_v43 }
  0x1f   :  { %379 = vmatpush1.bf16.msra.mxu0 %v964_v17  ;;  %910 = vmatpush3.bf16.msra.mxu1 %v1000_v44  ;;  %v97_v17 = vrot.slane %v84_v55, %v96_v16  ;;  %v818_v55 = vunpack.c.h.bf16 %v1089_v14 }
  0x20   :  { %380 = vmatprep.subr.bf16.mxu0 %v965_v18  ;;  %911 = vmatprep.subr.bf16.mxu1 %v1001_v45 }
  0x23   :  { %381 = vmatpush1.bf16.msra.mxu0 %v967_v19  ;;  %912 = vmatpush3.bf16.msra.mxu1 %v1002_v46 }
  0x24   :  { %382 = vmatprep.subr.bf16.mxu0 %v968_v20  ;;  %913 = vmatprep.subr.bf16.mxu1 %v1003_v47 }
  0x27   :  { %383 = vmatpush1.bf16.msra.mxu0 %v970_v21  ;;  %914 = vmatpush3.bf16.msra.mxu1 %v1004_v48 }
  0x28   :  { %384 = vmatprep.subr.bf16.mxu0 %v971_v22  ;;  %915 = vmatprep.subr.bf16.mxu1 %v1005_v49 }
  0x2b   :  { %385 = vmatpush1.bf16.msra.mxu0 %v973_v23  ;;  %916 = vmatpush3.bf16.msra.mxu1 %v1006_v50 }
  0x2c   :  { %386 = vmatprep.subr.bf16.mxu0 %v974_v24  ;;  %927 = vmatprep.subr.mxu1 %v1015_v51 }
  0x2e   :  { %438 = vmatmul.mubr.bf16.vlgmr.msra.gmra.mrb[0].mxu1 %v839_v34 }
  0x2f   :  { %387 = vmatpush1.bf16.msra.mxu0 %v976_v25  ;;  %929 = vmatprep.mubr.msk.f32.mxu1 %vm1016_vm0, %v1015_v51 }
  0x30   :  { %388 = vmatprep.subr.bf16.mxu0 %v977_v26 }
  0x33   :  { %389 = vmatpush1.bf16.msra.mxu0 %v979_v27 }
  0x34   :  { %390 = vmatprep.subr.bf16.mxu0 %v980_v28 }
  0x37   :  { %391 = vmatpush1.bf16.msra.mxu0 %v982_v29 }
  0x38   :  { %392 = vmatprep.subr.bf16.mxu0 %v983_v30 }
  0x3b   :  { %393 = vmatpush1.bf16.msra.mxu0 %v985_v31 }
  0x3c   :  { %394 = vmatprep.subr.bf16.mxu0 %v986_v32 }
  0x3f   :  { %395 = vmatpush1.bf16.msra.mxu0 %v988_v33 }
  0x42   :  { %397 = vmatmul.mubr.bf16.vlgmr.msra.gmra.mrb[0].mxu0 %v839_v34 }
 0x101   :  { %v917_v1 = vpop.f32.mrb[0].mxu1 }
 0x102   :  { %v918_v2 = vpop.f32.mrb[1].mxu1 }
 0x103   :  { %v919_v3 = vadd.f32 %v918_v2, %v917_v1  ;;  %v920_v4 = vpop.f32.mrb[2].mxu1 }
 0x104   :  { %v921_v5 = vpop.f32.mrb[3].mxu1 }
 0x105   :  { %v440_v19 = vadd.f32 %v919_v3, %v97_v17 }
 0x107   :  { %v451_v38 = vcombine.high %v440_v19, %v440_v19 }
 0x115   :  { %v398_v57 = vpop.f32.mrb[0].mxu0 }
 0x116   :  { %v1203_v58 = vadd.f32 %v398_v57, %v89_v56  ;;  %v400_v59 = vpop.f32.mrb[1].mxu0  ;;  %v814_v56 = vstv %s1248_s3 }
 0x117   :  { %v402_v60 = vpop.f32.mrb[2].mxu0  ;;  %v401_v15 = vadd.f32 %v400_v59, %v93_v13 }
 0x118   :  { %v403_v61 = vpop.f32.mrb[3].mxu0  ;;  %452 = vrot.lane.b32.xlu0 %v1203_v58, %s1017_s1  ;;  %v446_v62 = vcombine.high %v1203_v58, %v1203_v58  ;;  %v821_v60 = vcombine.low %v817_v54, %v818_v55 }
 0x119   :  { %v893_v18 = vcombine.low %v401_v15, %v401_v15  ;;  %v449_v20 = vcombine.low %v1203_v58, %v401_v15  ;;  %v897_v21 = vcombine.high %v401_v15, %v401_v15  ;;  %v450_v37 = vcombine.high %v1203_v58, %v401_v15 }
 0x11c   :  { %529 = vrot.lane.b32.xlu0 %v446_v62, %s1017_s1 }
 0x18a   :  { %v453_v63 = vpop.permute.xlu0 %452 }
 0x18b   :  { %928 = vmatpush3.xpose.msk.msra.mxu1 %vm454_vm1, %v453_v63 }
 0x18c   :  { %932 = vmatprep.subr.mxu1 %v1015_v51 }
 0x18e   :  { %930 = vmatmul.mubr.msk.f32.vlgmr.msra.gmra.mrb[4].mxu1 %vm454_vm1, %v1203_v58  ;;  %v530_v0 = vpop.permute.xlu0 %529 }
 0x18f   :  { %933 = vmatpush3.xpose.msk.msra.mxu1 %vm454_vm1, %v530_v0  ;;  %934 = vmatprep.mubr.msk.f32.mxu1 %vm1016_vm0, %v1015_v51 }
 0x192   :  { %935 = vmatmul.mubr.msk.f32.vlgmr.msra.gmra.mrb[6].mxu1 %vm454_vm1, %v446_v62  ;;  %v822_v62 = vcombine.high %v817_v54, %v818_v55 }
 0x193   :  { %711 = vmatprep.mubr.f32.mxu1 %v1015_v51 }
 0x261   :  { %v525_v6 = vpop.f32.mrb[4].mxu1 }
 0x262   :  { %v931_v7 = vpop.f32.mrb[5].mxu1  ;;  %v606_v8 = vsel %vm605_vm2, %v525_v6, -inf }
 0x263   :  { %607 = vmax.xlane.f32.xlu1 %v606_v8 }
 0x265   :  { %v601_v9 = vpop.f32.mrb[6].mxu1 }
 0x266   :  { %v936_v10 = vpop.f32.mrb[7].mxu1  ;;  %v609_v11 = vsel %vm605_vm2, %v601_v9, -inf }
 0x267   :  { %610 = vmax.xlane.f32.xlu1 %v609_v11 }
 0x278   :  { %631 = vrot.lane.b32.xlu1 %v893_v18, %s1018_s2 }
 0x27c   :  { %633 = vrot.lane.b32.xlu1 %v440_v19, %s1018_s2 }
 0x280   :  { %629 = vrot.lane.b32.xlu1 %v449_v20, %s1018_s2 }
 0x284   :  { %721 = vrot.lane.b32.xlu1 %v897_v21, %s1018_s2 }
 0x2f0   :  { %v608_v22 = vpop.xlane.xlu1 %607 }
 0x2f1   :  { %v612_v23 = vsub.f32 %v525_v6, %v608_v22 }
 0x2f3   :  { %v614_v24 = vmul.f32 1.442695, %v612_v23 }
 0x2f4   :  { %v611_v25 = vpop.xlane.xlu1 %610 }
 0x2f5   :  { %1007 = vpow2.f32 %v614_v24  ;;  %v613_v26 = vsub.f32 %v601_v9, %v611_v25 }
 0x2f7   :  { %v616_v27 = vmul.f32 1.442695, %v613_v26 }
 0x2f8   :  { %v632_v28 = vpop.permute.xlu1 %631 }
 0x2f9   :  { %1009 = vpow2.f32 %v616_v27 }
 0x2fc   :  { %v634_v29 = vpop.permute.xlu1 %633 }
 0x2fd   :  { %v637_v30 = vsel %vm635_vm3, %v632_v28, %v634_v29 }
 0x2fe   :  { %894 = vmatprep.subr.msk.mxu1 %vm642_vm4, %v637_v30 }
 0x2ff   :  { %v1008_v31 = vpop.eup %1007 }
 0x300   :  { %v630_v32 = vpop.permute.xlu1 %629  ;;  %v618_v33 = vsel %vm605_vm2, %v1008_v31, 0.0 }
 0x301   :  { %v636_v34 = vsel %vm635_vm3, %v630_v32, %v632_v28  ;;  %619 = vadd.xlane.f32.xlu0 %v618_v33 }
 0x302   :  { %895 = vmatpush1.msk.msra.mxu1 %vm642_vm4, %v636_v34 }
 0x303   :  { %v1010_v35 = vpop.eup %1009 }
 0x304   :  { %v621_v36 = vsel %vm605_vm2, %v1010_v35, 0.0  ;;  %v722_v39 = vpop.permute.xlu1 %721 }
 0x305   :  { %622 = vadd.xlane.f32.xlu1 %v621_v36 }
 0x316   :  { %719 = vrot.lane.b32.xlu1 %v450_v37, %s1018_s2 }
 0x317   :  { %723 = vrot.lane.b32.xlu0 %v451_v38, %s1018_s2 }
 0x38e   :  { %v620_v40 = vpop.xlane.xlu0 %619 }
 0x38f   :  { %1011 = vrcp.f32 %v620_v40 }
 0x392   :  { %v623_v41 = vpop.xlane.xlu1 %622  ;;  %v724_v42 = vpop.permute.xlu0 %723 }
 0x393   :  { %1013 = vrcp.f32 %v623_v41  ;;  %v726_v43 = vsel %vm635_vm3, %v722_v39, %v724_v42 }
 0x394   :  { %898 = vmatprep.subr.msk.mxu1 %vm642_vm4, %v726_v43 }
 0x396   :  { %v720_v45 = vpop.permute.xlu1 %719 }
 0x397   :  { %v725_v47 = vsel %vm635_vm3, %v720_v45, %v722_v39 }
 0x399   :  { %v1012_v44 = vpop.eup %1011 }
 0x39a   :  { %v625_v46 = vmul.f32 %v1012_v44, %v1008_v31 }
 0x39c   :  { %896 = vmatmul.mubr.msk.f32.vlgmr.msra.gmra.mrb[8].mxu1 %vm638_vm5, %v625_v46 }
 0x39d   :  { %v1014_v48 = vpop.eup %1013  ;;  %899 = vmatpush1.msk.msra.mxu1 %vm642_vm4, %v725_v47  ;;  %798 = vmatprep.mubr.f32.mxu1 %v1015_v51 }
 0x39e   :  { %v627_v49 = vmul.f32 %v1014_v48, %v1010_v35 }
 0x3a0   :  { %900 = vmatmul.mubr.msk.f32.vlgmr.msra.gmra.mrb[10].mxu1 %vm638_vm5, %v627_v49 }
 0x46f   :  { %v713_v50 = vpop.f32.mrb[8].mxu1 }
 0x470   :  { %v715_v52 = vpop.f32.mrb[9].mxu1 }
 0x471   :  { %v810_v53 = vcombine.low %v713_v50, %v715_v52 }
 0x473   :  { %v800_v57 = vpop.f32.mrb[10].mxu1  ;;  %v815_v59 = vmul.f32 %v814_v56, %v810_v53 }
 0x474   :  { %v802_v58 = vpop.f32.mrb[11].mxu1 }
 0x475   :  { %v811_v61 = vcombine.low %v800_v57, %v802_v58  ;;  %v825_v63 = vadd.f32 %v821_v60, %v815_v59 }
 0x477   :  { %v816_v51 = vmul.f32 %v814_v56, %v811_v61 }
 0x479   :  { %v826_v0 = vadd.f32 %v822_v62, %v816_v51 }
 0x47b   :  { %v829_v1 = vcombine.low %v825_v63, %v826_v0  ;;  %v830_v2 = vcombine.high %v825_v63, %v826_v0 }
 0x47d   :  { %833 = vst [vmem:[%s1249_s4] sm:$0xff] %v829_v1  ;;  %834 = vst [vmem:[%s1249_s4 + $0x8] sm:$0xff] %v830_v2 }

// kernel: forward.13
= control target key start
LH: loop header
LB: loop body
LE: loop exit
PB: predicated region body
PF: predicated region fallthrough
CT: control target
= control target key end

     0   :  { %s1556_s12 = smov 0   ;;  %s1558_s13 = smov 0   ;;  %s1884_s0 = inlined_call_operand.vmem [shape: bf16[2,4096], index: 0, kind: input, shape index: {}]   ;;  %s1885_s1 = inlined_call_operand.vmem [shape: bf16[4096,512], index: 1, kind: input, shape index: {}]   ;;  %s1886_s2 = inlined_call_operand.vmem [shape: f32[1,512], index: 2, kind: input, shape index: {}]   ;;  %s1887_s3 = inlined_call_operand.vmem [shape: bf16[2,512], index: 3, kind: output, shape index: {}]  }
   0x1   :  { %s1560_s14 = smov 0   ;;  %s1562_s15 = smov 0  }
   0x2   :  { %s1564_s16 = smov 0   ;;  %s1566_s17 = smov 0  }
   0x3   :  { %s1568_s18 = smov 0  }
   0x4 LB: > { %s25_s19 = sadd.s32 1, %s1523_s16  ;;  %s28_s20 = sadd.s32 1, %s1527_s17  ;;  %s1531_s18 = sphi %s1568_s18, %s13_s18   ;;  %s1527_s17 = sphi %s1566_s17, %s1893_s17   ;;  %s1523_s16 = sphi %s1564_s16, %s1892_s16   ;;  %s1519_s15 = sphi %s1562_s15, %s1891_s15   ;;  %s1515_s14 = sphi %s1560_s14, %s1890_s14   ;;  %s1511_s13 = sphi %s1558_s13, %s1889_s13   ;;  %s1507_s12 = sphi %s1556_s12, %s1888_s12  }
   0x5   : > { %p26_p0 = scmp.ge.s32.totalorder %s25_s19, 8  ;;  %p76_p1 = scmp.ne.s32.totalorder %s1511_s13, %s1507_s12 }
   0x6   : > { %p77_p2 = scmp.eq.s32.totalorder %s1531_s18, 0  ;;  %s69_s24 = sadd.s32 1, %s1511_s13 }
   0x7   : > { %s1895_s19 = smov (%p26_p0, %s25_s19), 0  ;;  %s1897_s20 = smov (!%p26_p0, %s28_s20), %s1527_s17 }
   0x8   : > { %p78_p3 = por %p77_p2, %p76_p1  ;;  %p30_p4 = scmp.ge.s32.totalorder %s1897_s20, 2 }
   0x9   : > { %s64_s21 = ssub.s32 %s1523_s16, %s1895_s19  ;;  %p1237_p6 = scmp.ge.s32.totalorder %s1531_s18, 16 }
   0xa   : > { %s1899_s20 = smov (%p30_p4, %s1897_s20), 0 }
   0xb   : > { %s65_s22 = ssub.s32 %s1527_s17, %s1899_s20  ;;  %156 = sbr.rel (%p1237_p6) target bundleno = 57 (0x39), region = 16 }
   0xc   : > { %s66_s23 = sor.u32 %s65_s22, %s64_s21 }
   0xd   : > { %p67_p5 = scmp.eq.s32.totalorder %s66_s23, 0 }
   0xf   : > { %s1607_s25 = scalar_select %p67_p5, %s1511_s13, %s69_s24  }
  0x12   : > { %171 = sbr.rel (!%p78_p3) target bundleno = 57 (0x39), region = 24  ;;  %s173_s26 = sand.u32 (%p78_p3), 1, %s1511_s13  }
  0x13   : > { %s1240_s27 = sshll.u32 (%p78_p3), %s1527_s17, 1  ;;  %s1238_s28 = sshll.u32 (%p78_p3), %s173_s26, 9 }
  0x14   : > { %s1319_s29 = sshll.u32 (%p78_p3), %s1523_s16, 8  ;;  %s1621_s8 = scalar_lea.vmem (%p78_p3), [#allocation3], %s1238_s28 }
  0x15   : > { %s179_s30 = sadd.s32 (%p78_p3), %s1319_s29, %s1240_s27 }
  0x16   : > { %s1242_s4 = sshll.u32 (%p78_p3), %s179_s30, 2 }
  0x17   : > { %s1616_s7 = scalar_lea.vmem (%p78_p3), %s1885_s1, %s1242_s4 }
  0x18   : > { %v335_v0 = vld [vmem:[%s1616_s7] sm:$0xff] (%p78_p3)  ;;  %v337_v1 = vld [vmem:[%s1616_s7 + $0x10] sm:$0xff] (%p78_p3) }
  0x19   : > { %v339_v2 = vld [vmem:[%s1616_s7 + $0x20] sm:$0xff]  ;;  %336 = vst [vmem:[%s1621_s8] sm:$0xff] %v335_v0  ;;  %338 = vst [vmem:[%s1621_s8 + $0x8] sm:$0xff] %v337_v1  ;;  %v341_v3 = vld [vmem:[%s1616_s7 + $0x30] sm:$0xff] }
  0x1a   : > { %340 = vst [vmem:[%s1621_s8 + $0x10] sm:$0xff] %v339_v2  ;;  %v343_v4 = vld [vmem:[%s1616_s7 + $0x40] sm:$0xff]  ;;  %v345_v5 = vld [vmem:[%s1616_s7 + $0x50] sm:$0xff]  ;;  %342 = vst [vmem:[%s1621_s8 + $0x18] sm:$0xff] %v341_v3 }
  0x1b   : > { %344 = vst [vmem:[%s1621_s8 + $0x20] sm:$0xff] %v343_v4  ;;  %346 = vst [vmem:[%s1621_s8 + $0x28] sm:$0xff] %v345_v5  ;;  %v347_v6 = vld [vmem:[%s1616_s7 + $0x60] sm:$0xff]  ;;  %v349_v7 = vld [vmem:[%s1616_s7 + $0x70] sm:$0xff] }
  0x1c   : > { %v351_v8 = vld [vmem:[%s1616_s7 + $0x80] sm:$0xff]  ;;  %348 = vst [vmem:[%s1621_s8 + $0x30] sm:$0xff] %v347_v6  ;;  %350 = vst [vmem:[%s1621_s8 + $0x38] sm:$0xff] %v349_v7  ;;  %v353_v9 = vld [vmem:[%s1616_s7 + $0x90] sm:$0xff] }
  0x1d   : > { %352 = vst [vmem:[%s1621_s8 + $0x40] sm:$0xff] %v351_v8  ;;  %v355_v10 = vld [vmem:[%s1616_s7 + $0xa0] sm:$0xff]  ;;  %v357_v11 = vld [vmem:[%s1616_s7 + $0xb0] sm:$0xff]  ;;  %354 = vst [vmem:[%s1621_s8 + $0x48] sm:$0xff] %v353_v9 }
  0x1e   : > { %356 = vst [vmem:[%s1621_s8 + $0x50] sm:$0xff] %v355_v10  ;;  %358 = vst [vmem:[%s1621_s8 + $0x58] sm:$0xff] %v357_v11  ;;  %v359_v12 = vld [vmem:[%s1616_s7 + $0xc0] sm:$0xff]  ;;  %v361_v13 = vld [vmem:[%s1616_s7 + $0xd0] sm:$0xff] }
  0x1f   : > { %v363_v14 = vld [vmem:[%s1616_s7 + $0xe0] sm:$0xff]  ;;  %360 = vst [vmem:[%s1621_s8 + $0x60] sm:$0xff] %v359_v12  ;;  %362 = vst [vmem:[%s1621_s8 + $0x68] sm:$0xff] %v361_v13  ;;  %v365_v15 = vld [vmem:[%s1616_s7 + $0xf0] sm:$0xff] }
  0x20   : > { %364 = vst [vmem:[%s1621_s8 + $0x70] sm:$0xff] %v363_v14  ;;  %v367_v16 = vld [vmem:[%s1616_s7 + $0x100] sm:$0xff]  ;;  %v369_v17 = vld [vmem:[%s1616_s7 + $0x110] sm:$0xff]  ;;  %366 = vst [vmem:[%s1621_s8 + $0x78] sm:$0xff] %v365_v15 }
  0x21   : > { %368 = vst [vmem:[%s1621_s8 + $0x80] sm:$0xff] %v367_v16  ;;  %370 = vst [vmem:[%s1621_s8 + $0x88] sm:$0xff] %v369_v17  ;;  %v371_v18 = vld [vmem:[%s1616_s7 + $0x120] sm:$0xff]  ;;  %v373_v19 = vld [vmem:[%s1616_s7 + $0x130] sm:$0xff] }
  0x22   : > { %v375_v20 = vld [vmem:[%s1616_s7 + $0x140] sm:$0xff]  ;;  %372 = vst [vmem:[%s1621_s8 + $0x90] sm:$0xff] %v371_v18  ;;  %374 = vst [vmem:[%s1621_s8 + $0x98] sm:$0xff] %v373_v19  ;;  %v377_v21 = vld [vmem:[%s1616_s7 + $0x150] sm:$0xff] }
  0x23   : > { %376 = vst [vmem:[%s1621_s8 + $0xa0] sm:$0xff] %v375_v20  ;;  %v379_v22 = vld [vmem:[%s1616_s7 + $0x160] sm:$0xff]  ;;  %v381_v23 = vld [vmem:[%s1616_s7 + $0x170] sm:$0xff]  ;;  %378 = vst [vmem:[%s1621_s8 + $0xa8] sm:$0xff] %v377_v21 }
  0x24   : > { %380 = vst [vmem:[%s1621_s8 + $0xb0] sm:$0xff] %v379_v22  ;;  %382 = vst [vmem:[%s1621_s8 + $0xb8] sm:$0xff] %v381_v23  ;;  %v383_v24 = vld [vmem:[%s1616_s7 + $0x180] sm:$0xff]  ;;  %v385_v25 = vld [vmem:[%s1616_s7 + $0x190] sm:$0xff] }
  0x25   : > { %v387_v26 = vld [vmem:[%s1616_s7 + $0x1a0] sm:$0xff]  ;;  %384 = vst [vmem:[%s1621_s8 + $0xc0] sm:$0xff] %v383_v24  ;;  %386 = vst [vmem:[%s1621_s8 + $0xc8] sm:$0xff] %v385_v25  ;;  %v389_v27 = vld [vmem:[%s1616_s7 + $0x1b0] sm:$0xff] }
  0x26   : > { %388 = vst [vmem:[%s1621_s8 + $0xd0] sm:$0xff] %v387_v26  ;;  %v391_v28 = vld [vmem:[%s1616_s7 + $0x1c0] sm:$0xff]  ;;  %v393_v29 = vld [vmem:[%s1616_s7 + $0x1d0] sm:$0xff]  ;;  %390 = vst [vmem:[%s1621_s8 + $0xd8] sm:$0xff] %v389_v27 }
  0x27   : > { %392 = vst [vmem:[%s1621_s8 + $0xe0] sm:$0xff] %v391_v28  ;;  %394 = vst [vmem:[%s1621_s8 + $0xe8] sm:$0xff] %v393_v29  ;;  %v395_v30 = vld [vmem:[%s1616_s7 + $0x1e0] sm:$0xff]  ;;  %v397_v31 = vld [vmem:[%s1616_s7 + $0x1f0] sm:$0xff] }
  0x28   : > { %v399_v32 = vld [vmem:[%s1616_s7 + $0x200] sm:$0xff]  ;;  %396 = vst [vmem:[%s1621_s8 + $0xf0] sm:$0xff] %v395_v30  ;;  %398 = vst [vmem:[%s1621_s8 + $0xf8] sm:$0xff] %v397_v31  ;;  %v401_v33 = vld [vmem:[%s1616_s7 + $0x210] sm:$0xff] }
  0x29   : > { %400 = vst [vmem:[%s1621_s8 + $0x100] sm:$0xff] %v399_v32  ;;  %v403_v34 = vld [vmem:[%s1616_s7 + $0x220] sm:$0xff]  ;;  %v405_v35 = vld [vmem:[%s1616_s7 + $0x230] sm:$0xff]  ;;  %402 = vst [vmem:[%s1621_s8 + $0x108] sm:$0xff] %v401_v33 }
  0x2a   : > { %404 = vst [vmem:[%s1621_s8 + $0x110] sm:$0xff] %v403_v34  ;;  %406 = vst [vmem:[%s1621_s8 + $0x118] sm:$0xff] %v405_v35  ;;  %v407_v36 = vld [vmem:[%s1616_s7 + $0x240] sm:$0xff]  ;;  %v409_v37 = vld [vmem:[%s1616_s7 + $0x250] sm:$0xff] }
  0x2b   : > { %v411_v38 = vld [vmem:[%s1616_s7 + $0x260] sm:$0xff]  ;;  %408 = vst [vmem:[%s1621_s8 + $0x120] sm:$0xff] %v407_v36  ;;  %410 = vst [vmem:[%s1621_s8 + $0x128] sm:$0xff] %v409_v37  ;;  %v413_v39 = vld [vmem:[%s1616_s7 + $0x270] sm:$0xff] }
  0x2c   : > { %412 = vst [vmem:[%s1621_s8 + $0x130] sm:$0xff] %v411_v38  ;;  %v415_v40 = vld [vmem:[%s1616_s7 + $0x280] sm:$0xff]  ;;  %v417_v41 = vld [vmem:[%s1616_s7 + $0x290] sm:$0xff]  ;;  %414 = vst [vmem:[%s1621_s8 + $0x138] sm:$0xff] %v413_v39 }
  0x2d   : > { %416 = vst [vmem:[%s1621_s8 + $0x140] sm:$0xff] %v415_v40  ;;  %418 = vst [vmem:[%s1621_s8 + $0x148] sm:$0xff] %v417_v41  ;;  %v419_v42 = vld [vmem:[%s1616_s7 + $0x2a0] sm:$0xff]  ;;  %v421_v43 = vld [vmem:[%s1616_s7 + $0x2b0] sm:$0xff] }
  0x2e   : > { %v423_v44 = vld [vmem:[%s1616_s7 + $0x2c0] sm:$0xff]  ;;  %420 = vst [vmem:[%s1621_s8 + $0x150] sm:$0xff] %v419_v42  ;;  %422 = vst [vmem:[%s1621_s8 + $0x158] sm:$0xff] %v421_v43  ;;  %v425_v45 = vld [vmem:[%s1616_s7 + $0x2d0] sm:$0xff] }
  0x2f   : > { %424 = vst [vmem:[%s1621_s8 + $0x160] sm:$0xff] %v423_v44  ;;  %v427_v46 = vld [vmem:[%s1616_s7 + $0x2e0] sm:$0xff]  ;;  %v429_v47 = vld [vmem:[%s1616_s7 + $0x2f0] sm:$0xff]  ;;  %426 = vst [vmem:[%s1621_s8 + $0x168] sm:$0xff] %v425_v45 }
  0x30   : > { %428 = vst [vmem:[%s1621_s8 + $0x170] sm:$0xff] %v427_v46  ;;  %430 = vst [vmem:[%s1621_s8 + $0x178] sm:$0xff] %v429_v47  ;;  %v431_v48 = vld [vmem:[%s1616_s7 + $0x300] sm:$0xff]  ;;  %v433_v49 = vld [vmem:[%s1616_s7 + $0x310] sm:$0xff] }
  0x31   : > { %v435_v50 = vld [vmem:[%s1616_s7 + $0x320] sm:$0xff]  ;;  %432 = vst [vmem:[%s1621_s8 + $0x180] sm:$0xff] %v431_v48  ;;  %434 = vst [vmem:[%s1621_s8 + $0x188] sm:$0xff] %v433_v49  ;;  %v437_v51 = vld [vmem:[%s1616_s7 + $0x330] sm:$0xff] }
  0x32   : > { %436 = vst [vmem:[%s1621_s8 + $0x190] sm:$0xff] %v435_v50  ;;  %v439_v52 = vld [vmem:[%s1616_s7 + $0x340] sm:$0xff]  ;;  %v441_v53 = vld [vmem:[%s1616_s7 + $0x350] sm:$0xff]  ;;  %438 = vst [vmem:[%s1621_s8 + $0x198] sm:$0xff] %v437_v51 }
  0x33   : > { %440 = vst [vmem:[%s1621_s8 + $0x1a0] sm:$0xff] %v439_v52  ;;  %442 = vst [vmem:[%s1621_s8 + $0x1a8] sm:$0xff] %v441_v53  ;;  %v443_v54 = vld [vmem:[%s1616_s7 + $0x360] sm:$0xff]  ;;  %v445_v55 = vld [vmem:[%s1616_s7 + $0x370] sm:$0xff] }
  0x34   : > { %v447_v56 = vld [vmem:[%s1616_s7 + $0x380] sm:$0xff]  ;;  %444 = vst [vmem:[%s1621_s8 + $0x1b0] sm:$0xff] %v443_v54  ;;  %446 = vst [vmem:[%s1621_s8 + $0x1b8] sm:$0xff] %v445_v55  ;;  %v449_v57 = vld [vmem:[%s1616_s7 + $0x390] sm:$0xff] }
  0x35   : > { %448 = vst [vmem:[%s1621_s8 + $0x1c0] sm:$0xff] %v447_v56  ;;  %v451_v58 = vld [vmem:[%s1616_s7 + $0x3a0] sm:$0xff]  ;;  %v453_v59 = vld [vmem:[%s1616_s7 + $0x3b0] sm:$0xff]  ;;  %450 = vst [vmem:[%s1621_s8 + $0x1c8] sm:$0xff] %v449_v57 }
  0x36   : > { %452 = vst [vmem:[%s1621_s8 + $0x1d0] sm:$0xff] %v451_v58  ;;  %454 = vst [vmem:[%s1621_s8 + $0x1d8] sm:$0xff] %v453_v59  ;;  %v455_v60 = vld [vmem:[%s1616_s7 + $0x3c0] sm:$0xff]  ;;  %v457_v61 = vld [vmem:[%s1616_s7 + $0x3d0] sm:$0xff] }
  0x37   : > { %v459_v62 = vld [vmem:[%s1616_s7 + $0x3e0] sm:$0xff]  ;;  %456 = vst [vmem:[%s1621_s8 + $0x1e0] sm:$0xff] %v455_v60  ;;  %458 = vst [vmem:[%s1621_s8 + $0x1e8] sm:$0xff] %v457_v61  ;;  %v461_v63 = vld [vmem:[%s1616_s7 + $0x3f0] sm:$0xff] }
  0x38   : > { %460 = vst [vmem:[%s1621_s8 + $0x1f0] sm:$0xff] %v459_v62  ;;  %462 = vst [vmem:[%s1621_s8 + $0x1f8] sm:$0xff] %v461_v63 }
  0x39 PF: > { %p1243_p7 = scmp.ge.s32.totalorder %s1531_s18, 1  ;;  %p475_p8 = scmp.lt.s32.totalorder %s1531_s18, 17 }
  0x3b   : > { %p476_p9 = pnand %p1243_p7, %p475_p8 }
  0x3c   : > { %s482_s9 = sand.u32 (!%p476_p9), 1, %s1507_s12   ;;  %s1245_s10 = sshll.u32 (!%p476_p9), %s1515_s14, 2 }
  0x3d   : > { %479 = sbr.rel (%p476_p9) target bundleno = 386 (0x182), region = 66  ;;  %s1244_s11 = sshll.u32 (!%p476_p9), %s482_s9, 9 }
  0x3e   : > { %p523_p10 = scmp.lt.s32.totalorder (!%p476_p9), %s1245_s10, 31  ;;  %s1246_s21 = sshll.u32 (!%p476_p9), %s1519_s15, 1 }
  0x3f   : > { %p532_p11 = scmp.lt.s32.totalorder (!%p476_p9), %s1246_s21, 3  ;;  %s1769_s30 = scalar_lea.vmem (!%p476_p9), [#allocation3], %s1244_s11 }
  0x40   : > { %p1248_p12 = scmp.ne.s32.totalorder (!%p476_p9), %s1515_s14, 0 }
  0x44   : > { %s1901_s10 = smov (!%p523_p10, %s1245_s10), 31  ;;  %s1903_s21 = smov (!%p532_p11, %s1246_s21), 3 }
  0x45   : > { %s527_s24 = scalar_lea.vmem %s1884_s0, %s1901_s10  ;;  %s534_s12 = scalar_lea.vmem %s1886_s2, %s1903_s21  ;;  %v1533_v0 = vmov (!%p1248_p12), 0.0  }
  0x46   : > { %s543_s15 = scalar_lea.vmem %s1887_s3, %s1903_s21  ;;  %548 = sbr.rel (%p1248_p12) target bundleno = 77 (0x4d), region = 74  ;;  %549 = vst [vmem:[#allocation2] sm:$0xf] (!%p1248_p12), %v1533_v0 }
  0x4d PF: > { %v1381_v1 = vld [vmem:[%s1769_s30 + $0x4] ss:$8 sps:$4 sm:$0xff]   ;;  %v1385_v3 = vld [vmem:[%s1769_s30] ss:$8 sps:$4 sm:$0xff]   ;;  %v1387_v5 = vld [vmem:[%s1769_s30 + $0x14] ss:$8 sps:$4 sm:$0xff]   ;;  %v628_v41 = vlaneseq }
  0x4e   : > { %v1383_v2 = vld [vmem:[%s1769_s30 + $0x104] ss:$8 sps:$4 sm:$0xff]   ;;  %965 = vmatprep.subr.bf16.mxu1 %v1381_v1  ;;  %v1386_v4 = vld [vmem:[%s1769_s30 + $0x100] ss:$8 sps:$4 sm:$0xff]   ;;  %v1389_v6 = vld [vmem:[%s1769_s30 + $0x114] ss:$8 sps:$4 sm:$0xff]  }
  0x4f   : > { %1006 = vmatprep.subr.bf16.mxu0 %v1383_v2  ;;  %966 = vmatpush1.bf16.msra.mxu1 %v1385_v3  ;;  %v1391_v7 = vld [vmem:[%s1769_s30 + $0x10] ss:$8 sps:$4 sm:$0xff]   ;;  %v1393_v9 = vld [vmem:[%s1769_s30 + $0x24] ss:$8 sps:$4 sm:$0xff]   ;;  %v1397_v11 = vld [vmem:[%s1769_s30 + $0x20] ss:$8 sps:$4 sm:$0xff]  }
  0x50   : > { %1007 = vmatpush1.bf16.msra.mxu0 %v1386_v4  ;;  %967 = vmatprep.subr.bf16.mxu1 %v1387_v5  ;;  %v1392_v8 = vld [vmem:[%s1769_s30 + $0x110] ss:$8 sps:$4 sm:$0xff]   ;;  %v1395_v10 = vld [vmem:[%s1769_s30 + $0x124] ss:$8 sps:$4 sm:$0xff]   ;;  %v1398_v12 = vld [vmem:[%s1769_s30 + $0x120] ss:$8 sps:$4 sm:$0xff]  }
  0x51   : > { %1008 = vmatprep.subr.bf16.mxu0 %v1389_v6  ;;  %v1399_v13 = vld [vmem:[%s1769_s30 + $0x34] ss:$8 sps:$4 sm:$0xff]   ;;  %v1403_v15 = vld [vmem:[%s1769_s30 + $0x30] ss:$8 sps:$4 sm:$0xff]   ;;  %v1405_v17 = vld [vmem:[%s1769_s30 + $0x44] ss:$8 sps:$4 sm:$0xff]  }
  0x52   : > { %v1401_v14 = vld [vmem:[%s1769_s30 + $0x134] ss:$8 sps:$4 sm:$0xff]   ;;  %v1404_v16 = vld [vmem:[%s1769_s30 + $0x130] ss:$8 sps:$4 sm:$0xff]   ;;  %v1407_v18 = vld [vmem:[%s1769_s30 + $0x144] ss:$8 sps:$4 sm:$0xff]  }
  0x53   : > { %968 = vmatpush1.bf16.msra.mxu1 %v1391_v7  ;;  %v1409_v19 = vld [vmem:[%s1769_s30 + $0x40] ss:$8 sps:$4 sm:$0xff]   ;;  %v1411_v21 = vld [vmem:[%s1769_s30 + $0x54] ss:$8 sps:$4 sm:$0xff]   ;;  %v1415_v23 = vld [vmem:[%s1769_s30 + $0x50] ss:$8 sps:$4 sm:$0xff]  }
  0x54   : > { %1009 = vmatpush1.bf16.msra.mxu0 %v1392_v8  ;;  %969 = vmatprep.subr.bf16.mxu1 %v1393_v9  ;;  %v1410_v20 = vld [vmem:[%s1769_s30 + $0x140] ss:$8 sps:$4 sm:$0xff]   ;;  %v1413_v22 = vld [vmem:[%s1769_s30 + $0x154] ss:$8 sps:$4 sm:$0xff]   ;;  %v1416_v24 = vld [vmem:[%s1769_s30 + $0x150] ss:$8 sps:$4 sm:$0xff]  }
  0x55   : > { %1010 = vmatprep.subr.bf16.mxu0 %v1395_v10  ;;  %v1417_v25 = vld [vmem:[%s1769_s30 + $0x64] ss:$8 sps:$4 sm:$0xff]   ;;  %v1421_v27 = vld [vmem:[%s1769_s30 + $0x60] ss:$8 sps:$4 sm:$0xff]   ;;  %v1423_v29 = vld [vmem:[%s1769_s30 + $0x74] ss:$8 sps:$4 sm:$0xff]  }
  0x56   : > { %v1419_v26 = vld [vmem:[%s1769_s30 + $0x164] ss:$8 sps:$4 sm:$0xff]   ;;  %v1422_v28 = vld [vmem:[%s1769_s30 + $0x160] ss:$8 sps:$4 sm:$0xff]   ;;  %v1425_v30 = vld [vmem:[%s1769_s30 + $0x174] ss:$8 sps:$4 sm:$0xff]  }
  0x57   : > { %970 = vmatpush1.bf16.msra.mxu1 %v1397_v11  ;;  %v1427_v31 = vld [vmem:[%s1769_s30 + $0x70] ss:$8 sps:$4 sm:$0xff]   ;;  %v1429_v33 = vld [vmem:[%s1769_s30 + $0x84] ss:$8 sps:$4 sm:$0xff]   ;;  %v1433_v35 = vld [vmem:[%s1769_s30 + $0x80] ss:$8 sps:$4 sm:$0xff]  }
  0x58   : > { %1011 = vmatpush1.bf16.msra.mxu0 %v1398_v12  ;;  %971 = vmatprep.subr.bf16.mxu1 %v1399_v13  ;;  %v1428_v32 = vld [vmem:[%s1769_s30 + $0x170] ss:$8 sps:$4 sm:$0xff]   ;;  %v1431_v34 = vld [vmem:[%s1769_s30 + $0x184] ss:$8 sps:$4 sm:$0xff]   ;;  %v1434_v36 = vld [vmem:[%s1769_s30 + $0x180] ss:$8 sps:$4 sm:$0xff]  }
  0x59   : > { %1012 = vmatprep.subr.bf16.mxu0 %v1401_v14  ;;  %v1435_v37 = vld [vmem:[%s1769_s30 + $0x94] ss:$8 sps:$4 sm:$0xff]   ;;  %v1534_v39 = vmov 1966171168   ;;  %v1439_v42 = vld [vmem:[%s1769_s30 + $0x90] ss:$8 sps:$4 sm:$0xff]  }
  0x5a   : > { %v1437_v38 = vld [vmem:[%s1769_s30 + $0x194] ss:$8 sps:$4 sm:$0xff]   ;;  %v626_v40 = vunpack.c.l.s4 %v1534_v39  ;;  %v1440_v43 = vld [vmem:[%s1769_s30 + $0x190] ss:$8 sps:$4 sm:$0xff]   ;;  %v1441_v44 = vld [vmem:[%s1769_s30 + $0xa4] ss:$8 sps:$4 sm:$0xff]  }
  0x5b   : > { %972 = vmatpush1.bf16.msra.mxu1 %v1403_v15  ;;  %v1443_v45 = vld [vmem:[%s1769_s30 + $0x1a4] ss:$8 sps:$4 sm:$0xff]   ;;  %v1814_v47 = vshrl.u32 %v628_v41, 7  ;;  %v1445_v48 = vld [vmem:[%s1769_s30 + $0xa0] ss:$8 sps:$4 sm:$0xff]   ;;  %p1314_p13 = scmp.ne.s32.totalorder %s1515_s14, 7 }
  0x5c   : > { %1013 = vmatpush1.bf16.msra.mxu0 %v1404_v16  ;;  %973 = vmatprep.subr.bf16.mxu1 %v1405_v17  ;;  %v627_v46 = vunpack.c.0.s8 %v626_v40  ;;  %v1446_v49 = vld [vmem:[%s1769_s30 + $0x1a0] ss:$8 sps:$4 sm:$0xff]   ;;  %v1447_v50 = vld [vmem:[%s1769_s30 + $0xb4] ss:$8 sps:$4 sm:$0xff]   ;;  %v1451_v54 = vld [vmem:[%s1769_s30 + $0xb0] ss:$8 sps:$4 sm:$0xff]  }
  0x5d   : > { %1014 = vmatprep.subr.bf16.mxu0 %v1407_v18  ;;  %v1449_v51 = vld [vmem:[%s1769_s30 + $0x1b4] ss:$8 sps:$4 sm:$0xff]   ;;  %v1452_v55 = vld [vmem:[%s1769_s30 + $0x1b0] ss:$8 sps:$4 sm:$0xff]   ;;  %v1453_v57 = vld [vmem:[%s1769_s30 + $0xc4] ss:$8 sps:$4 sm:$0xff]  }
  0x5e   : > { %v1821_v52 = vsub.s32 %v627_v46, %v1814_v47  ;;  %v1249_v53 = vld.sshfl [vmem:[%s527_s24] sm:$0x33 pattern:$0x75316420]  ;;  %v1455_v58 = vld [vmem:[%s1769_s30 + $0x1c4] ss:$8 sps:$4 sm:$0xff]  }
  0x5f   : > { %974 = vmatpush1.bf16.msra.mxu1 %v1409_v19  ;;  %v624_v56 = vcombine.high %v1249_v53, %v1249_v53  ;;  %v1457_v60 = vld [vmem:[%s1769_s30 + $0xc0] ss:$8 sps:$4 sm:$0xff]   ;;  %v1459_v63 = vld [vmem:[%s1769_s30 + $0xd4] ss:$8 sps:$4 sm:$0xff]   ;;  %v1463_v1 = vld [vmem:[%s1769_s30 + $0xd0] ss:$8 sps:$4 sm:$0xff]  }
  0x60   : > { %1015 = vmatpush1.bf16.msra.mxu0 %v1410_v20  ;;  %975 = vmatprep.subr.bf16.mxu1 %v1411_v21  ;;  %v1458_v61 = vld [vmem:[%s1769_s30 + $0x1c0] ss:$8 sps:$4 sm:$0xff]   ;;  %v1461_v0 = vld [vmem:[%s1769_s30 + $0x1d4] ss:$8 sps:$4 sm:$0xff]   ;;  %v1464_v2 = vld [vmem:[%s1769_s30 + $0x1d0] ss:$8 sps:$4 sm:$0xff]   ;;  %v631_v9 = vrot.slane %v1249_v53, %v1821_v52 }
  0x61   : > { %1016 = vmatprep.subr.bf16.mxu0 %v1413_v22  ;;  %v638_v59 = vrot.slane %v624_v56, %v1821_v52  ;;  %v1465_v3 = vld [vmem:[%s1769_s30 + $0xe4] ss:$8 sps:$4 sm:$0xff]   ;;  %v1469_v5 = vld [vmem:[%s1769_s30 + $0xe0] ss:$8 sps:$4 sm:$0xff]   ;;  %v1471_v7 = vld [vmem:[%s1769_s30 + $0xf4] ss:$8 sps:$4 sm:$0xff]  }
  0x62   : > { %v1467_v4 = vld [vmem:[%s1769_s30 + $0x1e4] ss:$8 sps:$4 sm:$0xff]   ;;  %v1470_v6 = vld [vmem:[%s1769_s30 + $0x1e0] ss:$8 sps:$4 sm:$0xff]   ;;  %v1473_v8 = vld [vmem:[%s1769_s30 + $0x1f4] ss:$8 sps:$4 sm:$0xff]   ;;  %v639_v12 = vcombine.high %v631_v9, %v631_v9 }
  0x63   : > { %976 = vmatpush1.bf16.msra.mxu1 %v1415_v23  ;;  %v640_v62 = vcombine.high %v638_v59, %v638_v59  ;;  %997 = vmatprep.mubr.bf16.mxu1 %v638_v59  ;;  %v1475_v10 = vld [vmem:[%s1769_s30 + $0xf0] ss:$8 sps:$4 sm:$0xff]   ;;  %v1535_v13 = vmov 1983009808  }
  0x64   : > { %1017 = vmatpush1.bf16.msra.mxu0 %v1416_v24  ;;  %977 = vmatprep.subr.bf16.mxu1 %v1417_v25  ;;  %v1476_v11 = vld [vmem:[%s1769_s30 + $0x1f0] ss:$8 sps:$4 sm:$0xff]   ;;  %v1051_v14 = vunpack.c.l.s4 %v1535_v13 }
  0x65   : > { %1018 = vmatprep.subr.bf16.mxu0 %v1419_v26  ;;  %1038 = vmatprep.mubr.bf16.mxu0 %v640_v62 }
  0x66   : > { %v1052_v15 = vunpack.c.0.s8 %v1051_v14 }
  0x67   : > { %978 = vmatpush1.bf16.msra.mxu1 %v1421_v27 }
  0x68   : > { %1019 = vmatpush1.bf16.msra.mxu0 %v1422_v28  ;;  %979 = vmatprep.subr.bf16.mxu1 %v1423_v29  ;;  %v1055_v22 = vsub.s32 %v1052_v15, %v1814_v47  ;;  %v550_v28 = vld [vmem:[#allocation2] sm:$0xf] }
  0x69   : > { %1020 = vmatprep.subr.bf16.mxu0 %v1425_v30 }
  0x6b   : > { %980 = vmatpush1.bf16.msra.mxu1 %v1427_v31  ;;  %v1065_v31 = vld [vmem:[%s534_s12] sm:$0x3] (!%p1314_p13) }
  0x6c   : > { %1021 = vmatpush1.bf16.msra.mxu0 %v1428_v32  ;;  %981 = vmatprep.subr.bf16.mxu1 %v1429_v33  ;;  %v1069_v32 = vsub.s32 (!%p1314_p13), 0, %v1814_v47  ;;  %v1073_v33 = vsub.s32 (!%p1314_p13), 1, %v1814_v47 }
  0x6d   : > { %1022 = vmatprep.subr.bf16.mxu0 %v1431_v34 }
  0x6e   : > { %v1070_v34 = vrot.slane (!%p1314_p13), %v1065_v31, %v1069_v32 }
  0x6f   : > { %982 = vmatpush1.bf16.msra.mxu1 %v1433_v35  ;;  %v1074_v35 = vrot.slane (!%p1314_p13), %v1065_v31, %v1073_v33 }
  0x70   : > { %1023 = vmatpush1.bf16.msra.mxu0 %v1434_v36  ;;  %983 = vmatprep.subr.bf16.mxu1 %v1435_v37 }
  0x71   : > { %1024 = vmatprep.subr.bf16.mxu0 %v1437_v38  ;;  %v1075_v36 = vcombine.low (!%p1314_p13), %v1070_v34, %v1074_v35 }
  0x73   : > { %984 = vmatpush1.bf16.msra.mxu1 %v1439_v42  ;;  %v1082_v38 = vrot.slane (!%p1314_p13), %v1075_v36, %v1055_v22 }
  0x74   : > { %1025 = vmatpush1.bf16.msra.mxu0 %v1440_v43  ;;  %985 = vmatprep.subr.bf16.mxu1 %v1441_v44 }
  0x75   : > { %1026 = vmatprep.subr.bf16.mxu0 %v1443_v45 }
  0x77   : > { %986 = vmatpush1.bf16.msra.mxu1 %v1445_v48 }
  0x78   : > { %1027 = vmatpush1.bf16.msra.mxu0 %v1446_v49  ;;  %987 = vmatprep.subr.bf16.mxu1 %v1447_v50 }
  0x79   : > { %1028 = vmatprep.subr.bf16.mxu0 %v1449_v51 }
  0x7b   : > { %988 = vmatpush1.bf16.msra.mxu1 %v1451_v54 }
  0x7c   : > { %1029 = vmatpush1.bf16.msra.mxu0 %v1452_v55  ;;  %989 = vmatprep.subr.bf16.mxu1 %v1453_v57 }
  0x7d   : > { %1030 = vmatprep.subr.bf16.mxu0 %v1455_v58 }
  0x7f   : > { %990 = vmatpush1.bf16.msra.mxu1 %v1457_v60 }
  0x80   : > { %1031 = vmatpush1.bf16.msra.mxu0 %v1458_v61  ;;  %991 = vmatprep.subr.bf16.mxu1 %v1459_v63 }
  0x81   : > { %1032 = vmatprep.subr.bf16.mxu0 %v1461_v0 }
  0x83   : > { %992 = vmatpush1.bf16.msra.mxu1 %v1463_v1 }
  0x84   : > { %1033 = vmatpush1.bf16.msra.mxu0 %v1464_v2  ;;  %993 = vmatprep.subr.bf16.mxu1 %v1465_v3 }
  0x85   : > { %1034 = vmatprep.subr.bf16.mxu0 %v1467_v4 }
  0x87   : > { %994 = vmatpush1.bf16.msra.mxu1 %v1469_v5 }
  0x88   : > { %1035 = vmatpush1.bf16.msra.mxu0 %v1470_v6  ;;  %995 = vmatprep.subr.bf16.mxu1 %v1471_v7 }
  0x89   : > { %1036 = vmatprep.subr.bf16.mxu0 %v1473_v8 }
  0x8b   : > { %996 = vmatpush1.bf16.msra.mxu1 %v1475_v10 }
  0x8c   : > { %1037 = vmatpush1.bf16.msra.mxu0 %v1476_v11 }
  0x8e   : > { %998 = vmatmul.mubr.bf16.vlgmr.msra.gmra.mrb[0].mxu1 %v631_v9 }
  0x8f   : > { %1039 = vmatmul.mubr.bf16.vlgmr.msra.gmra.mrb[0].mxu0 %v639_v12 }
 0x161   : > { %v999_v16 = vpop.f32.mrb[0].mxu1 }
 0x162   : > { %v1040_v17 = vpop.f32.mrb[0].mxu0  ;;  %v1001_v19 = vpop.f32.mrb[1].mxu1 }
 0x163   : > { %v1041_v18 = vadd.f32 %v1040_v17, %v999_v16  ;;  %v1042_v20 = vpop.f32.mrb[1].mxu0  ;;  %v1003_v23 = vpop.f32.mrb[2].mxu1 }
 0x164   : > { %v1043_v21 = vadd.f32 %v1042_v20, %v1001_v19  ;;  %v1044_v24 = vpop.f32.mrb[2].mxu0  ;;  %v1004_v25 = vpop.f32.mrb[3].mxu1 }
 0x165   : > { %v1045_v26 = vpop.f32.mrb[3].mxu0 }
 0x166   : > { %v1049_v27 = vcombine.low %v1041_v18, %v1043_v21  ;;  %1063 = sbr.rel (%p1314_p13) target bundleno = 386 (0x182), region = 78 }
 0x168   : > { %v1056_v29 = vrot.slane %v1049_v27, %v1055_v22 }
 0x16a   : > { %v1058_v30 = vadd.f32 %v1056_v29, %v550_v28 }
 0x16c   : > { %1059 = vst [vmem:[#allocation2] sm:$0xf] %v1058_v30 }
 0x173   : > { %v1064_v37 = vld [vmem:[#allocation2] sm:$0xf] }
 0x174   : > { %v1084_v39 = vadd.f32 %v1082_v38, %v1064_v37 }
 0x176   : > { %vm1085_vm0 = vcmp.ge.f32.partialorder %v1084_v39, 0.0  ;;  %v1086_v40 = vmul.f32 0.1, %v1084_v39 }
 0x178   : > { %v1087_v41 = vsel %vm1085_vm0, %v1084_v39, %v1086_v40 }
 0x179   : > { %v1095_v42 = vrot.slane %v1087_v41, %v1055_v22 }
 0x17b   : > { %v1096_v43 = vcombine.high %v1095_v42, %v1095_v42 }
 0x17d   : > { %v1315_v44 = vpack.c.bf16 %v1096_v43, %v1095_v42 }
 0x17f   : > { %v1110_v45 = vrot.slane %v1315_v44, %v1821_v52 }
 0x181   : > { %1316 = vst.sshfl [vmem:[%s543_s15] sm:$0x5 pattern:$0x73625140] %v1110_v45 }
 0x182 PF: > { %s13_s18 = sadd.s32 1, %s1531_s18   ;;  %s1888_s12 = smov %s1511_s13 }
 0x183   : > { %p10_p0 = scmp.ge.s32.totalorder %s13_s18, 18   ;;  %s1889_s13 = smov %s1607_s25 }
 0x184   : > { %s1890_s14 = smov %s1523_s16  ;;  %s1891_s15 = smov %s1527_s17 }
 0x185   : > { %s1892_s16 = smov %s1895_s19  ;;  %s1893_s17 = smov %s1899_s20 }
 0x186   :  { %12 = sbr.rel (!%p10_p0) target bundleno = 4 (0x4), region = 119 }

// kernel: forward.14
= control target key start
LH: loop header
LB: loop body
LE: loop exit
PB: predicated region body
PF: predicated region fallthrough
CT: control target
= control target key end

     0   :  { %s1492_s12 = smov 0   ;;  %s1494_s13 = smov 0   ;;  %s1776_s0 = inlined_call_operand.vmem [shape: bf16[2,512], index: 0, kind: input, shape index: {}]   ;;  %s1777_s1 = inlined_call_operand.vmem [shape: bf16[512,512], index: 1, kind: input, shape index: {}]   ;;  %s1778_s2 = inlined_call_operand.vmem [shape: f32[1,512], index: 2, kind: input, shape index: {}]   ;;  %s1779_s3 = inlined_call_operand.vmem [shape: f32[2,512], index: 3, kind: output, shape index: {}]  }
   0x1   :  { %s1496_s14 = smov 0   ;;  %s1498_s15 = smov 0  }
   0x2   :  { %s1500_s16 = smov 0  }
   0x3 LB: > { %s28_s17 = sadd.s32 1, %s1463_s15  ;;  %p76_p1 = scmp.ne.s32.totalorder %s1455_s13, %s1451_s12  ;;  %s1467_s16 = sphi %s1500_s16, %s13_s16   ;;  %s1463_s15 = sphi %s1498_s15, %s1783_s15   ;;  %s1459_s14 = sphi %s1496_s14, %s1782_s14   ;;  %s1455_s13 = sphi %s1494_s13, %s1781_s13   ;;  %s1451_s12 = sphi %s1492_s12, %s1780_s12  }
   0x4   : > { %p30_p0 = scmp.ge.s32.totalorder %s28_s17, 2  ;;  %p77_p2 = scmp.eq.s32.totalorder %s1467_s16, 0 }
   0x5   : > { %s69_s19 = sadd.s32 1, %s1455_s13  ;;  %p1211_p5 = scmp.ge.s32.totalorder %s1467_s16, 2 }
   0x6   : > { %s1785_s17 = smov (%p30_p0, %s28_s17), 0  ;;  %p78_p3 = por %p77_p2, %p76_p1 }
   0x7   : > { %s65_s18 = ssub.s32 %s1463_s15, %s1785_s17  ;;  %168 = sbr.rel (%p1211_p5) target bundleno = 50 (0x32), region = 20 }
   0x8   : > { %p67_p4 = scmp.eq.s32.totalorder %s65_s18, 0 }
   0xa   : > { %s1527_s20 = scalar_select %p67_p4, %s1455_s13, %s69_s19  }
   0xe   : > { %171 = sbr.rel (!%p78_p3) target bundleno = 50 (0x32), region = 24  ;;  %s173_s21 = sand.u32 (%p78_p3), 1, %s1455_s13  }
   0xf   : > { %s1287_s22 = sshll.u32 (%p78_p3), %s1463_s15, 3  ;;  %s1212_s23 = sshll.u32 (%p78_p3), %s173_s21, 9 }
  0x10   : > { %s1535_s26 = scalar_lea.vmem (%p78_p3), %s1777_s1, %s1287_s22  ;;  %s1540_s27 = scalar_lea.vmem (%p78_p3), [#allocation3], %s1212_s23 }
  0x11   : > { %v335_v0 = vld [vmem:[%s1535_s26] sm:$0xff] (%p78_p3)  ;;  %v337_v1 = vld [vmem:[%s1535_s26 + $0x10] sm:$0xff] (%p78_p3) }
  0x12   : > { %v339_v2 = vld [vmem:[%s1535_s26 + $0x20] sm:$0xff] (%p78_p3)  ;;  %336 = vst [vmem:[%s1540_s27] sm:$0xff] (%p78_p3), %v335_v0  ;;  %338 = vst [vmem:[%s1540_s27 + $0x8] sm:$0xff] (%p78_p3), %v337_v1  ;;  %v341_v3 = vld [vmem:[%s1535_s26 + $0x30] sm:$0xff] (%p78_p3) }
  0x13   : > { %340 = vst [vmem:[%s1540_s27 + $0x10] sm:$0xff] (%p78_p3), %v339_v2  ;;  %v343_v4 = vld [vmem:[%s1535_s26 + $0x40] sm:$0xff] (%p78_p3)  ;;  %v345_v5 = vld [vmem:[%s1535_s26 + $0x50] sm:$0xff] (%p78_p3)  ;;  %342 = vst [vmem:[%s1540_s27 + $0x18] sm:$0xff] (%p78_p3), %v341_v3 }
  0x14   : > { %344 = vst [vmem:[%s1540_s27 + $0x20] sm:$0xff] (%p78_p3), %v343_v4  ;;  %346 = vst [vmem:[%s1540_s27 + $0x28] sm:$0xff] (%p78_p3), %v345_v5  ;;  %v347_v6 = vld [vmem:[%s1535_s26 + $0x60] sm:$0xff] (%p78_p3)  ;;  %v349_v7 = vld [vmem:[%s1535_s26 + $0x70] sm:$0xff] (%p78_p3) }
  0x15   : > { %v351_v8 = vld [vmem:[%s1535_s26 + $0x80] sm:$0xff]  ;;  %348 = vst [vmem:[%s1540_s27 + $0x30] sm:$0xff] %v347_v6  ;;  %350 = vst [vmem:[%s1540_s27 + $0x38] sm:$0xff] %v349_v7  ;;  %v353_v9 = vld [vmem:[%s1535_s26 + $0x90] sm:$0xff] }
  0x16   : > { %352 = vst [vmem:[%s1540_s27 + $0x40] sm:$0xff] %v351_v8  ;;  %v355_v10 = vld [vmem:[%s1535_s26 + $0xa0] sm:$0xff]  ;;  %v357_v11 = vld [vmem:[%s1535_s26 + $0xb0] sm:$0xff]  ;;  %354 = vst [vmem:[%s1540_s27 + $0x48] sm:$0xff] %v353_v9 }
  0x17   : > { %356 = vst [vmem:[%s1540_s27 + $0x50] sm:$0xff] %v355_v10  ;;  %358 = vst [vmem:[%s1540_s27 + $0x58] sm:$0xff] %v357_v11  ;;  %v359_v12 = vld [vmem:[%s1535_s26 + $0xc0] sm:$0xff]  ;;  %v361_v13 = vld [vmem:[%s1535_s26 + $0xd0] sm:$0xff] }
  0x18   : > { %v363_v14 = vld [vmem:[%s1535_s26 + $0xe0] sm:$0xff]  ;;  %360 = vst [vmem:[%s1540_s27 + $0x60] sm:$0xff] %v359_v12  ;;  %362 = vst [vmem:[%s1540_s27 + $0x68] sm:$0xff] %v361_v13  ;;  %v365_v15 = vld [vmem:[%s1535_s26 + $0xf0] sm:$0xff] }
  0x19   : > { %364 = vst [vmem:[%s1540_s27 + $0x70] sm:$0xff] %v363_v14  ;;  %v367_v16 = vld [vmem:[%s1535_s26 + $0x100] sm:$0xff]  ;;  %v369_v17 = vld [vmem:[%s1535_s26 + $0x110] sm:$0xff]  ;;  %366 = vst [vmem:[%s1540_s27 + $0x78] sm:$0xff] %v365_v15 }
  0x1a   : > { %368 = vst [vmem:[%s1540_s27 + $0x80] sm:$0xff] %v367_v16  ;;  %370 = vst [vmem:[%s1540_s27 + $0x88] sm:$0xff] %v369_v17  ;;  %v371_v18 = vld [vmem:[%s1535_s26 + $0x120] sm:$0xff]  ;;  %v373_v19 = vld [vmem:[%s1535_s26 + $0x130] sm:$0xff] }
  0x1b   : > { %v375_v20 = vld [vmem:[%s1535_s26 + $0x140] sm:$0xff]  ;;  %372 = vst [vmem:[%s1540_s27 + $0x90] sm:$0xff] %v371_v18  ;;  %374 = vst [vmem:[%s1540_s27 + $0x98] sm:$0xff] %v373_v19  ;;  %v377_v21 = vld [vmem:[%s1535_s26 + $0x150] sm:$0xff] }
  0x1c   : > { %376 = vst [vmem:[%s1540_s27 + $0xa0] sm:$0xff] %v375_v20  ;;  %v379_v22 = vld [vmem:[%s1535_s26 + $0x160] sm:$0xff]  ;;  %v381_v23 = vld [vmem:[%s1535_s26 + $0x170] sm:$0xff]  ;;  %378 = vst [vmem:[%s1540_s27 + $0xa8] sm:$0xff] %v377_v21 }
  0x1d   : > { %380 = vst [vmem:[%s1540_s27 + $0xb0] sm:$0xff] %v379_v22  ;;  %382 = vst [vmem:[%s1540_s27 + $0xb8] sm:$0xff] %v381_v23  ;;  %v383_v24 = vld [vmem:[%s1535_s26 + $0x180] sm:$0xff]  ;;  %v385_v25 = vld [vmem:[%s1535_s26 + $0x190] sm:$0xff] }
  0x1e   : > { %v387_v26 = vld [vmem:[%s1535_s26 + $0x1a0] sm:$0xff]  ;;  %384 = vst [vmem:[%s1540_s27 + $0xc0] sm:$0xff] %v383_v24  ;;  %386 = vst [vmem:[%s1540_s27 + $0xc8] sm:$0xff] %v385_v25  ;;  %v389_v27 = vld [vmem:[%s1535_s26 + $0x1b0] sm:$0xff] }
  0x1f   : > { %388 = vst [vmem:[%s1540_s27 + $0xd0] sm:$0xff] %v387_v26  ;;  %v391_v28 = vld [vmem:[%s1535_s26 + $0x1c0] sm:$0xff]  ;;  %v393_v29 = vld [vmem:[%s1535_s26 + $0x1d0] sm:$0xff]  ;;  %390 = vst [vmem:[%s1540_s27 + $0xd8] sm:$0xff] %v389_v27 }
  0x20   : > { %392 = vst [vmem:[%s1540_s27 + $0xe0] sm:$0xff] %v391_v28  ;;  %394 = vst [vmem:[%s1540_s27 + $0xe8] sm:$0xff] %v393_v29  ;;  %v395_v30 = vld [vmem:[%s1535_s26 + $0x1e0] sm:$0xff]  ;;  %v397_v31 = vld [vmem:[%s1535_s26 + $0x1f0] sm:$0xff] }
  0x21   : > { %v399_v32 = vld [vmem:[%s1535_s26 + $0x200] sm:$0xff]  ;;  %396 = vst [vmem:[%s1540_s27 + $0xf0] sm:$0xff] %v395_v30  ;;  %398 = vst [vmem:[%s1540_s27 + $0xf8] sm:$0xff] %v397_v31  ;;  %v401_v33 = vld [vmem:[%s1535_s26 + $0x210] sm:$0xff] }
  0x22   : > { %400 = vst [vmem:[%s1540_s27 + $0x100] sm:$0xff] %v399_v32  ;;  %v403_v34 = vld [vmem:[%s1535_s26 + $0x220] sm:$0xff]  ;;  %v405_v35 = vld [vmem:[%s1535_s26 + $0x230] sm:$0xff]  ;;  %402 = vst [vmem:[%s1540_s27 + $0x108] sm:$0xff] %v401_v33 }
  0x23   : > { %404 = vst [vmem:[%s1540_s27 + $0x110] sm:$0xff] %v403_v34  ;;  %406 = vst [vmem:[%s1540_s27 + $0x118] sm:$0xff] %v405_v35  ;;  %v407_v36 = vld [vmem:[%s1535_s26 + $0x240] sm:$0xff]  ;;  %v409_v37 = vld [vmem:[%s1535_s26 + $0x250] sm:$0xff] }
  0x24   : > { %v411_v38 = vld [vmem:[%s1535_s26 + $0x260] sm:$0xff]  ;;  %408 = vst [vmem:[%s1540_s27 + $0x120] sm:$0xff] %v407_v36  ;;  %410 = vst [vmem:[%s1540_s27 + $0x128] sm:$0xff] %v409_v37  ;;  %v413_v39 = vld [vmem:[%s1535_s26 + $0x270] sm:$0xff] }
  0x25   : > { %412 = vst [vmem:[%s1540_s27 + $0x130] sm:$0xff] %v411_v38  ;;  %v415_v40 = vld [vmem:[%s1535_s26 + $0x280] sm:$0xff]  ;;  %v417_v41 = vld [vmem:[%s1535_s26 + $0x290] sm:$0xff]  ;;  %414 = vst [vmem:[%s1540_s27 + $0x138] sm:$0xff] %v413_v39 }
  0x26   : > { %416 = vst [vmem:[%s1540_s27 + $0x140] sm:$0xff] %v415_v40  ;;  %418 = vst [vmem:[%s1540_s27 + $0x148] sm:$0xff] %v417_v41  ;;  %v419_v42 = vld [vmem:[%s1535_s26 + $0x2a0] sm:$0xff]  ;;  %v421_v43 = vld [vmem:[%s1535_s26 + $0x2b0] sm:$0xff] }
  0x27   : > { %v423_v44 = vld [vmem:[%s1535_s26 + $0x2c0] sm:$0xff]  ;;  %420 = vst [vmem:[%s1540_s27 + $0x150] sm:$0xff] %v419_v42  ;;  %422 = vst [vmem:[%s1540_s27 + $0x158] sm:$0xff] %v421_v43  ;;  %v425_v45 = vld [vmem:[%s1535_s26 + $0x2d0] sm:$0xff] }
  0x28   : > { %424 = vst [vmem:[%s1540_s27 + $0x160] sm:$0xff] %v423_v44  ;;  %v427_v46 = vld [vmem:[%s1535_s26 + $0x2e0] sm:$0xff]  ;;  %v429_v47 = vld [vmem:[%s1535_s26 + $0x2f0] sm:$0xff]  ;;  %426 = vst [vmem:[%s1540_s27 + $0x168] sm:$0xff] %v425_v45 }
  0x29   : > { %428 = vst [vmem:[%s1540_s27 + $0x170] sm:$0xff] %v427_v46  ;;  %430 = vst [vmem:[%s1540_s27 + $0x178] sm:$0xff] %v429_v47  ;;  %v431_v48 = vld [vmem:[%s1535_s26 + $0x300] sm:$0xff]  ;;  %v433_v49 = vld [vmem:[%s1535_s26 + $0x310] sm:$0xff] }
  0x2a   : > { %v435_v50 = vld [vmem:[%s1535_s26 + $0x320] sm:$0xff]  ;;  %432 = vst [vmem:[%s1540_s27 + $0x180] sm:$0xff] %v431_v48  ;;  %434 = vst [vmem:[%s1540_s27 + $0x188] sm:$0xff] %v433_v49  ;;  %v437_v51 = vld [vmem:[%s1535_s26 + $0x330] sm:$0xff] }
  0x2b   : > { %436 = vst [vmem:[%s1540_s27 + $0x190] sm:$0xff] %v435_v50  ;;  %v439_v52 = vld [vmem:[%s1535_s26 + $0x340] sm:$0xff]  ;;  %v441_v53 = vld [vmem:[%s1535_s26 + $0x350] sm:$0xff]  ;;  %438 = vst [vmem:[%s1540_s27 + $0x198] sm:$0xff] %v437_v51 }
  0x2c   : > { %440 = vst [vmem:[%s1540_s27 + $0x1a0] sm:$0xff] %v439_v52  ;;  %442 = vst [vmem:[%s1540_s27 + $0x1a8] sm:$0xff] %v441_v53  ;;  %v443_v54 = vld [vmem:[%s1535_s26 + $0x360] sm:$0xff]  ;;  %v445_v55 = vld [vmem:[%s1535_s26 + $0x370] sm:$0xff] }
  0x2d   : > { %v447_v56 = vld [vmem:[%s1535_s26 + $0x380] sm:$0xff]  ;;  %444 = vst [vmem:[%s1540_s27 + $0x1b0] sm:$0xff] %v443_v54  ;;  %446 = vst [vmem:[%s1540_s27 + $0x1b8] sm:$0xff] %v445_v55  ;;  %v449_v57 = vld [vmem:[%s1535_s26 + $0x390] sm:$0xff] }
  0x2e   : > { %448 = vst [vmem:[%s1540_s27 + $0x1c0] sm:$0xff] %v447_v56  ;;  %v451_v58 = vld [vmem:[%s1535_s26 + $0x3a0] sm:$0xff]  ;;  %v453_v59 = vld [vmem:[%s1535_s26 + $0x3b0] sm:$0xff]  ;;  %450 = vst [vmem:[%s1540_s27 + $0x1c8] sm:$0xff] %v449_v57 }
  0x2f   : > { %452 = vst [vmem:[%s1540_s27 + $0x1d0] sm:$0xff] %v451_v58  ;;  %454 = vst [vmem:[%s1540_s27 + $0x1d8] sm:$0xff] %v453_v59  ;;  %v455_v60 = vld [vmem:[%s1535_s26 + $0x3c0] sm:$0xff]  ;;  %v457_v61 = vld [vmem:[%s1535_s26 + $0x3d0] sm:$0xff] }
  0x30   : > { %v459_v62 = vld [vmem:[%s1535_s26 + $0x3e0] sm:$0xff]  ;;  %456 = vst [vmem:[%s1540_s27 + $0x1e0] sm:$0xff] %v455_v60  ;;  %458 = vst [vmem:[%s1540_s27 + $0x1e8] sm:$0xff] %v457_v61  ;;  %v461_v63 = vld [vmem:[%s1535_s26 + $0x3f0] sm:$0xff] }
  0x31   : > { %460 = vst [vmem:[%s1540_s27 + $0x1f0] sm:$0xff] %v459_v62  ;;  %462 = vst [vmem:[%s1540_s27 + $0x1f8] sm:$0xff] %v461_v63 }
  0x32 PF: > { %p1215_p6 = scmp.ge.s32.totalorder %s1467_s16, 1  ;;  %p475_p7 = scmp.lt.s32.totalorder %s1467_s16, 3 }
  0x34   : > { %p476_p8 = pnand %p1215_p6, %p475_p7 }
  0x35   : > { %s482_s28 = sand.u32 (!%p476_p8), 1, %s1451_s12   ;;  %v1673_v0 = vld.sshfl [vmem:[%s1776_s0] sm:$0x33 pattern:$0x75316420] (!%p476_p8)  ;;  %v630_v1 = vlaneseq (!%p476_p8)  ;;  %s1217_s6 = sshll.u32 (!%p476_p8), %s1459_s14, 1 }
  0x36   : > { %479 = sbr.rel (%p476_p8) target bundleno = 354 (0x162), region = 66  ;;  %s1216_s4 = sshll.u32 (!%p476_p8), %s482_s28, 9  ;;  %v1469_v2 = vmov (!%p476_p8), 1966171168   ;;  %v626_v7 = vcombine.high (!%p476_p8), %v1673_v0, %v1673_v0 }
  0x37   : > { %v628_v3 = vunpack.c.l.s4 (!%p476_p8), %v1469_v2  ;;  %v1675_v4 = vshrl.u32 (!%p476_p8), %v630_v1, 7  ;;  %s1677_s5 = scalar_lea.vmem (!%p476_p8), [#allocation3], %s1216_s4  ;;  %p533_p9 = scmp.lt.s32.totalorder (!%p476_p8), %s1217_s6, 3 }
  0x38   : > { %v1333_v5 = vld [vmem:[%s1677_s5 + $0x4] ss:$8 sps:$4 sm:$0xff] (!%p476_p8)   ;;  %v1337_v9 = vld [vmem:[%s1677_s5] ss:$8 sps:$4 sm:$0xff] (!%p476_p8)   ;;  %v1339_v11 = vld [vmem:[%s1677_s5 + $0x14] ss:$8 sps:$4 sm:$0xff] (!%p476_p8)  }
  0x39   : > { %v1335_v6 = vld [vmem:[%s1677_s5 + $0x104] ss:$8 sps:$4 sm:$0xff] (!%p476_p8)   ;;  %v629_v8 = vunpack.c.0.s8 (!%p476_p8), %v628_v3  ;;  %967 = vmatprep.subr.bf16.mxu1 (!%p476_p8), %v1333_v5  ;;  %v1338_v10 = vld [vmem:[%s1677_s5 + $0x100] ss:$8 sps:$4 sm:$0xff] (!%p476_p8)   ;;  %v1341_v13 = vld [vmem:[%s1677_s5 + $0x114] ss:$8 sps:$4 sm:$0xff] (!%p476_p8)  }
  0x3a   : > { %1008 = vmatprep.subr.bf16.mxu0 (!%p476_p8), %v1335_v6  ;;  %968 = vmatpush1.bf16.msra.mxu1 (!%p476_p8), %v1337_v9  ;;  %v1343_v14 = vld [vmem:[%s1677_s5 + $0x10] ss:$8 sps:$4 sm:$0xff] (!%p476_p8)   ;;  %v1345_v17 = vld [vmem:[%s1677_s5 + $0x24] ss:$8 sps:$4 sm:$0xff] (!%p476_p8)   ;;  %v1349_v19 = vld [vmem:[%s1677_s5 + $0x20] ss:$8 sps:$4 sm:$0xff] (!%p476_p8)  }
  0x3b   : > { %v1687_v12 = vsub.s32 (!%p476_p8), %v629_v8, %v1675_v4  ;;  %1009 = vmatpush1.bf16.msra.mxu0 (!%p476_p8), %v1338_v10  ;;  %969 = vmatprep.subr.bf16.mxu1 (!%p476_p8), %v1339_v11  ;;  %v1344_v15 = vld [vmem:[%s1677_s5 + $0x110] ss:$8 sps:$4 sm:$0xff] (!%p476_p8)   ;;  %v1347_v18 = vld [vmem:[%s1677_s5 + $0x124] ss:$8 sps:$4 sm:$0xff] (!%p476_p8)   ;;  %v1350_v20 = vld [vmem:[%s1677_s5 + $0x120] ss:$8 sps:$4 sm:$0xff] (!%p476_p8)  }
  0x3c   : > { %1010 = vmatprep.subr.bf16.mxu0 (!%p476_p8), %v1341_v13  ;;  %v1351_v22 = vld [vmem:[%s1677_s5 + $0x34] ss:$8 sps:$4 sm:$0xff] (!%p476_p8)   ;;  %v1355_v24 = vld [vmem:[%s1677_s5 + $0x30] ss:$8 sps:$4 sm:$0xff] (!%p476_p8)   ;;  %v1357_v26 = vld [vmem:[%s1677_s5 + $0x44] ss:$8 sps:$4 sm:$0xff] (!%p476_p8)  }
  0x3d   : > { %v640_v16 = vrot.slane %v626_v7, %v1687_v12  ;;  %v1353_v23 = vld [vmem:[%s1677_s5 + $0x134] ss:$8 sps:$4 sm:$0xff]   ;;  %v1356_v25 = vld [vmem:[%s1677_s5 + $0x130] ss:$8 sps:$4 sm:$0xff]   ;;  %v1359_v27 = vld [vmem:[%s1677_s5 + $0x144] ss:$8 sps:$4 sm:$0xff]   ;;  %v633_v10 = vrot.slane %v1673_v0, %v1687_v12 }
  0x3e   : > { %970 = vmatpush1.bf16.msra.mxu1 %v1343_v14  ;;  %v1361_v28 = vld [vmem:[%s1677_s5 + $0x40] ss:$8 sps:$4 sm:$0xff]   ;;  %v1363_v30 = vld [vmem:[%s1677_s5 + $0x54] ss:$8 sps:$4 sm:$0xff]   ;;  %v1367_v32 = vld [vmem:[%s1677_s5 + $0x50] ss:$8 sps:$4 sm:$0xff]  }
  0x3f   : > { %999 = vmatprep.mubr.bf16.mxu1 %v640_v16  ;;  %v642_v21 = vcombine.high %v640_v16, %v640_v16  ;;  %1011 = vmatpush1.bf16.msra.mxu0 %v1344_v15  ;;  %v1362_v29 = vld [vmem:[%s1677_s5 + $0x140] ss:$8 sps:$4 sm:$0xff]   ;;  %v1365_v31 = vld [vmem:[%s1677_s5 + $0x154] ss:$8 sps:$4 sm:$0xff]   ;;  %v1368_v33 = vld [vmem:[%s1677_s5 + $0x150] ss:$8 sps:$4 sm:$0xff]   ;;  %v641_v14 = vcombine.high %v633_v10, %v633_v10 }
  0x40   : > { %971 = vmatprep.subr.bf16.mxu1 %v1345_v17  ;;  %1012 = vmatprep.subr.bf16.mxu0 %v1347_v18  ;;  %v1369_v34 = vld [vmem:[%s1677_s5 + $0x64] ss:$8 sps:$4 sm:$0xff]   ;;  %v1373_v36 = vld [vmem:[%s1677_s5 + $0x60] ss:$8 sps:$4 sm:$0xff]   ;;  %v1375_v38 = vld [vmem:[%s1677_s5 + $0x74] ss:$8 sps:$4 sm:$0xff]  }
  0x41   : > { %1040 = vmatprep.mubr.bf16.mxu0 %v642_v21  ;;  %v1371_v35 = vld [vmem:[%s1677_s5 + $0x164] ss:$8 sps:$4 sm:$0xff]   ;;  %v1374_v37 = vld [vmem:[%s1677_s5 + $0x160] ss:$8 sps:$4 sm:$0xff]   ;;  %v1377_v39 = vld [vmem:[%s1677_s5 + $0x174] ss:$8 sps:$4 sm:$0xff]  }
  0x42   : > { %972 = vmatpush1.bf16.msra.mxu1 %v1349_v19  ;;  %v1379_v40 = vld [vmem:[%s1677_s5 + $0x70] ss:$8 sps:$4 sm:$0xff]   ;;  %v1381_v42 = vld [vmem:[%s1677_s5 + $0x84] ss:$8 sps:$4 sm:$0xff]   ;;  %v1385_v44 = vld [vmem:[%s1677_s5 + $0x80] ss:$8 sps:$4 sm:$0xff]  }
  0x43   : > { %1013 = vmatpush1.bf16.msra.mxu0 %v1350_v20  ;;  %973 = vmatprep.subr.bf16.mxu1 %v1351_v22  ;;  %v1380_v41 = vld [vmem:[%s1677_s5 + $0x170] ss:$8 sps:$4 sm:$0xff]   ;;  %v1383_v43 = vld [vmem:[%s1677_s5 + $0x184] ss:$8 sps:$4 sm:$0xff]   ;;  %v1386_v45 = vld [vmem:[%s1677_s5 + $0x180] ss:$8 sps:$4 sm:$0xff]  }
  0x44   : > { %1014 = vmatprep.subr.bf16.mxu0 %v1353_v23  ;;  %v1387_v46 = vld [vmem:[%s1677_s5 + $0x94] ss:$8 sps:$4 sm:$0xff]   ;;  %v1391_v48 = vld [vmem:[%s1677_s5 + $0x90] ss:$8 sps:$4 sm:$0xff]   ;;  %v1393_v50 = vld [vmem:[%s1677_s5 + $0xa4] ss:$8 sps:$4 sm:$0xff]  }
  0x45   : > { %v1389_v47 = vld [vmem:[%s1677_s5 + $0x194] ss:$8 sps:$4 sm:$0xff]   ;;  %v1392_v49 = vld [vmem:[%s1677_s5 + $0x190] ss:$8 sps:$4 sm:$0xff]   ;;  %v1395_v51 = vld [vmem:[%s1677_s5 + $0x1a4] ss:$8 sps:$4 sm:$0xff]  }
  0x46   : > { %974 = vmatpush1.bf16.msra.mxu1 %v1355_v24  ;;  %v1397_v52 = vld [vmem:[%s1677_s5 + $0xa0] ss:$8 sps:$4 sm:$0xff]   ;;  %v1399_v54 = vld [vmem:[%s1677_s5 + $0xb4] ss:$8 sps:$4 sm:$0xff]   ;;  %v1403_v56 = vld [vmem:[%s1677_s5 + $0xb0] ss:$8 sps:$4 sm:$0xff]  }
  0x47   : > { %1015 = vmatpush1.bf16.msra.mxu0 %v1356_v25  ;;  %975 = vmatprep.subr.bf16.mxu1 %v1357_v26  ;;  %v1398_v53 = vld [vmem:[%s1677_s5 + $0x1a0] ss:$8 sps:$4 sm:$0xff]   ;;  %v1401_v55 = vld [vmem:[%s1677_s5 + $0x1b4] ss:$8 sps:$4 sm:$0xff]   ;;  %v1404_v57 = vld [vmem:[%s1677_s5 + $0x1b0] ss:$8 sps:$4 sm:$0xff]  }
  0x48   : > { %1016 = vmatprep.subr.bf16.mxu0 %v1359_v27  ;;  %v1405_v58 = vld [vmem:[%s1677_s5 + $0xc4] ss:$8 sps:$4 sm:$0xff]   ;;  %v1409_v60 = vld [vmem:[%s1677_s5 + $0xc0] ss:$8 sps:$4 sm:$0xff]   ;;  %v1411_v62 = vld [vmem:[%s1677_s5 + $0xd4] ss:$8 sps:$4 sm:$0xff]  }
  0x49   : > { %v1407_v59 = vld [vmem:[%s1677_s5 + $0x1c4] ss:$8 sps:$4 sm:$0xff]   ;;  %v1410_v61 = vld [vmem:[%s1677_s5 + $0x1c0] ss:$8 sps:$4 sm:$0xff]   ;;  %v1413_v63 = vld [vmem:[%s1677_s5 + $0x1d4] ss:$8 sps:$4 sm:$0xff]  }
  0x4a   : > { %976 = vmatpush1.bf16.msra.mxu1 %v1361_v28  ;;  %v1415_v1 = vld [vmem:[%s1677_s5 + $0xd0] ss:$8 sps:$4 sm:$0xff]   ;;  %v1417_v3 = vld [vmem:[%s1677_s5 + $0xe4] ss:$8 sps:$4 sm:$0xff]   ;;  %v1421_v6 = vld [vmem:[%s1677_s5 + $0xe0] ss:$8 sps:$4 sm:$0xff]  }
  0x4b   : > { %1017 = vmatpush1.bf16.msra.mxu0 %v1362_v29  ;;  %977 = vmatprep.subr.bf16.mxu1 %v1363_v30  ;;  %v1416_v2 = vld [vmem:[%s1677_s5 + $0x1d0] ss:$8 sps:$4 sm:$0xff]   ;;  %v1419_v5 = vld [vmem:[%s1677_s5 + $0x1e4] ss:$8 sps:$4 sm:$0xff]   ;;  %v1422_v7 = vld [vmem:[%s1677_s5 + $0x1e0] ss:$8 sps:$4 sm:$0xff]  }
  0x4c   : > { %1018 = vmatprep.subr.bf16.mxu0 %v1365_v31  ;;  %v1423_v8 = vld [vmem:[%s1677_s5 + $0xf4] ss:$8 sps:$4 sm:$0xff]   ;;  %v1427_v11 = vld [vmem:[%s1677_s5 + $0xf0] ss:$8 sps:$4 sm:$0xff]   ;;  %v1470_v15 = vmov 0.0   ;;  %s1787_s6 = smov (!%p533_p9, %s1217_s6), 3 }
  0x4d   : > { %v1425_v9 = vld [vmem:[%s1677_s5 + $0x1f4] ss:$8 sps:$4 sm:$0xff]   ;;  %v1428_v13 = vld [vmem:[%s1677_s5 + $0x1f0] ss:$8 sps:$4 sm:$0xff]   ;;  %551 = vst [vmem:[#allocation2] sm:$0xf] %v1470_v15  ;;  %s535_s9 = scalar_lea.vmem %s1778_s2, %s1787_s6 }
  0x4e   : > { %978 = vmatpush1.bf16.msra.mxu1 %v1367_v32  ;;  %v1471_v16 = vmov 1983009808   ;;  %v1070_v24 = vsub.s32 0, %v1675_v4  ;;  %v1074_v25 = vsub.s32 1, %v1675_v4  ;;  %v1066_v28 = vld [vmem:[%s535_s9] sm:$0x3] }
  0x4f   : > { %1019 = vmatpush1.bf16.msra.mxu0 %v1368_v33  ;;  %979 = vmatprep.subr.bf16.mxu1 %v1369_v34  ;;  %v1053_v17 = vunpack.c.l.s4 %v1471_v16  ;;  %s1219_s10 = sshll.u32 %s1787_s6, 1 }
  0x50   : > { %1020 = vmatprep.subr.bf16.mxu0 %v1371_v35  ;;  %v1071_v34 = vrot.slane %v1066_v28, %v1070_v24  ;;  %v1075_v35 = vrot.slane %v1066_v28, %v1074_v25  ;;  %s545_s14 = scalar_lea.vmem %s1779_s3, %s1219_s10 }
  0x51   : > { %v1054_v18 = vunpack.c.0.s8 %v1053_v17 }
  0x52   : > { %980 = vmatpush1.bf16.msra.mxu1 %v1373_v36 }
  0x53   : > { %1021 = vmatpush1.bf16.msra.mxu0 %v1374_v37  ;;  %981 = vmatprep.subr.bf16.mxu1 %v1375_v38  ;;  %v1057_v23 = vsub.s32 %v1054_v18, %v1675_v4  ;;  %v1076_v37 = vcombine.low %v1071_v34, %v1075_v35 }
  0x54   : > { %1022 = vmatprep.subr.bf16.mxu0 %v1377_v39  ;;  %v552_v32 = vld [vmem:[#allocation2] sm:$0xf] }
  0x55   : > { %v1083_v38 = vrot.slane %v1076_v37, %v1057_v23 }
  0x56   : > { %982 = vmatpush1.bf16.msra.mxu1 %v1379_v40 }
  0x57   : > { %1023 = vmatpush1.bf16.msra.mxu0 %v1380_v41  ;;  %983 = vmatprep.subr.bf16.mxu1 %v1381_v42 }
  0x58   : > { %1024 = vmatprep.subr.bf16.mxu0 %v1383_v43 }
  0x5a   : > { %984 = vmatpush1.bf16.msra.mxu1 %v1385_v44 }
  0x5b   : > { %1025 = vmatpush1.bf16.msra.mxu0 %v1386_v45  ;;  %985 = vmatprep.subr.bf16.mxu1 %v1387_v46 }
  0x5c   : > { %1026 = vmatprep.subr.bf16.mxu0 %v1389_v47 }
  0x5e   : > { %986 = vmatpush1.bf16.msra.mxu1 %v1391_v48 }
  0x5f   : > { %1027 = vmatpush1.bf16.msra.mxu0 %v1392_v49  ;;  %987 = vmatprep.subr.bf16.mxu1 %v1393_v50 }
  0x60   : > { %1028 = vmatprep.subr.bf16.mxu0 %v1395_v51 }
  0x62   : > { %988 = vmatpush1.bf16.msra.mxu1 %v1397_v52 }
  0x63   : > { %1029 = vmatpush1.bf16.msra.mxu0 %v1398_v53  ;;  %989 = vmatprep.subr.bf16.mxu1 %v1399_v54 }
  0x64   : > { %1030 = vmatprep.subr.bf16.mxu0 %v1401_v55 }
  0x66   : > { %990 = vmatpush1.bf16.msra.mxu1 %v1403_v56 }
  0x67   : > { %1031 = vmatpush1.bf16.msra.mxu0 %v1404_v57  ;;  %991 = vmatprep.subr.bf16.mxu1 %v1405_v58 }
  0x68   : > { %1032 = vmatprep.subr.bf16.mxu0 %v1407_v59 }
  0x6a   : > { %992 = vmatpush1.bf16.msra.mxu1 %v1409_v60 }
  0x6b   : > { %1033 = vmatpush1.bf16.msra.mxu0 %v1410_v61  ;;  %993 = vmatprep.subr.bf16.mxu1 %v1411_v62 }
  0x6c   : > { %1034 = vmatprep.subr.bf16.mxu0 %v1413_v63 }
  0x6e   : > { %994 = vmatpush1.bf16.msra.mxu1 %v1415_v1 }
  0x6f   : > { %1035 = vmatpush1.bf16.msra.mxu0 %v1416_v2  ;;  %995 = vmatprep.subr.bf16.mxu1 %v1417_v3 }
  0x70   : > { %1036 = vmatprep.subr.bf16.mxu0 %v1419_v5 }
  0x72   : > { %996 = vmatpush1.bf16.msra.mxu1 %v1421_v6 }
  0x73   : > { %1037 = vmatpush1.bf16.msra.mxu0 %v1422_v7  ;;  %997 = vmatprep.subr.bf16.mxu1 %v1423_v8 }
  0x74   : > { %1038 = vmatprep.subr.bf16.mxu0 %v1425_v9 }
  0x76   : > { %998 = vmatpush1.bf16.msra.mxu1 %v1427_v11 }
  0x77   : > { %1039 = vmatpush1.bf16.msra.mxu0 %v1428_v13 }
  0x79   : > { %1000 = vmatmul.mubr.bf16.vlgmr.msra.gmra.mrb[0].mxu1 %v633_v10 }
  0x7a   : > { %1041 = vmatmul.mubr.bf16.vlgmr.msra.gmra.mrb[0].mxu0 %v641_v14 }
 0x14c   : > { %v1001_v0 = vpop.f32.mrb[0].mxu1 }
 0x14d   : > { %v1042_v12 = vpop.f32.mrb[0].mxu0  ;;  %v1003_v20 = vpop.f32.mrb[1].mxu1 }
 0x14e   : > { %v1043_v19 = vadd.f32 %v1042_v12, %v1001_v0  ;;  %v1044_v21 = vpop.f32.mrb[1].mxu0  ;;  %v1005_v26 = vpop.f32.mrb[2].mxu1 }
 0x14f   : > { %v1045_v22 = vadd.f32 %v1044_v21, %v1003_v20  ;;  %v1046_v27 = vpop.f32.mrb[2].mxu0  ;;  %v1006_v29 = vpop.f32.mrb[3].mxu1 }
 0x150   : > { %v1047_v30 = vpop.f32.mrb[3].mxu0 }
 0x151   : > { %v1051_v31 = vcombine.low %v1043_v19, %v1045_v22 }
 0x153   : > { %v1058_v33 = vrot.slane %v1051_v31, %v1057_v23 }
 0x155   : > { %v1060_v36 = vadd.f32 %v1058_v33, %v552_v32 }
 0x157   : > { %1061 = vst [vmem:[#allocation2] sm:$0xf] %v1060_v36 }
 0x15e   : > { %v1065_v4 = vld [vmem:[#allocation2] sm:$0xf] }
 0x15f   : > { %v1085_v39 = vadd.f32 %v1083_v38, %v1065_v4 }
 0x161   : > { %1086 = vst [vmem:[%s545_s14] sm:$0xf] %v1085_v39 }
 0x162 PF: > { %s13_s16 = sadd.s32 1, %s1467_s16   ;;  %s1780_s12 = smov %s1455_s13 }
 0x163   : > { %p10_p10 = scmp.ge.s32.totalorder %s13_s16, 4   ;;  %s1781_s13 = smov %s1527_s20 }
 0x164   : > { %s1782_s14 = smov %s1463_s15  ;;  %s1783_s15 = smov %s1785_s17 }
 0x165   :  { %12 = sbr.rel (!%p10_p10) target bundleno = 3 (0x3), region = 119 }

// kernel: forward.15
= control target key start
LH: loop header
LB: loop body
LE: loop exit
PB: predicated region body
PF: predicated region fallthrough
CT: control target
= control target key end

     0   :  { %s2176_s12 = smov 0   ;;  %s2178_s13 = smov 0   ;;  %s2697_s0 = inlined_call_operand.vmem [shape: bf16[2,4608], index: 0, kind: input, shape index: {}]   ;;  %s2698_s1 = inlined_call_operand.vmem [shape: bf16[4608,1024], index: 1, kind: input, shape index: {}]   ;;  %s2699_s2 = inlined_call_operand.vmem [shape: f32[1,1024], index: 2, kind: input, shape index: {}]   ;;  %s2700_s3 = inlined_call_operand.vmem [shape: f32[2,1024], index: 3, kind: output, shape index: {}]  }
   0x1   :  { %s2180_s14 = smov 0   ;;  %s2182_s15 = smov 0  }
   0x2   :  { %s2184_s16 = smov 0   ;;  %s2186_s17 = smov 0  }
   0x3   :  { %s2188_s18 = smov 0  }
   0x4 LB: > { %s25_s19 = sadd.s32 1, %s2143_s16  ;;  %s28_s20 = sadd.s32 1, %s2147_s17  ;;  %s2151_s18 = sphi %s2188_s18, %s13_s18   ;;  %s2147_s17 = sphi %s2186_s17, %s2706_s17   ;;  %s2143_s16 = sphi %s2184_s16, %s2705_s16   ;;  %s2139_s15 = sphi %s2182_s15, %s2704_s15   ;;  %s2135_s14 = sphi %s2180_s14, %s2703_s14   ;;  %s2131_s13 = sphi %s2178_s13, %s2702_s13   ;;  %s2127_s12 = sphi %s2176_s12, %s2701_s12  }
   0x5   : > { %p26_p0 = scmp.ge.s32.totalorder %s25_s19, 9  ;;  %p76_p1 = scmp.ne.s32.totalorder %s2131_s13, %s2127_s12 }
   0x6   : > { %p77_p2 = scmp.eq.s32.totalorder %s2151_s18, 0  ;;  %s69_s24 = sadd.s32 1, %s2131_s13 }
   0x7   : > { %s2708_s19 = smov (%p26_p0, %s25_s19), 0  ;;  %s2710_s20 = smov (!%p26_p0, %s28_s20), %s2147_s17 }
   0x8   : > { %p78_p3 = por %p77_p2, %p76_p1  ;;  %p30_p4 = scmp.ge.s32.totalorder %s2710_s20, 2 }
   0x9   : > { %s64_s21 = ssub.s32 %s2143_s16, %s2708_s19  ;;  %p1692_p6 = scmp.ge.s32.totalorder %s2151_s18, 18 }
   0xa   : > { %s2712_s20 = smov (%p30_p4, %s2710_s20), 0 }
   0xb   : > { %s65_s22 = ssub.s32 %s2147_s17, %s2712_s20  ;;  %156 = sbr.rel (%p1692_p6) target bundleno = 89 (0x59), region = 16 }
   0xc   : > { %s66_s23 = sor.u32 %s65_s22, %s64_s21 }
   0xd   : > { %p67_p5 = scmp.eq.s32.totalorder %s66_s23, 0 }
   0xf   : > { %s2227_s25 = scalar_select %p67_p5, %s2131_s13, %s69_s24  }
  0x12   : > { %171 = sbr.rel (!%p78_p3) target bundleno = 89 (0x59), region = 24  ;;  %s173_s26 = sand.u32 (%p78_p3), 1, %s2131_s13  }
  0x13   : > { %s1695_s27 = sshll.u32 (%p78_p3), %s2147_s17, 2  ;;  %s1693_s28 = sshll.u32 (%p78_p3), %s173_s26, 10 }
  0x14   : > { %s1837_s29 = sshll.u32 (%p78_p3), %s2143_s16, 9  ;;  %s2241_s8 = scalar_lea.vmem (%p78_p3), [#allocation3], %s1693_s28 }
  0x15   : > { %s179_s30 = sadd.s32 (%p78_p3), %s1837_s29, %s1695_s27 }
  0x16   : > { %s1697_s4 = sshll.u32 (%p78_p3), %s179_s30, 2 }
  0x17   : > { %s2236_s7 = scalar_lea.vmem (%p78_p3), %s2698_s1, %s1697_s4 }
  0x18   : > { %v194_v0 = vld [vmem:[%s2236_s7] sm:$0xff] (%p78_p3)  ;;  %v196_v1 = vld [vmem:[%s2236_s7 + $0x8] sm:$0xff] (%p78_p3) }
  0x19   : > { %v198_v2 = vld [vmem:[%s2236_s7 + $0x20] sm:$0xff]  ;;  %195 = vst [vmem:[%s2241_s8] sm:$0xff] %v194_v0  ;;  %197 = vst [vmem:[%s2241_s8 + $0x8] sm:$0xff] %v196_v1  ;;  %v200_v3 = vld [vmem:[%s2236_s7 + $0x28] sm:$0xff] }
  0x1a   : > { %199 = vst [vmem:[%s2241_s8 + $0x10] sm:$0xff] %v198_v2  ;;  %v202_v4 = vld [vmem:[%s2236_s7 + $0x40] sm:$0xff]  ;;  %v204_v5 = vld [vmem:[%s2236_s7 + $0x48] sm:$0xff]  ;;  %201 = vst [vmem:[%s2241_s8 + $0x18] sm:$0xff] %v200_v3 }
  0x1b   : > { %203 = vst [vmem:[%s2241_s8 + $0x20] sm:$0xff] %v202_v4  ;;  %205 = vst [vmem:[%s2241_s8 + $0x28] sm:$0xff] %v204_v5  ;;  %v206_v6 = vld [vmem:[%s2236_s7 + $0x60] sm:$0xff]  ;;  %v208_v7 = vld [vmem:[%s2236_s7 + $0x68] sm:$0xff] }
  0x1c   : > { %v210_v8 = vld [vmem:[%s2236_s7 + $0x80] sm:$0xff]  ;;  %207 = vst [vmem:[%s2241_s8 + $0x30] sm:$0xff] %v206_v6  ;;  %209 = vst [vmem:[%s2241_s8 + $0x38] sm:$0xff] %v208_v7  ;;  %v212_v9 = vld [vmem:[%s2236_s7 + $0x88] sm:$0xff] }
  0x1d   : > { %211 = vst [vmem:[%s2241_s8 + $0x40] sm:$0xff] %v210_v8  ;;  %v214_v10 = vld [vmem:[%s2236_s7 + $0xa0] sm:$0xff]  ;;  %v216_v11 = vld [vmem:[%s2236_s7 + $0xa8] sm:$0xff]  ;;  %213 = vst [vmem:[%s2241_s8 + $0x48] sm:$0xff] %v212_v9 }
  0x1e   : > { %215 = vst [vmem:[%s2241_s8 + $0x50] sm:$0xff] %v214_v10  ;;  %217 = vst [vmem:[%s2241_s8 + $0x58] sm:$0xff] %v216_v11  ;;  %v218_v12 = vld [vmem:[%s2236_s7 + $0xc0] sm:$0xff]  ;;  %v220_v13 = vld [vmem:[%s2236_s7 + $0xc8] sm:$0xff] }
  0x1f   : > { %v222_v14 = vld [vmem:[%s2236_s7 + $0xe0] sm:$0xff]  ;;  %219 = vst [vmem:[%s2241_s8 + $0x60] sm:$0xff] %v218_v12  ;;  %221 = vst [vmem:[%s2241_s8 + $0x68] sm:$0xff] %v220_v13  ;;  %v224_v15 = vld [vmem:[%s2236_s7 + $0xe8] sm:$0xff] }
  0x20   : > { %223 = vst [vmem:[%s2241_s8 + $0x70] sm:$0xff] %v222_v14  ;;  %v226_v16 = vld [vmem:[%s2236_s7 + $0x100] sm:$0xff]  ;;  %v228_v17 = vld [vmem:[%s2236_s7 + $0x108] sm:$0xff]  ;;  %225 = vst [vmem:[%s2241_s8 + $0x78] sm:$0xff] %v224_v15 }
  0x21   : > { %227 = vst [vmem:[%s2241_s8 + $0x80] sm:$0xff] %v226_v16  ;;  %229 = vst [vmem:[%s2241_s8 + $0x88] sm:$0xff] %v228_v17  ;;  %v230_v18 = vld [vmem:[%s2236_s7 + $0x120] sm:$0xff]  ;;  %v232_v19 = vld [vmem:[%s2236_s7 + $0x128] sm:$0xff] }
  0x22   : > { %v234_v20 = vld [vmem:[%s2236_s7 + $0x140] sm:$0xff]  ;;  %231 = vst [vmem:[%s2241_s8 + $0x90] sm:$0xff] %v230_v18  ;;  %233 = vst [vmem:[%s2241_s8 + $0x98] sm:$0xff] %v232_v19  ;;  %v236_v21 = vld [vmem:[%s2236_s7 + $0x148] sm:$0xff] }
  0x23   : > { %235 = vst [vmem:[%s2241_s8 + $0xa0] sm:$0xff] %v234_v20  ;;  %v238_v22 = vld [vmem:[%s2236_s7 + $0x160] sm:$0xff]  ;;  %v240_v23 = vld [vmem:[%s2236_s7 + $0x168] sm:$0xff]  ;;  %237 = vst [vmem:[%s2241_s8 + $0xa8] sm:$0xff] %v236_v21 }
  0x24   : > { %239 = vst [vmem:[%s2241_s8 + $0xb0] sm:$0xff] %v238_v22  ;;  %241 = vst [vmem:[%s2241_s8 + $0xb8] sm:$0xff] %v240_v23  ;;  %v242_v24 = vld [vmem:[%s2236_s7 + $0x180] sm:$0xff]  ;;  %v244_v25 = vld [vmem:[%s2236_s7 + $0x188] sm:$0xff] }
  0x25   : > { %v246_v26 = vld [vmem:[%s2236_s7 + $0x1a0] sm:$0xff]  ;;  %243 = vst [vmem:[%s2241_s8 + $0xc0] sm:$0xff] %v242_v24  ;;  %245 = vst [vmem:[%s2241_s8 + $0xc8] sm:$0xff] %v244_v25  ;;  %v248_v27 = vld [vmem:[%s2236_s7 + $0x1a8] sm:$0xff] }
  0x26   : > { %247 = vst [vmem:[%s2241_s8 + $0xd0] sm:$0xff] %v246_v26  ;;  %v250_v28 = vld [vmem:[%s2236_s7 + $0x1c0] sm:$0xff]  ;;  %v252_v29 = vld [vmem:[%s2236_s7 + $0x1c8] sm:$0xff]  ;;  %249 = vst [vmem:[%s2241_s8 + $0xd8] sm:$0xff] %v248_v27 }
  0x27   : > { %251 = vst [vmem:[%s2241_s8 + $0xe0] sm:$0xff] %v250_v28  ;;  %253 = vst [vmem:[%s2241_s8 + $0xe8] sm:$0xff] %v252_v29  ;;  %v254_v30 = vld [vmem:[%s2236_s7 + $0x1e0] sm:$0xff]  ;;  %v256_v31 = vld [vmem:[%s2236_s7 + $0x1e8] sm:$0xff] }
  0x28   : > { %v258_v32 = vld [vmem:[%s2236_s7 + $0x200] sm:$0xff]  ;;  %255 = vst [vmem:[%s2241_s8 + $0xf0] sm:$0xff] %v254_v30  ;;  %257 = vst [vmem:[%s2241_s8 + $0xf8] sm:$0xff] %v256_v31  ;;  %v260_v33 = vld [vmem:[%s2236_s7 + $0x208] sm:$0xff] }
  0x29   : > { %259 = vst [vmem:[%s2241_s8 + $0x100] sm:$0xff] %v258_v32  ;;  %v262_v34 = vld [vmem:[%s2236_s7 + $0x220] sm:$0xff]  ;;  %v264_v35 = vld [vmem:[%s2236_s7 + $0x228] sm:$0xff]  ;;  %261 = vst [vmem:[%s2241_s8 + $0x108] sm:$0xff] %v260_v33 }
  0x2a   : > { %263 = vst [vmem:[%s2241_s8 + $0x110] sm:$0xff] %v262_v34  ;;  %265 = vst [vmem:[%s2241_s8 + $0x118] sm:$0xff] %v264_v35  ;;  %v266_v36 = vld [vmem:[%s2236_s7 + $0x240] sm:$0xff]  ;;  %v268_v37 = vld [vmem:[%s2236_s7 + $0x248] sm:$0xff] }
  0x2b   : > { %v270_v38 = vld [vmem:[%s2236_s7 + $0x260] sm:$0xff]  ;;  %267 = vst [vmem:[%s2241_s8 + $0x120] sm:$0xff] %v266_v36  ;;  %269 = vst [vmem:[%s2241_s8 + $0x128] sm:$0xff] %v268_v37  ;;  %v272_v39 = vld [vmem:[%s2236_s7 + $0x268] sm:$0xff] }
  0x2c   : > { %271 = vst [vmem:[%s2241_s8 + $0x130] sm:$0xff] %v270_v38  ;;  %v274_v40 = vld [vmem:[%s2236_s7 + $0x280] sm:$0xff]  ;;  %v276_v41 = vld [vmem:[%s2236_s7 + $0x288] sm:$0xff]  ;;  %273 = vst [vmem:[%s2241_s8 + $0x138] sm:$0xff] %v272_v39 }
  0x2d   : > { %275 = vst [vmem:[%s2241_s8 + $0x140] sm:$0xff] %v274_v40  ;;  %277 = vst [vmem:[%s2241_s8 + $0x148] sm:$0xff] %v276_v41  ;;  %v278_v42 = vld [vmem:[%s2236_s7 + $0x2a0] sm:$0xff]  ;;  %v280_v43 = vld [vmem:[%s2236_s7 + $0x2a8] sm:$0xff] }
  0x2e   : > { %v282_v44 = vld [vmem:[%s2236_s7 + $0x2c0] sm:$0xff]  ;;  %279 = vst [vmem:[%s2241_s8 + $0x150] sm:$0xff] %v278_v42  ;;  %281 = vst [vmem:[%s2241_s8 + $0x158] sm:$0xff] %v280_v43  ;;  %v284_v45 = vld [vmem:[%s2236_s7 + $0x2c8] sm:$0xff] }
  0x2f   : > { %283 = vst [vmem:[%s2241_s8 + $0x160] sm:$0xff] %v282_v44  ;;  %v286_v46 = vld [vmem:[%s2236_s7 + $0x2e0] sm:$0xff]  ;;  %v288_v47 = vld [vmem:[%s2236_s7 + $0x2e8] sm:$0xff]  ;;  %285 = vst [vmem:[%s2241_s8 + $0x168] sm:$0xff] %v284_v45 }
  0x30   : > { %287 = vst [vmem:[%s2241_s8 + $0x170] sm:$0xff] %v286_v46  ;;  %289 = vst [vmem:[%s2241_s8 + $0x178] sm:$0xff] %v288_v47  ;;  %v290_v48 = vld [vmem:[%s2236_s7 + $0x300] sm:$0xff]  ;;  %v292_v49 = vld [vmem:[%s2236_s7 + $0x308] sm:$0xff] }
  0x31   : > { %v294_v50 = vld [vmem:[%s2236_s7 + $0x320] sm:$0xff]  ;;  %291 = vst [vmem:[%s2241_s8 + $0x180] sm:$0xff] %v290_v48  ;;  %293 = vst [vmem:[%s2241_s8 + $0x188] sm:$0xff] %v292_v49  ;;  %v296_v51 = vld [vmem:[%s2236_s7 + $0x328] sm:$0xff] }
  0x32   : > { %295 = vst [vmem:[%s2241_s8 + $0x190] sm:$0xff] %v294_v50  ;;  %v298_v52 = vld [vmem:[%s2236_s7 + $0x340] sm:$0xff]  ;;  %v300_v53 = vld [vmem:[%s2236_s7 + $0x348] sm:$0xff]  ;;  %297 = vst [vmem:[%s2241_s8 + $0x198] sm:$0xff] %v296_v51 }
  0x33   : > { %299 = vst [vmem:[%s2241_s8 + $0x1a0] sm:$0xff] %v298_v52  ;;  %301 = vst [vmem:[%s2241_s8 + $0x1a8] sm:$0xff] %v300_v53  ;;  %v302_v54 = vld [vmem:[%s2236_s7 + $0x360] sm:$0xff]  ;;  %v304_v55 = vld [vmem:[%s2236_s7 + $0x368] sm:$0xff] }
  0x34   : > { %v306_v56 = vld [vmem:[%s2236_s7 + $0x380] sm:$0xff]  ;;  %303 = vst [vmem:[%s2241_s8 + $0x1b0] sm:$0xff] %v302_v54  ;;  %305 = vst [vmem:[%s2241_s8 + $0x1b8] sm:$0xff] %v304_v55  ;;  %v308_v57 = vld [vmem:[%s2236_s7 + $0x388] sm:$0xff] }
  0x35   : > { %307 = vst [vmem:[%s2241_s8 + $0x1c0] sm:$0xff] %v306_v56  ;;  %v310_v58 = vld [vmem:[%s2236_s7 + $0x3a0] sm:$0xff]  ;;  %v312_v59 = vld [vmem:[%s2236_s7 + $0x3a8] sm:$0xff]  ;;  %309 = vst [vmem:[%s2241_s8 + $0x1c8] sm:$0xff] %v308_v57 }
  0x36   : > { %311 = vst [vmem:[%s2241_s8 + $0x1d0] sm:$0xff] %v310_v58  ;;  %313 = vst [vmem:[%s2241_s8 + $0x1d8] sm:$0xff] %v312_v59  ;;  %v314_v60 = vld [vmem:[%s2236_s7 + $0x3c0] sm:$0xff]  ;;  %v316_v61 = vld [vmem:[%s2236_s7 + $0x3c8] sm:$0xff] }
  0x37   : > { %v318_v62 = vld [vmem:[%s2236_s7 + $0x3e0] sm:$0xff]  ;;  %315 = vst [vmem:[%s2241_s8 + $0x1e0] sm:$0xff] %v314_v60  ;;  %317 = vst [vmem:[%s2241_s8 + $0x1e8] sm:$0xff] %v316_v61  ;;  %v320_v63 = vld [vmem:[%s2236_s7 + $0x3e8] sm:$0xff] }
  0x38   : > { %319 = vst [vmem:[%s2241_s8 + $0x1f0] sm:$0xff] %v318_v62  ;;  %v322_v0 = vld [vmem:[%s2236_s7 + $0x400] sm:$0xff]  ;;  %v324_v1 = vld [vmem:[%s2236_s7 + $0x408] sm:$0xff]  ;;  %321 = vst [vmem:[%s2241_s8 + $0x1f8] sm:$0xff] %v320_v63 }
  0x39   : > { %323 = vst [vmem:[%s2241_s8 + $0x200] sm:$0xff] %v322_v0  ;;  %325 = vst [vmem:[%s2241_s8 + $0x208] sm:$0xff] %v324_v1  ;;  %v326_v2 = vld [vmem:[%s2236_s7 + $0x420] sm:$0xff]  ;;  %v328_v3 = vld [vmem:[%s2236_s7 + $0x428] sm:$0xff] }
  0x3a   : > { %v330_v4 = vld [vmem:[%s2236_s7 + $0x440] sm:$0xff]  ;;  %327 = vst [vmem:[%s2241_s8 + $0x210] sm:$0xff] %v326_v2  ;;  %329 = vst [vmem:[%s2241_s8 + $0x218] sm:$0xff] %v328_v3  ;;  %v332_v5 = vld [vmem:[%s2236_s7 + $0x448] sm:$0xff] }
  0x3b   : > { %331 = vst [vmem:[%s2241_s8 + $0x220] sm:$0xff] %v330_v4  ;;  %v334_v6 = vld [vmem:[%s2236_s7 + $0x460] sm:$0xff]  ;;  %v336_v7 = vld [vmem:[%s2236_s7 + $0x468] sm:$0xff]  ;;  %333 = vst [vmem:[%s2241_s8 + $0x228] sm:$0xff] %v332_v5 }
  0x3c   : > { %335 = vst [vmem:[%s2241_s8 + $0x230] sm:$0xff] %v334_v6  ;;  %337 = vst [vmem:[%s2241_s8 + $0x238] sm:$0xff] %v336_v7  ;;  %v338_v8 = vld [vmem:[%s2236_s7 + $0x480] sm:$0xff]  ;;  %v340_v9 = vld [vmem:[%s2236_s7 + $0x488] sm:$0xff] }
  0x3d   : > { %v342_v10 = vld [vmem:[%s2236_s7 + $0x4a0] sm:$0xff]  ;;  %339 = vst [vmem:[%s2241_s8 + $0x240] sm:$0xff] %v338_v8  ;;  %341 = vst [vmem:[%s2241_s8 + $0x248] sm:$0xff] %v340_v9  ;;  %v344_v11 = vld [vmem:[%s2236_s7 + $0x4a8] sm:$0xff] }
  0x3e   : > { %343 = vst [vmem:[%s2241_s8 + $0x250] sm:$0xff] %v342_v10  ;;  %v346_v12 = vld [vmem:[%s2236_s7 + $0x4c0] sm:$0xff]  ;;  %v348_v13 = vld [vmem:[%s2236_s7 + $0x4c8] sm:$0xff]  ;;  %345 = vst [vmem:[%s2241_s8 + $0x258] sm:$0xff] %v344_v11 }
  0x3f   : > { %347 = vst [vmem:[%s2241_s8 + $0x260] sm:$0xff] %v346_v12  ;;  %349 = vst [vmem:[%s2241_s8 + $0x268] sm:$0xff] %v348_v13  ;;  %v350_v14 = vld [vmem:[%s2236_s7 + $0x4e0] sm:$0xff]  ;;  %v352_v15 = vld [vmem:[%s2236_s7 + $0x4e8] sm:$0xff] }
  0x40   : > { %v354_v16 = vld [vmem:[%s2236_s7 + $0x500] sm:$0xff]  ;;  %351 = vst [vmem:[%s2241_s8 + $0x270] sm:$0xff] %v350_v14  ;;  %353 = vst [vmem:[%s2241_s8 + $0x278] sm:$0xff] %v352_v15  ;;  %v356_v17 = vld [vmem:[%s2236_s7 + $0x508] sm:$0xff] }
  0x41   : > { %355 = vst [vmem:[%s2241_s8 + $0x280] sm:$0xff] %v354_v16  ;;  %v358_v18 = vld [vmem:[%s2236_s7 + $0x520] sm:$0xff]  ;;  %v360_v19 = vld [vmem:[%s2236_s7 + $0x528] sm:$0xff]  ;;  %357 = vst [vmem:[%s2241_s8 + $0x288] sm:$0xff] %v356_v17 }
  0x42   : > { %359 = vst [vmem:[%s2241_s8 + $0x290] sm:$0xff] %v358_v18  ;;  %361 = vst [vmem:[%s2241_s8 + $0x298] sm:$0xff] %v360_v19  ;;  %v362_v20 = vld [vmem:[%s2236_s7 + $0x540] sm:$0xff]  ;;  %v364_v21 = vld [vmem:[%s2236_s7 + $0x548] sm:$0xff] }
  0x43   : > { %v366_v22 = vld [vmem:[%s2236_s7 + $0x560] sm:$0xff]  ;;  %363 = vst [vmem:[%s2241_s8 + $0x2a0] sm:$0xff] %v362_v20  ;;  %365 = vst [vmem:[%s2241_s8 + $0x2a8] sm:$0xff] %v364_v21  ;;  %v368_v23 = vld [vmem:[%s2236_s7 + $0x568] sm:$0xff] }
  0x44   : > { %367 = vst [vmem:[%s2241_s8 + $0x2b0] sm:$0xff] %v366_v22  ;;  %v370_v24 = vld [vmem:[%s2236_s7 + $0x580] sm:$0xff]  ;;  %v372_v25 = vld [vmem:[%s2236_s7 + $0x588] sm:$0xff]  ;;  %369 = vst [vmem:[%s2241_s8 + $0x2b8] sm:$0xff] %v368_v23 }
  0x45   : > { %371 = vst [vmem:[%s2241_s8 + $0x2c0] sm:$0xff] %v370_v24  ;;  %373 = vst [vmem:[%s2241_s8 + $0x2c8] sm:$0xff] %v372_v25  ;;  %v374_v26 = vld [vmem:[%s2236_s7 + $0x5a0] sm:$0xff]  ;;  %v376_v27 = vld [vmem:[%s2236_s7 + $0x5a8] sm:$0xff] }
  0x46   : > { %v378_v28 = vld [vmem:[%s2236_s7 + $0x5c0] sm:$0xff]  ;;  %375 = vst [vmem:[%s2241_s8 + $0x2d0] sm:$0xff] %v374_v26  ;;  %377 = vst [vmem:[%s2241_s8 + $0x2d8] sm:$0xff] %v376_v27  ;;  %v380_v29 = vld [vmem:[%s2236_s7 + $0x5c8] sm:$0xff] }
  0x47   : > { %379 = vst [vmem:[%s2241_s8 + $0x2e0] sm:$0xff] %v378_v28  ;;  %v382_v30 = vld [vmem:[%s2236_s7 + $0x5e0] sm:$0xff]  ;;  %v384_v31 = vld [vmem:[%s2236_s7 + $0x5e8] sm:$0xff]  ;;  %381 = vst [vmem:[%s2241_s8 + $0x2e8] sm:$0xff] %v380_v29 }
  0x48   : > { %383 = vst [vmem:[%s2241_s8 + $0x2f0] sm:$0xff] %v382_v30  ;;  %385 = vst [vmem:[%s2241_s8 + $0x2f8] sm:$0xff] %v384_v31  ;;  %v386_v32 = vld [vmem:[%s2236_s7 + $0x600] sm:$0xff]  ;;  %v388_v33 = vld [vmem:[%s2236_s7 + $0x608] sm:$0xff] }
  0x49   : > { %v390_v34 = vld [vmem:[%s2236_s7 + $0x620] sm:$0xff]  ;;  %387 = vst [vmem:[%s2241_s8 + $0x300] sm:$0xff] %v386_v32  ;;  %389 = vst [vmem:[%s2241_s8 + $0x308] sm:$0xff] %v388_v33  ;;  %v392_v35 = vld [vmem:[%s2236_s7 + $0x628] sm:$0xff] }
  0x4a   : > { %391 = vst [vmem:[%s2241_s8 + $0x310] sm:$0xff] %v390_v34  ;;  %v394_v36 = vld [vmem:[%s2236_s7 + $0x640] sm:$0xff]  ;;  %v396_v37 = vld [vmem:[%s2236_s7 + $0x648] sm:$0xff]  ;;  %393 = vst [vmem:[%s2241_s8 + $0x318] sm:$0xff] %v392_v35 }
  0x4b   : > { %395 = vst [vmem:[%s2241_s8 + $0x320] sm:$0xff] %v394_v36  ;;  %397 = vst [vmem:[%s2241_s8 + $0x328] sm:$0xff] %v396_v37  ;;  %v398_v38 = vld [vmem:[%s2236_s7 + $0x660] sm:$0xff]  ;;  %v400_v39 = vld [vmem:[%s2236_s7 + $0x668] sm:$0xff] }
  0x4c   : > { %v402_v40 = vld [vmem:[%s2236_s7 + $0x680] sm:$0xff]  ;;  %399 = vst [vmem:[%s2241_s8 + $0x330] sm:$0xff] %v398_v38  ;;  %401 = vst [vmem:[%s2241_s8 + $0x338] sm:$0xff] %v400_v39  ;;  %v404_v41 = vld [vmem:[%s2236_s7 + $0x688] sm:$0xff] }
  0x4d   : > { %403 = vst [vmem:[%s2241_s8 + $0x340] sm:$0xff] %v402_v40  ;;  %v406_v42 = vld [vmem:[%s2236_s7 + $0x6a0] sm:$0xff]  ;;  %v408_v43 = vld [vmem:[%s2236_s7 + $0x6a8] sm:$0xff]  ;;  %405 = vst [vmem:[%s2241_s8 + $0x348] sm:$0xff] %v404_v41 }
  0x4e   : > { %407 = vst [vmem:[%s2241_s8 + $0x350] sm:$0xff] %v406_v42  ;;  %409 = vst [vmem:[%s2241_s8 + $0x358] sm:$0xff] %v408_v43  ;;  %v410_v44 = vld [vmem:[%s2236_s7 + $0x6c0] sm:$0xff]  ;;  %v412_v45 = vld [vmem:[%s2236_s7 + $0x6c8] sm:$0xff] }
  0x4f   : > { %v414_v46 = vld [vmem:[%s2236_s7 + $0x6e0] sm:$0xff]  ;;  %411 = vst [vmem:[%s2241_s8 + $0x360] sm:$0xff] %v410_v44  ;;  %413 = vst [vmem:[%s2241_s8 + $0x368] sm:$0xff] %v412_v45  ;;  %v416_v47 = vld [vmem:[%s2236_s7 + $0x6e8] sm:$0xff] }
  0x50   : > { %415 = vst [vmem:[%s2241_s8 + $0x370] sm:$0xff] %v414_v46  ;;  %v418_v48 = vld [vmem:[%s2236_s7 + $0x700] sm:$0xff]  ;;  %v420_v49 = vld [vmem:[%s2236_s7 + $0x708] sm:$0xff]  ;;  %417 = vst [vmem:[%s2241_s8 + $0x378] sm:$0xff] %v416_v47 }
  0x51   : > { %419 = vst [vmem:[%s2241_s8 + $0x380] sm:$0xff] %v418_v48  ;;  %421 = vst [vmem:[%s2241_s8 + $0x388] sm:$0xff] %v420_v49  ;;  %v422_v50 = vld [vmem:[%s2236_s7 + $0x720] sm:$0xff]  ;;  %v424_v51 = vld [vmem:[%s2236_s7 + $0x728] sm:$0xff] }
  0x52   : > { %v426_v52 = vld [vmem:[%s2236_s7 + $0x740] sm:$0xff]  ;;  %423 = vst [vmem:[%s2241_s8 + $0x390] sm:$0xff] %v422_v50  ;;  %425 = vst [vmem:[%s2241_s8 + $0x398] sm:$0xff] %v424_v51  ;;  %v428_v53 = vld [vmem:[%s2236_s7 + $0x748] sm:$0xff] }
  0x53   : > { %427 = vst [vmem:[%s2241_s8 + $0x3a0] sm:$0xff] %v426_v52  ;;  %v430_v54 = vld [vmem:[%s2236_s7 + $0x760] sm:$0xff]  ;;  %v432_v55 = vld [vmem:[%s2236_s7 + $0x768] sm:$0xff]  ;;  %429 = vst [vmem:[%s2241_s8 + $0x3a8] sm:$0xff] %v428_v53 }
  0x54   : > { %431 = vst [vmem:[%s2241_s8 + $0x3b0] sm:$0xff] %v430_v54  ;;  %433 = vst [vmem:[%s2241_s8 + $0x3b8] sm:$0xff] %v432_v55  ;;  %v434_v56 = vld [vmem:[%s2236_s7 + $0x780] sm:$0xff]  ;;  %v436_v57 = vld [vmem:[%s2236_s7 + $0x788] sm:$0xff] }
  0x55   : > { %v438_v58 = vld [vmem:[%s2236_s7 + $0x7a0] sm:$0xff]  ;;  %435 = vst [vmem:[%s2241_s8 + $0x3c0] sm:$0xff] %v434_v56  ;;  %437 = vst [vmem:[%s2241_s8 + $0x3c8] sm:$0xff] %v436_v57  ;;  %v440_v59 = vld [vmem:[%s2236_s7 + $0x7a8] sm:$0xff] }
  0x56   : > { %439 = vst [vmem:[%s2241_s8 + $0x3d0] sm:$0xff] %v438_v58  ;;  %v442_v60 = vld [vmem:[%s2236_s7 + $0x7c0] sm:$0xff]  ;;  %v444_v61 = vld [vmem:[%s2236_s7 + $0x7c8] sm:$0xff]  ;;  %441 = vst [vmem:[%s2241_s8 + $0x3d8] sm:$0xff] %v440_v59 }
  0x57   : > { %443 = vst [vmem:[%s2241_s8 + $0x3e0] sm:$0xff] %v442_v60  ;;  %445 = vst [vmem:[%s2241_s8 + $0x3e8] sm:$0xff] %v444_v61  ;;  %v446_v62 = vld [vmem:[%s2236_s7 + $0x7e0] sm:$0xff]  ;;  %v448_v63 = vld [vmem:[%s2236_s7 + $0x7e8] sm:$0xff] }
  0x58   : > { %447 = vst [vmem:[%s2241_s8 + $0x3f0] sm:$0xff] %v446_v62  ;;  %449 = vst [vmem:[%s2241_s8 + $0x3f8] sm:$0xff] %v448_v63 }
  0x59 PF: > { %p1698_p7 = scmp.ge.s32.totalorder %s2151_s18, 1  ;;  %p462_p8 = scmp.lt.s32.totalorder %s2151_s18, 19 }
  0x5b   : > { %p463_p9 = pnand %p1698_p7, %p462_p8 }
  0x5c   : > { %s469_s9 = sand.u32 (!%p463_p9), 1, %s2127_s12   ;;  %s1700_s10 = sshll.u32 (!%p463_p9), %s2135_s14, 2 }
  0x5d   : > { %466 = sbr.rel (%p463_p9) target bundleno = 470 (0x1d6), region = 51  ;;  %s1699_s11 = sshll.u32 (!%p463_p9), %s469_s9, 10 }
  0x5e   : > { %p511_p10 = scmp.lt.s32.totalorder (!%p463_p9), %s1700_s10, 35  ;;  %s1701_s21 = sshll.u32 (!%p463_p9), %s2139_s15, 2 }
  0x5f   : > { %p520_p11 = scmp.lt.s32.totalorder (!%p463_p9), %s1701_s21, 7  ;;  %s2519_s4 = scalar_lea.vmem (!%p463_p9), [#allocation3], %s1699_s11 }
  0x60   : > { %p1704_p12 = scmp.ne.s32.totalorder (!%p463_p9), %s2135_s14, 0 }
  0x64   : > { %s2714_s10 = smov (!%p511_p10, %s1700_s10), 35  ;;  %s2716_s21 = smov (!%p520_p11, %s1701_s21), 7 }
  0x65   : > { %s515_s24 = scalar_lea.vmem %s2697_s0, %s2714_s10  ;;  %s522_s12 = scalar_lea.vmem %s2699_s2, %s2716_s21  ;;  %v2153_v0 = vmov (!%p1704_p12), 0.0  }
  0x66   : > { %s1703_s28 = sshll.u32 %s2716_s21, 1  ;;  %537 = sbr.rel (%p1704_p12) target bundleno = 109 (0x6d), region = 59  ;;  %538 = vst [vmem:[#allocation2] sm:$0xff] (!%p1704_p12), %v2153_v0 }
  0x67   : > { %s2517_s15 = scalar_lea.vmem %s2700_s3, %s1703_s28 }
  0x6d PF: > { %v1905_v1 = vld [vmem:[%s2519_s4 + $0x4] ss:$16 sps:$4 sm:$0xff]   ;;  %v1907_v2 = vld [vmem:[%s2519_s4 + $0xc] ss:$16 sps:$4 sm:$0xff]   ;;  %v1909_v3 = vld [vmem:[%s2519_s4] ss:$16 sps:$4 sm:$0xff]   ;;  %v681_v41 = vlaneseq }
  0x6e   : > { %1338 = vmatprep.subr.bf16.mxu0 %v1905_v1  ;;  %v1910_v4 = vld [vmem:[%s2519_s4 + $0x8] ss:$16 sps:$4 sm:$0xff]   ;;  %1420 = vmatprep.subr.bf16.mxu1 %v1907_v2  ;;  %v1911_v5 = vld [vmem:[%s2519_s4 + $0x24] ss:$16 sps:$4 sm:$0xff]   ;;  %v1913_v6 = vld [vmem:[%s2519_s4 + $0x2c] ss:$16 sps:$4 sm:$0xff]  }
  0x6f   : > { %1339 = vmatpush1.bf16.msra.mxu0 %v1909_v3  ;;  %1421 = vmatpush1.bf16.msra.mxu1 %v1910_v4  ;;  %v1915_v7 = vld [vmem:[%s2519_s4 + $0x20] ss:$16 sps:$4 sm:$0xff]   ;;  %v1916_v8 = vld [vmem:[%s2519_s4 + $0x28] ss:$16 sps:$4 sm:$0xff]   ;;  %v1917_v9 = vld [vmem:[%s2519_s4 + $0x44] ss:$16 sps:$4 sm:$0xff]  }
  0x70   : > { %1340 = vmatprep.subr.bf16.mxu0 %v1911_v5  ;;  %1422 = vmatprep.subr.bf16.mxu1 %v1913_v6  ;;  %v1919_v10 = vld [vmem:[%s2519_s4 + $0x4c] ss:$16 sps:$4 sm:$0xff]   ;;  %v1921_v11 = vld [vmem:[%s2519_s4 + $0x40] ss:$16 sps:$4 sm:$0xff]   ;;  %v1922_v12 = vld [vmem:[%s2519_s4 + $0x48] ss:$16 sps:$4 sm:$0xff]  }
  0x71   : > { %v1923_v13 = vld [vmem:[%s2519_s4 + $0x64] ss:$16 sps:$4 sm:$0xff]   ;;  %v1925_v14 = vld [vmem:[%s2519_s4 + $0x6c] ss:$16 sps:$4 sm:$0xff]   ;;  %v1927_v15 = vld [vmem:[%s2519_s4 + $0x60] ss:$16 sps:$4 sm:$0xff]  }
  0x72   : > { %v1928_v16 = vld [vmem:[%s2519_s4 + $0x68] ss:$16 sps:$4 sm:$0xff]   ;;  %v1929_v17 = vld [vmem:[%s2519_s4 + $0x84] ss:$16 sps:$4 sm:$0xff]   ;;  %v1931_v18 = vld [vmem:[%s2519_s4 + $0x8c] ss:$16 sps:$4 sm:$0xff]  }
  0x73   : > { %1341 = vmatpush1.bf16.msra.mxu0 %v1915_v7  ;;  %1423 = vmatpush1.bf16.msra.mxu1 %v1916_v8  ;;  %v1933_v19 = vld [vmem:[%s2519_s4 + $0x80] ss:$16 sps:$4 sm:$0xff]   ;;  %v1934_v20 = vld [vmem:[%s2519_s4 + $0x88] ss:$16 sps:$4 sm:$0xff]   ;;  %v1935_v21 = vld [vmem:[%s2519_s4 + $0xa4] ss:$16 sps:$4 sm:$0xff]  }
  0x74   : > { %1342 = vmatprep.subr.bf16.mxu0 %v1917_v9  ;;  %1424 = vmatprep.subr.bf16.mxu1 %v1919_v10  ;;  %v1937_v22 = vld [vmem:[%s2519_s4 + $0xac] ss:$16 sps:$4 sm:$0xff]   ;;  %v1939_v23 = vld [vmem:[%s2519_s4 + $0xa0] ss:$16 sps:$4 sm:$0xff]   ;;  %v1940_v24 = vld [vmem:[%s2519_s4 + $0xa8] ss:$16 sps:$4 sm:$0xff]  }
  0x75   : > { %v1941_v25 = vld [vmem:[%s2519_s4 + $0xc4] ss:$16 sps:$4 sm:$0xff]   ;;  %v1943_v26 = vld [vmem:[%s2519_s4 + $0xcc] ss:$16 sps:$4 sm:$0xff]   ;;  %v1945_v27 = vld [vmem:[%s2519_s4 + $0xc0] ss:$16 sps:$4 sm:$0xff]  }
  0x76   : > { %v1946_v28 = vld [vmem:[%s2519_s4 + $0xc8] ss:$16 sps:$4 sm:$0xff]   ;;  %v1947_v29 = vld [vmem:[%s2519_s4 + $0xe4] ss:$16 sps:$4 sm:$0xff]   ;;  %v1949_v30 = vld [vmem:[%s2519_s4 + $0xec] ss:$16 sps:$4 sm:$0xff]  }
  0x77   : > { %1343 = vmatpush1.bf16.msra.mxu0 %v1921_v11  ;;  %1425 = vmatpush1.bf16.msra.mxu1 %v1922_v12  ;;  %v1951_v31 = vld [vmem:[%s2519_s4 + $0xe0] ss:$16 sps:$4 sm:$0xff]   ;;  %v1952_v32 = vld [vmem:[%s2519_s4 + $0xe8] ss:$16 sps:$4 sm:$0xff]   ;;  %v1953_v33 = vld [vmem:[%s2519_s4 + $0x104] ss:$16 sps:$4 sm:$0xff]  }
  0x78   : > { %1344 = vmatprep.subr.bf16.mxu0 %v1923_v13  ;;  %1426 = vmatprep.subr.bf16.mxu1 %v1925_v14  ;;  %v1955_v34 = vld [vmem:[%s2519_s4 + $0x10c] ss:$16 sps:$4 sm:$0xff]   ;;  %v1957_v35 = vld [vmem:[%s2519_s4 + $0x100] ss:$16 sps:$4 sm:$0xff]   ;;  %v1958_v36 = vld [vmem:[%s2519_s4 + $0x108] ss:$16 sps:$4 sm:$0xff]  }
  0x79   : > { %v1959_v37 = vld [vmem:[%s2519_s4 + $0x124] ss:$16 sps:$4 sm:$0xff]   ;;  %v1961_v38 = vld [vmem:[%s2519_s4 + $0x12c] ss:$16 sps:$4 sm:$0xff]   ;;  %v2154_v39 = vmov 1966171168  }
  0x7a   : > { %v679_v40 = vunpack.c.l.s4 %v2154_v39  ;;  %v1963_v42 = vld [vmem:[%s2519_s4 + $0x120] ss:$16 sps:$4 sm:$0xff]   ;;  %v1964_v43 = vld [vmem:[%s2519_s4 + $0x128] ss:$16 sps:$4 sm:$0xff]   ;;  %v1965_v44 = vld [vmem:[%s2519_s4 + $0x144] ss:$16 sps:$4 sm:$0xff]  }
  0x7b   : > { %1345 = vmatpush1.bf16.msra.mxu0 %v1927_v15  ;;  %1427 = vmatpush1.bf16.msra.mxu1 %v1928_v16  ;;  %v1967_v45 = vld [vmem:[%s2519_s4 + $0x14c] ss:$16 sps:$4 sm:$0xff]   ;;  %v2564_v47 = vshrl.u32 %v681_v41, 7  ;;  %v1969_v48 = vld [vmem:[%s2519_s4 + $0x140] ss:$16 sps:$4 sm:$0xff]   ;;  %p1834_p13 = scmp.ne.s32.totalorder %s2135_s14, 8 }
  0x7c   : > { %1346 = vmatprep.subr.bf16.mxu0 %v1929_v17  ;;  %1428 = vmatprep.subr.bf16.mxu1 %v1931_v18  ;;  %v680_v46 = vunpack.c.0.s8 %v679_v40  ;;  %v1970_v49 = vld [vmem:[%s2519_s4 + $0x148] ss:$16 sps:$4 sm:$0xff]   ;;  %v1971_v50 = vld [vmem:[%s2519_s4 + $0x164] ss:$16 sps:$4 sm:$0xff]   ;;  %v1973_v51 = vld [vmem:[%s2519_s4 + $0x16c] ss:$16 sps:$4 sm:$0xff]  }
  0x7d   : > { %v1705_v53 = vld.sshfl [vmem:[%s515_s24] sm:$0x33 pattern:$0x75316420]  ;;  %v1975_v54 = vld [vmem:[%s2519_s4 + $0x160] ss:$16 sps:$4 sm:$0xff]  }
  0x7e   : > { %v683_v52 = vsub.s32 %v680_v46, %v2564_v47  ;;  %v1976_v55 = vld [vmem:[%s2519_s4 + $0x168] ss:$16 sps:$4 sm:$0xff]   ;;  %v677_v56 = vcombine.high %v1705_v53, %v1705_v53  ;;  %v1977_v57 = vld [vmem:[%s2519_s4 + $0x184] ss:$16 sps:$4 sm:$0xff]   ;;  %v1979_v58 = vld [vmem:[%s2519_s4 + $0x18c] ss:$16 sps:$4 sm:$0xff]  }
  0x7f   : > { %1347 = vmatpush1.bf16.msra.mxu0 %v1933_v19  ;;  %1429 = vmatpush1.bf16.msra.mxu1 %v1934_v20  ;;  %v1981_v60 = vld [vmem:[%s2519_s4 + $0x180] ss:$16 sps:$4 sm:$0xff]   ;;  %v1982_v61 = vld [vmem:[%s2519_s4 + $0x188] ss:$16 sps:$4 sm:$0xff]   ;;  %v1983_v62 = vld [vmem:[%s2519_s4 + $0x1a4] ss:$16 sps:$4 sm:$0xff]  }
  0x80   : > { %1348 = vmatprep.subr.bf16.mxu0 %v1935_v21  ;;  %1430 = vmatprep.subr.bf16.mxu1 %v1937_v22  ;;  %v691_v59 = vrot.slane %v677_v56, %v683_v52  ;;  %v1985_v63 = vld [vmem:[%s2519_s4 + $0x1ac] ss:$16 sps:$4 sm:$0xff]   ;;  %v1987_v0 = vld [vmem:[%s2519_s4 + $0x1a0] ss:$16 sps:$4 sm:$0xff]   ;;  %v1988_v1 = vld [vmem:[%s2519_s4 + $0x1a8] ss:$16 sps:$4 sm:$0xff]   ;;  %v2597_v13 = vrot.slane %v1705_v53, %v683_v52 }
  0x81   : > { %v1989_v2 = vld [vmem:[%s2519_s4 + $0x1c4] ss:$16 sps:$4 sm:$0xff]   ;;  %v1991_v3 = vld [vmem:[%s2519_s4 + $0x1cc] ss:$16 sps:$4 sm:$0xff]   ;;  %v1993_v4 = vld [vmem:[%s2519_s4 + $0x1c0] ss:$16 sps:$4 sm:$0xff]  }
  0x82   : > { %1370 = vmatprep.mubr.bf16.mxu0 %v691_v59  ;;  %1452 = vmatprep.mubr.bf16.mxu1 %v691_v59  ;;  %v1994_v5 = vld [vmem:[%s2519_s4 + $0x1c8] ss:$16 sps:$4 sm:$0xff]   ;;  %v1995_v6 = vld [vmem:[%s2519_s4 + $0x1e4] ss:$16 sps:$4 sm:$0xff]   ;;  %v1997_v7 = vld [vmem:[%s2519_s4 + $0x1ec] ss:$16 sps:$4 sm:$0xff]   ;;  %v693_v17 = vcombine.high %v691_v59, %v691_v59 }
  0x83   : > { %1349 = vmatpush1.bf16.msra.mxu0 %v1939_v23  ;;  %1431 = vmatpush1.bf16.msra.mxu1 %v1940_v24  ;;  %v1999_v8 = vld [vmem:[%s2519_s4 + $0x1e0] ss:$16 sps:$4 sm:$0xff]   ;;  %v2000_v9 = vld [vmem:[%s2519_s4 + $0x1e8] ss:$16 sps:$4 sm:$0xff]   ;;  %v2003_v10 = vld [vmem:[%s2519_s4 + $0x204] ss:$16 sps:$4 sm:$0xff]  }
  0x84   : > { %1350 = vmatprep.subr.bf16.mxu0 %v1941_v25  ;;  %1432 = vmatprep.subr.bf16.mxu1 %v1943_v26  ;;  %v2006_v11 = vld [vmem:[%s2519_s4 + $0x20c] ss:$16 sps:$4 sm:$0xff]   ;;  %v2001_v12 = vld [vmem:[%s2519_s4 + $0x200] ss:$16 sps:$4 sm:$0xff]   ;;  %v2004_v14 = vld [vmem:[%s2519_s4 + $0x208] ss:$16 sps:$4 sm:$0xff]  }
  0x85   : > { %v2009_v15 = vld [vmem:[%s2519_s4 + $0x224] ss:$16 sps:$4 sm:$0xff]   ;;  %v2012_v16 = vld [vmem:[%s2519_s4 + $0x22c] ss:$16 sps:$4 sm:$0xff]   ;;  %v2007_v18 = vld [vmem:[%s2519_s4 + $0x220] ss:$16 sps:$4 sm:$0xff]  }
  0x86   : > { %v2010_v19 = vld [vmem:[%s2519_s4 + $0x228] ss:$16 sps:$4 sm:$0xff]   ;;  %v2015_v20 = vld [vmem:[%s2519_s4 + $0x244] ss:$16 sps:$4 sm:$0xff]   ;;  %v2018_v21 = vld [vmem:[%s2519_s4 + $0x24c] ss:$16 sps:$4 sm:$0xff]  }
  0x87   : > { %1351 = vmatpush1.bf16.msra.mxu0 %v1945_v27  ;;  %1433 = vmatpush1.bf16.msra.mxu1 %v1946_v28  ;;  %v2013_v22 = vld [vmem:[%s2519_s4 + $0x240] ss:$16 sps:$4 sm:$0xff]   ;;  %v2016_v23 = vld [vmem:[%s2519_s4 + $0x248] ss:$16 sps:$4 sm:$0xff]   ;;  %v2021_v24 = vld [vmem:[%s2519_s4 + $0x264] ss:$16 sps:$4 sm:$0xff]  }
  0x88   : > { %1352 = vmatprep.subr.bf16.mxu0 %v1947_v29  ;;  %1434 = vmatprep.subr.bf16.mxu1 %v1949_v30  ;;  %v2024_v25 = vld [vmem:[%s2519_s4 + $0x26c] ss:$16 sps:$4 sm:$0xff]   ;;  %v2019_v26 = vld [vmem:[%s2519_s4 + $0x260] ss:$16 sps:$4 sm:$0xff]   ;;  %v2022_v27 = vld [vmem:[%s2519_s4 + $0x268] ss:$16 sps:$4 sm:$0xff]  }
  0x89   : > { %v2027_v28 = vld [vmem:[%s2519_s4 + $0x284] ss:$16 sps:$4 sm:$0xff]   ;;  %v2030_v29 = vld [vmem:[%s2519_s4 + $0x28c] ss:$16 sps:$4 sm:$0xff]   ;;  %v2025_v30 = vld [vmem:[%s2519_s4 + $0x280] ss:$16 sps:$4 sm:$0xff]  }
  0x8a   : > { %v2040_v39 = vld [vmem:[%s2519_s4 + $0x2c8] ss:$16 sps:$4 sm:$0xff]   ;;  %v2045_v40 = vld [vmem:[%s2519_s4 + $0x2e4] ss:$16 sps:$4 sm:$0xff]   ;;  %v2048_v41 = vld [vmem:[%s2519_s4 + $0x2ec] ss:$16 sps:$4 sm:$0xff]  }
  0x8b   : > { %1353 = vmatpush1.bf16.msra.mxu0 %v1951_v31  ;;  %1435 = vmatpush1.bf16.msra.mxu1 %v1952_v32  ;;  %v2028_v31 = vld [vmem:[%s2519_s4 + $0x288] ss:$16 sps:$4 sm:$0xff]   ;;  %v2033_v32 = vld [vmem:[%s2519_s4 + $0x2a4] ss:$16 sps:$4 sm:$0xff]   ;;  %v2049_v46 = vld [vmem:[%s2519_s4 + $0x300] ss:$16 sps:$4 sm:$0xff]  }
  0x8c   : > { %1354 = vmatprep.subr.bf16.mxu0 %v1953_v33  ;;  %1436 = vmatprep.subr.bf16.mxu1 %v1955_v34  ;;  %v2036_v33 = vld [vmem:[%s2519_s4 + $0x2ac] ss:$16 sps:$4 sm:$0xff]   ;;  %v2031_v34 = vld [vmem:[%s2519_s4 + $0x2a0] ss:$16 sps:$4 sm:$0xff]   ;;  %v2058_v52 = vld [vmem:[%s2519_s4 + $0x328] ss:$16 sps:$4 sm:$0xff]  }
  0x8d   : > { %v2063_v53 = vld [vmem:[%s2519_s4 + $0x344] ss:$16 sps:$4 sm:$0xff]   ;;  %v2064_v56 = vld [vmem:[%s2519_s4 + $0x348] ss:$16 sps:$4 sm:$0xff]   ;;  %v2067_v59 = vld [vmem:[%s2519_s4 + $0x360] ss:$16 sps:$4 sm:$0xff]  }
  0x8f   : > { %1355 = vmatpush1.bf16.msra.mxu0 %v1957_v35  ;;  %1437 = vmatpush1.bf16.msra.mxu1 %v1958_v36  ;;  %v2034_v35 = vld [vmem:[%s2519_s4 + $0x2a8] ss:$16 sps:$4 sm:$0xff]   ;;  %v2039_v36 = vld [vmem:[%s2519_s4 + $0x2c4] ss:$16 sps:$4 sm:$0xff]  }
  0x90   : > { %1356 = vmatprep.subr.bf16.mxu0 %v1959_v37  ;;  %1438 = vmatprep.subr.bf16.mxu1 %v1961_v38  ;;  %v2042_v37 = vld [vmem:[%s2519_s4 + $0x2cc] ss:$16 sps:$4 sm:$0xff]   ;;  %v2037_v38 = vld [vmem:[%s2519_s4 + $0x2c0] ss:$16 sps:$4 sm:$0xff]  }
  0x93   : > { %1357 = vmatpush1.bf16.msra.mxu0 %v1963_v42  ;;  %1439 = vmatpush1.bf16.msra.mxu1 %v1964_v43  ;;  %v2043_v42 = vld [vmem:[%s2519_s4 + $0x2e0] ss:$16 sps:$4 sm:$0xff]   ;;  %v2046_v43 = vld [vmem:[%s2519_s4 + $0x2e8] ss:$16 sps:$4 sm:$0xff]  }
  0x94   : > { %1358 = vmatprep.subr.bf16.mxu0 %v1965_v44  ;;  %1440 = vmatprep.subr.bf16.mxu1 %v1967_v45  ;;  %v2051_v44 = vld [vmem:[%s2519_s4 + $0x304] ss:$16 sps:$4 sm:$0xff]   ;;  %v2054_v45 = vld [vmem:[%s2519_s4 + $0x30c] ss:$16 sps:$4 sm:$0xff]  }
  0x97   : > { %1359 = vmatpush1.bf16.msra.mxu0 %v1969_v48  ;;  %1441 = vmatpush1.bf16.msra.mxu1 %v1970_v49  ;;  %v2052_v48 = vld [vmem:[%s2519_s4 + $0x308] ss:$16 sps:$4 sm:$0xff]   ;;  %v2057_v49 = vld [vmem:[%s2519_s4 + $0x324] ss:$16 sps:$4 sm:$0xff]  }
  0x98   : > { %1360 = vmatprep.subr.bf16.mxu0 %v1971_v50  ;;  %1442 = vmatprep.subr.bf16.mxu1 %v1973_v51  ;;  %v2060_v50 = vld [vmem:[%s2519_s4 + $0x32c] ss:$16 sps:$4 sm:$0xff]   ;;  %v2055_v51 = vld [vmem:[%s2519_s4 + $0x320] ss:$16 sps:$4 sm:$0xff]  }
  0x9b   : > { %1361 = vmatpush1.bf16.msra.mxu0 %v1975_v54  ;;  %1443 = vmatpush1.bf16.msra.mxu1 %v1976_v55  ;;  %v2066_v54 = vld [vmem:[%s2519_s4 + $0x34c] ss:$16 sps:$4 sm:$0xff]   ;;  %v2061_v55 = vld [vmem:[%s2519_s4 + $0x340] ss:$16 sps:$4 sm:$0xff]  }
  0x9c   : > { %1362 = vmatprep.subr.bf16.mxu0 %v1977_v57  ;;  %1444 = vmatprep.subr.bf16.mxu1 %v1979_v58  ;;  %v2069_v57 = vld [vmem:[%s2519_s4 + $0x364] ss:$16 sps:$4 sm:$0xff]   ;;  %v2072_v58 = vld [vmem:[%s2519_s4 + $0x36c] ss:$16 sps:$4 sm:$0xff]  }
  0x9f   : > { %1363 = vmatpush1.bf16.msra.mxu0 %v1981_v60  ;;  %1445 = vmatpush1.bf16.msra.mxu1 %v1982_v61  ;;  %v2070_v60 = vld [vmem:[%s2519_s4 + $0x368] ss:$16 sps:$4 sm:$0xff]   ;;  %v2075_v61 = vld [vmem:[%s2519_s4 + $0x384] ss:$16 sps:$4 sm:$0xff]  }
  0xa0   : > { %1364 = vmatprep.subr.bf16.mxu0 %v1983_v62  ;;  %1446 = vmatprep.subr.bf16.mxu1 %v1985_v63  ;;  %v2078_v62 = vld [vmem:[%s2519_s4 + $0x38c] ss:$16 sps:$4 sm:$0xff]   ;;  %v2073_v63 = vld [vmem:[%s2519_s4 + $0x380] ss:$16 sps:$4 sm:$0xff]  }
  0xa3   : > { %1365 = vmatpush1.bf16.msra.mxu0 %v1987_v0  ;;  %1447 = vmatpush1.bf16.msra.mxu1 %v1988_v1  ;;  %v2076_v0 = vld [vmem:[%s2519_s4 + $0x388] ss:$16 sps:$4 sm:$0xff]   ;;  %v2081_v1 = vld [vmem:[%s2519_s4 + $0x3a4] ss:$16 sps:$4 sm:$0xff]  }
  0xa4   : > { %1366 = vmatprep.subr.bf16.mxu0 %v1989_v2  ;;  %1448 = vmatprep.subr.bf16.mxu1 %v1991_v3  ;;  %v2084_v2 = vld [vmem:[%s2519_s4 + $0x3ac] ss:$16 sps:$4 sm:$0xff]   ;;  %v2079_v3 = vld [vmem:[%s2519_s4 + $0x3a0] ss:$16 sps:$4 sm:$0xff]  }
  0xa7   : > { %1367 = vmatpush1.bf16.msra.mxu0 %v1993_v4  ;;  %1449 = vmatpush1.bf16.msra.mxu1 %v1994_v5  ;;  %v2082_v4 = vld [vmem:[%s2519_s4 + $0x3a8] ss:$16 sps:$4 sm:$0xff]   ;;  %v2087_v5 = vld [vmem:[%s2519_s4 + $0x3c4] ss:$16 sps:$4 sm:$0xff]  }
  0xa8   : > { %1368 = vmatprep.subr.bf16.mxu0 %v1995_v6  ;;  %1450 = vmatprep.subr.bf16.mxu1 %v1997_v7  ;;  %v2090_v6 = vld [vmem:[%s2519_s4 + $0x3cc] ss:$16 sps:$4 sm:$0xff]   ;;  %v2085_v7 = vld [vmem:[%s2519_s4 + $0x3c0] ss:$16 sps:$4 sm:$0xff]  }
  0xab   : > { %1369 = vmatpush1.bf16.msra.mxu0 %v1999_v8  ;;  %1451 = vmatpush1.bf16.msra.mxu1 %v2000_v9  ;;  %v2088_v8 = vld [vmem:[%s2519_s4 + $0x3c8] ss:$16 sps:$4 sm:$0xff]   ;;  %v2093_v9 = vld [vmem:[%s2519_s4 + $0x3e4] ss:$16 sps:$4 sm:$0xff]  }
  0xac   : > { %1379 = vmatprep.subr.bf16.mxu0 %v2003_v10  ;;  %1461 = vmatprep.subr.bf16.mxu1 %v2006_v11  ;;  %v2096_v10 = vld [vmem:[%s2519_s4 + $0x3ec] ss:$16 sps:$4 sm:$0xff]   ;;  %v2091_v11 = vld [vmem:[%s2519_s4 + $0x3e0] ss:$16 sps:$4 sm:$0xff]  }
  0xae   : > { %1371 = vmatmul.mubr.bf16.vlgmr.msra.gmra.mrb[0].mxu0 %v2597_v13  ;;  %1453 = vmatmul.mubr.bf16.vlgmr.msra.gmra.mrb[0].mxu1 %v2597_v13 }
  0xaf   : > { %1380 = vmatpush1.bf16.msra.mxu0 %v2001_v12  ;;  %1462 = vmatpush1.bf16.msra.mxu1 %v2004_v14  ;;  %v2094_v12 = vld [vmem:[%s2519_s4 + $0x3e8] ss:$16 sps:$4 sm:$0xff]   ;;  %v692_v14 = vcombine.high %v2597_v13, %v2597_v13 }
  0xb0   : > { %1381 = vmatprep.subr.bf16.mxu0 %v2009_v15  ;;  %1463 = vmatprep.subr.bf16.mxu1 %v2012_v16  ;;  %v2155_v15 = vmov 1983009808  }
  0xb1   : > { %1411 = vmatprep.mubr.bf16.mxu0 %v693_v17  ;;  %1493 = vmatprep.mubr.bf16.mxu1 %v693_v17  ;;  %v1509_v16 = vunpack.c.l.s4 %v2155_v15 }
  0xb3   : > { %1382 = vmatpush1.bf16.msra.mxu0 %v2007_v18  ;;  %1464 = vmatpush1.bf16.msra.mxu1 %v2010_v19  ;;  %v1510_v17 = vunpack.c.0.s8 %v1509_v16 }
  0xb4   : > { %1383 = vmatprep.subr.bf16.mxu0 %v2015_v20  ;;  %1465 = vmatprep.subr.bf16.mxu1 %v2018_v21 }
  0xb5   : > { %v1513_v20 = vsub.s32 %v1510_v17, %v2564_v47 }
  0xb7   : > { %1384 = vmatpush1.bf16.msra.mxu0 %v2013_v22  ;;  %1466 = vmatpush1.bf16.msra.mxu1 %v2016_v23 }
  0xb8   : > { %1385 = vmatprep.subr.bf16.mxu0 %v2021_v24  ;;  %1467 = vmatprep.subr.bf16.mxu1 %v2024_v25 }
  0xbb   : > { %1386 = vmatpush1.bf16.msra.mxu0 %v2019_v26  ;;  %1468 = vmatpush1.bf16.msra.mxu1 %v2022_v27 }
  0xbc   : > { %1387 = vmatprep.subr.bf16.mxu0 %v2027_v28  ;;  %1469 = vmatprep.subr.bf16.mxu1 %v2030_v29 }
  0xbf   : > { %1388 = vmatpush1.bf16.msra.mxu0 %v2025_v30  ;;  %1470 = vmatpush1.bf16.msra.mxu1 %v2028_v31  ;;  %v539_v30 = vld [vmem:[#allocation2] sm:$0xff] }
  0xc0   : > { %1389 = vmatprep.subr.bf16.mxu0 %v2033_v32  ;;  %1471 = vmatprep.subr.bf16.mxu1 %v2036_v33  ;;  %v1531_v33 = vld [vmem:[%s522_s12] sm:$0xf] (!%p1834_p13) }
  0xc3   : > { %1390 = vmatpush1.bf16.msra.mxu0 %v2031_v34  ;;  %1472 = vmatpush1.bf16.msra.mxu1 %v2034_v35  ;;  %v1535_v34 = vsub.s32 (!%p1834_p13), 0, %v2564_v47  ;;  %v1539_v35 = vsub.s32 (!%p1834_p13), 1, %v2564_v47 }
  0xc4   : > { %1391 = vmatprep.subr.bf16.mxu0 %v2039_v36  ;;  %1473 = vmatprep.subr.bf16.mxu1 %v2042_v37  ;;  %v1543_v36 = vsub.s32 (!%p1834_p13), 2, %v2564_v47  ;;  %v1547_v37 = vsub.s32 (!%p1834_p13), 3, %v2564_v47 }
  0xc7   : > { %1392 = vmatpush1.bf16.msra.mxu0 %v2037_v38  ;;  %1474 = vmatpush1.bf16.msra.mxu1 %v2040_v39  ;;  %v1536_v38 = vrot.slane (!%p1834_p13), %v1531_v33, %v1535_v34  ;;  %v1540_v39 = vrot.slane (!%p1834_p13), %v1531_v33, %v1539_v35 }
  0xc8   : > { %1393 = vmatprep.subr.bf16.mxu0 %v2045_v40  ;;  %1475 = vmatprep.subr.bf16.mxu1 %v2048_v41  ;;  %v1544_v40 = vrot.slane (!%p1834_p13), %v1531_v33, %v1543_v36  ;;  %v1548_v41 = vrot.slane (!%p1834_p13), %v1531_v33, %v1547_v37 }
  0xcb   : > { %1394 = vmatpush1.bf16.msra.mxu0 %v2043_v42  ;;  %1476 = vmatpush1.bf16.msra.mxu1 %v2046_v43  ;;  %v1549_v42 = vcombine.low (!%p1834_p13), %v1536_v38, %v1540_v39  ;;  %v1550_v43 = vcombine.low (!%p1834_p13), %v1544_v40, %v1548_v41 }
  0xcc   : > { %1395 = vmatprep.subr.bf16.mxu0 %v2051_v44  ;;  %1477 = vmatprep.subr.bf16.mxu1 %v2054_v45 }
  0xcd   : > { %v1557_v44 = vrot.slane (!%p1834_p13), %v1549_v42, %v1513_v20  ;;  %v1564_v45 = vrot.slane (!%p1834_p13), %v1550_v43, %v1513_v20 }
  0xcf   : > { %1396 = vmatpush1.bf16.msra.mxu0 %v2049_v46  ;;  %1478 = vmatpush1.bf16.msra.mxu1 %v2052_v48  ;;  %v1565_v48 = vcombine.low (!%p1834_p13), %v1557_v44, %v1564_v45 }
  0xd0   : > { %1397 = vmatprep.subr.bf16.mxu0 %v2057_v49  ;;  %1479 = vmatprep.subr.bf16.mxu1 %v2060_v50 }
  0xd3   : > { %1398 = vmatpush1.bf16.msra.mxu0 %v2055_v51  ;;  %1480 = vmatpush1.bf16.msra.mxu1 %v2058_v52 }
  0xd4   : > { %1399 = vmatprep.subr.bf16.mxu0 %v2063_v53  ;;  %1481 = vmatprep.subr.bf16.mxu1 %v2066_v54 }
  0xd7   : > { %1400 = vmatpush1.bf16.msra.mxu0 %v2061_v55  ;;  %1482 = vmatpush1.bf16.msra.mxu1 %v2064_v56 }
  0xd8   : > { %1401 = vmatprep.subr.bf16.mxu0 %v2069_v57  ;;  %1483 = vmatprep.subr.bf16.mxu1 %v2072_v58 }
  0xdb   : > { %1402 = vmatpush1.bf16.msra.mxu0 %v2067_v59  ;;  %1484 = vmatpush1.bf16.msra.mxu1 %v2070_v60 }
  0xdc   : > { %1403 = vmatprep.subr.bf16.mxu0 %v2075_v61  ;;  %1485 = vmatprep.subr.bf16.mxu1 %v2078_v62 }
  0xdf   : > { %1404 = vmatpush1.bf16.msra.mxu0 %v2073_v63  ;;  %1486 = vmatpush1.bf16.msra.mxu1 %v2076_v0 }
  0xe0   : > { %1405 = vmatprep.subr.bf16.mxu0 %v2081_v1  ;;  %1487 = vmatprep.subr.bf16.mxu1 %v2084_v2 }
  0xe3   : > { %1406 = vmatpush1.bf16.msra.mxu0 %v2079_v3  ;;  %1488 = vmatpush1.bf16.msra.mxu1 %v2082_v4 }
  0xe4   : > { %1407 = vmatprep.subr.bf16.mxu0 %v2087_v5  ;;  %1489 = vmatprep.subr.bf16.mxu1 %v2090_v6 }
  0xe7   : > { %1408 = vmatpush1.bf16.msra.mxu0 %v2085_v7  ;;  %1490 = vmatpush1.bf16.msra.mxu1 %v2088_v8 }
  0xe8   : > { %1409 = vmatprep.subr.bf16.mxu0 %v2093_v9  ;;  %1491 = vmatprep.subr.bf16.mxu1 %v2096_v10 }
  0xeb   : > { %1410 = vmatpush1.bf16.msra.mxu0 %v2091_v11  ;;  %1492 = vmatpush1.bf16.msra.mxu1 %v2094_v12 }
  0xee   : > { %1412 = vmatmul.mubr.bf16.vlgmr.msra.gmra.mrb[0].mxu0 %v692_v14  ;;  %1494 = vmatmul.mubr.bf16.vlgmr.msra.gmra.mrb[0].mxu1 %v692_v14 }
 0x1c1   : > { %v1413_v18 = vpop.f32.mrb[0].mxu0  ;;  %v1495_v19 = vpop.f32.mrb[0].mxu1 }
 0x1c2   : > { %v1415_v21 = vpop.f32.mrb[1].mxu0  ;;  %v1497_v22 = vpop.f32.mrb[1].mxu1 }
 0x1c3   : > { %v1506_v23 = vcombine.low %v1413_v18, %v1415_v21  ;;  %v1507_v24 = vcombine.low %v1495_v19, %v1497_v22  ;;  %v1417_v25 = vpop.f32.mrb[2].mxu0  ;;  %v1499_v26 = vpop.f32.mrb[2].mxu1 }
 0x1c4   : > { %v1418_v27 = vpop.f32.mrb[3].mxu0  ;;  %v1500_v28 = vpop.f32.mrb[3].mxu1 }
 0x1c5   : > { %v1514_v13 = vrot.slane %v1506_v23, %v1513_v20  ;;  %v1521_v29 = vrot.slane %v1507_v24, %v1513_v20  ;;  %1529 = sbr.rel (%p1834_p13) target bundleno = 470 (0x1d6), region = 63 }
 0x1c7   : > { %v1522_v31 = vcombine.low %v1514_v13, %v1521_v29 }
 0x1c9   : > { %v1524_v32 = vadd.f32 %v1522_v31, %v539_v30 }
 0x1cb   : > { %1525 = vst [vmem:[#allocation2] sm:$0xff] %v1524_v32 }
 0x1d2   : > { %v1530_v46 = vld [vmem:[#allocation2] sm:$0xff] }
 0x1d3   : > { %v1567_v49 = vadd.f32 %v1565_v48, %v1530_v46 }
 0x1d5   : > { %1568 = vst [vmem:[%s2517_s15] sm:$0xff] %v1567_v49 }
 0x1d6 PF: > { %s13_s18 = sadd.s32 1, %s2151_s18   ;;  %s2701_s12 = smov %s2131_s13 }
 0x1d7   : > { %p10_p0 = scmp.ge.s32.totalorder %s13_s18, 20   ;;  %s2702_s13 = smov %s2227_s25 }
 0x1d8   : > { %s2703_s14 = smov %s2143_s16  ;;  %s2704_s15 = smov %s2147_s17 }
 0x1d9   : > { %s2705_s16 = smov %s2708_s19  ;;  %s2706_s17 = smov %s2712_s20 }
 0x1da   :  { %12 = sbr.rel (!%p10_p0) target bundleno = 4 (0x4), region = 104 }

// kernel: tile.23
= control target key start
LH: loop header
LB: loop body
LE: loop exit
PB: predicated region body
PF: predicated region fallthrough
CT: control target
= control target key end

     0   :  { %s22_s0 = inlined_call_operand.vmem [shape: f32[128], index: 0, kind: input, shape index: {}]   ;;  %s23_s1 = inlined_call_operand.vmem [shape: f32[4,128], index: 1, kind: output, shape index: {}]  }
   0x1   :  { %v4_v0 = vld [vmem:[%s22_s0] ss:$0 sm:$0xff] }
   0x2   :  { %5 = vst [vmem:[%s23_s1] sm:$0xf] %v4_v0 }

// kernel: forward.16
= control target key start
LH: loop header
LB: loop body
LE: loop exit
PB: predicated region body
PF: predicated region fallthrough
CT: control target
= control target key end

     0   :  { %s1512_s12 = smov 0   ;;  %s1514_s13 = smov 0   ;;  %s1824_s0 = inlined_call_operand.vmem [shape: bf16[8,2560], index: 0, kind: input, shape index: {}]   ;;  %s1825_s1 = inlined_call_operand.vmem [shape: bf16[2560,512], index: 1, kind: input, shape index: {}]   ;;  %s1826_s2 = inlined_call_operand.vmem [shape: f32[1,512], index: 2, kind: input, shape index: {}]   ;;  %s1827_s3 = inlined_call_operand.vmem [shape: f32[8,512], index: 3, kind: output, shape index: {}]  }
   0x1   :  { %s1516_s14 = smov 0   ;;  %s1518_s15 = smov 0  }
   0x2   :  { %s1520_s16 = smov 0   ;;  %s1522_s17 = smov 0  }
   0x3   :  { %s1524_s18 = smov 0  }
   0x4 LB: > { %s25_s19 = sadd.s32 1, %s1481_s16  ;;  %s28_s20 = sadd.s32 1, %s1485_s17  ;;  %s1489_s18 = sphi %s1524_s18, %s13_s18   ;;  %s1485_s17 = sphi %s1522_s17, %s1833_s17   ;;  %s1481_s16 = sphi %s1520_s16, %s1832_s16   ;;  %s1477_s15 = sphi %s1518_s15, %s1831_s15   ;;  %s1473_s14 = sphi %s1516_s14, %s1830_s14   ;;  %s1469_s13 = sphi %s1514_s13, %s1829_s13   ;;  %s1465_s12 = sphi %s1512_s12, %s1828_s12  }
   0x5   : > { %p26_p0 = scmp.ge.s32.totalorder %s25_s19, 5  ;;  %p76_p1 = scmp.ne.s32.totalorder %s1469_s13, %s1465_s12 }
   0x6   : > { %p77_p2 = scmp.eq.s32.totalorder %s1489_s18, 0  ;;  %s69_s24 = sadd.s32 1, %s1469_s13 }
   0x7   : > { %s1835_s19 = smov (%p26_p0, %s25_s19), 0  ;;  %s1837_s20 = smov (!%p26_p0, %s28_s20), %s1485_s17 }
   0x8   : > { %p78_p3 = por %p77_p2, %p76_p1  ;;  %p30_p4 = scmp.ge.s32.totalorder %s1837_s20, 2 }
   0x9   : > { %s64_s21 = ssub.s32 %s1481_s16, %s1835_s19  ;;  %p1192_p6 = scmp.ge.s32.totalorder %s1489_s18, 10 }
   0xa   : > { %s1839_s20 = smov (%p30_p4, %s1837_s20), 0 }
   0xb   : > { %s65_s22 = ssub.s32 %s1485_s17, %s1839_s20  ;;  %156 = sbr.rel (%p1192_p6) target bundleno = 57 (0x39), region = 16 }
   0xc   : > { %s66_s23 = sor.u32 %s65_s22, %s64_s21 }
   0xd   : > { %p67_p5 = scmp.eq.s32.totalorder %s66_s23, 0 }
   0xf   : > { %s1563_s25 = scalar_select %p67_p5, %s1469_s13, %s69_s24  }
  0x12   : > { %172 = sbr.rel (!%p78_p3) target bundleno = 57 (0x39), region = 24  ;;  %s174_s26 = sand.u32 (%p78_p3), 1, %s1469_s13  }
  0x13   : > { %s1195_s27 = sshll.u32 (%p78_p3), %s1485_s17, 1  ;;  %s1193_s28 = sshll.u32 (%p78_p3), %s174_s26, 9 }
  0x14   : > { %s1277_s29 = sshll.u32 (%p78_p3), %s1481_s16, 8  ;;  %s1577_s8 = scalar_lea.vmem (%p78_p3), [#allocation3], %s1193_s28 }
  0x15   : > { %s180_s30 = sadd.s32 (%p78_p3), %s1277_s29, %s1195_s27 }
  0x16   : > { %s1197_s4 = sshll.u32 (%p78_p3), %s180_s30, 2 }
  0x17   : > { %s1572_s7 = scalar_lea.vmem (%p78_p3), %s1825_s1, %s1197_s4 }
  0x18   : > { %v336_v0 = vld [vmem:[%s1572_s7] sm:$0xff] (%p78_p3)  ;;  %v338_v1 = vld [vmem:[%s1572_s7 + $0x10] sm:$0xff] (%p78_p3) }
  0x19   : > { %v340_v2 = vld [vmem:[%s1572_s7 + $0x20] sm:$0xff]  ;;  %337 = vst [vmem:[%s1577_s8] sm:$0xff] %v336_v0  ;;  %339 = vst [vmem:[%s1577_s8 + $0x8] sm:$0xff] %v338_v1  ;;  %v342_v3 = vld [vmem:[%s1572_s7 + $0x30] sm:$0xff] }
  0x1a   : > { %341 = vst [vmem:[%s1577_s8 + $0x10] sm:$0xff] %v340_v2  ;;  %v344_v4 = vld [vmem:[%s1572_s7 + $0x40] sm:$0xff]  ;;  %v346_v5 = vld [vmem:[%s1572_s7 + $0x50] sm:$0xff]  ;;  %343 = vst [vmem:[%s1577_s8 + $0x18] sm:$0xff] %v342_v3 }
  0x1b   : > { %345 = vst [vmem:[%s1577_s8 + $0x20] sm:$0xff] %v344_v4  ;;  %347 = vst [vmem:[%s1577_s8 + $0x28] sm:$0xff] %v346_v5  ;;  %v348_v6 = vld [vmem:[%s1572_s7 + $0x60] sm:$0xff]  ;;  %v350_v7 = vld [vmem:[%s1572_s7 + $0x70] sm:$0xff] }
  0x1c   : > { %v352_v8 = vld [vmem:[%s1572_s7 + $0x80] sm:$0xff]  ;;  %349 = vst [vmem:[%s1577_s8 + $0x30] sm:$0xff] %v348_v6  ;;  %351 = vst [vmem:[%s1577_s8 + $0x38] sm:$0xff] %v350_v7  ;;  %v354_v9 = vld [vmem:[%s1572_s7 + $0x90] sm:$0xff] }
  0x1d   : > { %353 = vst [vmem:[%s1577_s8 + $0x40] sm:$0xff] %v352_v8  ;;  %v356_v10 = vld [vmem:[%s1572_s7 + $0xa0] sm:$0xff]  ;;  %v358_v11 = vld [vmem:[%s1572_s7 + $0xb0] sm:$0xff]  ;;  %355 = vst [vmem:[%s1577_s8 + $0x48] sm:$0xff] %v354_v9 }
  0x1e   : > { %357 = vst [vmem:[%s1577_s8 + $0x50] sm:$0xff] %v356_v10  ;;  %359 = vst [vmem:[%s1577_s8 + $0x58] sm:$0xff] %v358_v11  ;;  %v360_v12 = vld [vmem:[%s1572_s7 + $0xc0] sm:$0xff]  ;;  %v362_v13 = vld [vmem:[%s1572_s7 + $0xd0] sm:$0xff] }
  0x1f   : > { %v364_v14 = vld [vmem:[%s1572_s7 + $0xe0] sm:$0xff]  ;;  %361 = vst [vmem:[%s1577_s8 + $0x60] sm:$0xff] %v360_v12  ;;  %363 = vst [vmem:[%s1577_s8 + $0x68] sm:$0xff] %v362_v13  ;;  %v366_v15 = vld [vmem:[%s1572_s7 + $0xf0] sm:$0xff] }
  0x20   : > { %365 = vst [vmem:[%s1577_s8 + $0x70] sm:$0xff] %v364_v14  ;;  %v368_v16 = vld [vmem:[%s1572_s7 + $0x100] sm:$0xff]  ;;  %v370_v17 = vld [vmem:[%s1572_s7 + $0x110] sm:$0xff]  ;;  %367 = vst [vmem:[%s1577_s8 + $0x78] sm:$0xff] %v366_v15 }
  0x21   : > { %369 = vst [vmem:[%s1577_s8 + $0x80] sm:$0xff] %v368_v16  ;;  %371 = vst [vmem:[%s1577_s8 + $0x88] sm:$0xff] %v370_v17  ;;  %v372_v18 = vld [vmem:[%s1572_s7 + $0x120] sm:$0xff]  ;;  %v374_v19 = vld [vmem:[%s1572_s7 + $0x130] sm:$0xff] }
  0x22   : > { %v376_v20 = vld [vmem:[%s1572_s7 + $0x140] sm:$0xff]  ;;  %373 = vst [vmem:[%s1577_s8 + $0x90] sm:$0xff] %v372_v18  ;;  %375 = vst [vmem:[%s1577_s8 + $0x98] sm:$0xff] %v374_v19  ;;  %v378_v21 = vld [vmem:[%s1572_s7 + $0x150] sm:$0xff] }
  0x23   : > { %377 = vst [vmem:[%s1577_s8 + $0xa0] sm:$0xff] %v376_v20  ;;  %v380_v22 = vld [vmem:[%s1572_s7 + $0x160] sm:$0xff]  ;;  %v382_v23 = vld [vmem:[%s1572_s7 + $0x170] sm:$0xff]  ;;  %379 = vst [vmem:[%s1577_s8 + $0xa8] sm:$0xff] %v378_v21 }
  0x24   : > { %381 = vst [vmem:[%s1577_s8 + $0xb0] sm:$0xff] %v380_v22  ;;  %383 = vst [vmem:[%s1577_s8 + $0xb8] sm:$0xff] %v382_v23  ;;  %v384_v24 = vld [vmem:[%s1572_s7 + $0x180] sm:$0xff]  ;;  %v386_v25 = vld [vmem:[%s1572_s7 + $0x190] sm:$0xff] }
  0x25   : > { %v388_v26 = vld [vmem:[%s1572_s7 + $0x1a0] sm:$0xff]  ;;  %385 = vst [vmem:[%s1577_s8 + $0xc0] sm:$0xff] %v384_v24  ;;  %387 = vst [vmem:[%s1577_s8 + $0xc8] sm:$0xff] %v386_v25  ;;  %v390_v27 = vld [vmem:[%s1572_s7 + $0x1b0] sm:$0xff] }
  0x26   : > { %389 = vst [vmem:[%s1577_s8 + $0xd0] sm:$0xff] %v388_v26  ;;  %v392_v28 = vld [vmem:[%s1572_s7 + $0x1c0] sm:$0xff]  ;;  %v394_v29 = vld [vmem:[%s1572_s7 + $0x1d0] sm:$0xff]  ;;  %391 = vst [vmem:[%s1577_s8 + $0xd8] sm:$0xff] %v390_v27 }
  0x27   : > { %393 = vst [vmem:[%s1577_s8 + $0xe0] sm:$0xff] %v392_v28  ;;  %395 = vst [vmem:[%s1577_s8 + $0xe8] sm:$0xff] %v394_v29  ;;  %v396_v30 = vld [vmem:[%s1572_s7 + $0x1e0] sm:$0xff]  ;;  %v398_v31 = vld [vmem:[%s1572_s7 + $0x1f0] sm:$0xff] }
  0x28   : > { %v400_v32 = vld [vmem:[%s1572_s7 + $0x200] sm:$0xff]  ;;  %397 = vst [vmem:[%s1577_s8 + $0xf0] sm:$0xff] %v396_v30  ;;  %399 = vst [vmem:[%s1577_s8 + $0xf8] sm:$0xff] %v398_v31  ;;  %v402_v33 = vld [vmem:[%s1572_s7 + $0x210] sm:$0xff] }
  0x29   : > { %401 = vst [vmem:[%s1577_s8 + $0x100] sm:$0xff] %v400_v32  ;;  %v404_v34 = vld [vmem:[%s1572_s7 + $0x220] sm:$0xff]  ;;  %v406_v35 = vld [vmem:[%s1572_s7 + $0x230] sm:$0xff]  ;;  %403 = vst [vmem:[%s1577_s8 + $0x108] sm:$0xff] %v402_v33 }
  0x2a   : > { %405 = vst [vmem:[%s1577_s8 + $0x110] sm:$0xff] %v404_v34  ;;  %407 = vst [vmem:[%s1577_s8 + $0x118] sm:$0xff] %v406_v35  ;;  %v408_v36 = vld [vmem:[%s1572_s7 + $0x240] sm:$0xff]  ;;  %v410_v37 = vld [vmem:[%s1572_s7 + $0x250] sm:$0xff] }
  0x2b   : > { %v412_v38 = vld [vmem:[%s1572_s7 + $0x260] sm:$0xff]  ;;  %409 = vst [vmem:[%s1577_s8 + $0x120] sm:$0xff] %v408_v36  ;;  %411 = vst [vmem:[%s1577_s8 + $0x128] sm:$0xff] %v410_v37  ;;  %v414_v39 = vld [vmem:[%s1572_s7 + $0x270] sm:$0xff] }
  0x2c   : > { %413 = vst [vmem:[%s1577_s8 + $0x130] sm:$0xff] %v412_v38  ;;  %v416_v40 = vld [vmem:[%s1572_s7 + $0x280] sm:$0xff]  ;;  %v418_v41 = vld [vmem:[%s1572_s7 + $0x290] sm:$0xff]  ;;  %415 = vst [vmem:[%s1577_s8 + $0x138] sm:$0xff] %v414_v39 }
  0x2d   : > { %417 = vst [vmem:[%s1577_s8 + $0x140] sm:$0xff] %v416_v40  ;;  %419 = vst [vmem:[%s1577_s8 + $0x148] sm:$0xff] %v418_v41  ;;  %v420_v42 = vld [vmem:[%s1572_s7 + $0x2a0] sm:$0xff]  ;;  %v422_v43 = vld [vmem:[%s1572_s7 + $0x2b0] sm:$0xff] }
  0x2e   : > { %v424_v44 = vld [vmem:[%s1572_s7 + $0x2c0] sm:$0xff]  ;;  %421 = vst [vmem:[%s1577_s8 + $0x150] sm:$0xff] %v420_v42  ;;  %423 = vst [vmem:[%s1577_s8 + $0x158] sm:$0xff] %v422_v43  ;;  %v426_v45 = vld [vmem:[%s1572_s7 + $0x2d0] sm:$0xff] }
  0x2f   : > { %425 = vst [vmem:[%s1577_s8 + $0x160] sm:$0xff] %v424_v44  ;;  %v428_v46 = vld [vmem:[%s1572_s7 + $0x2e0] sm:$0xff]  ;;  %v430_v47 = vld [vmem:[%s1572_s7 + $0x2f0] sm:$0xff]  ;;  %427 = vst [vmem:[%s1577_s8 + $0x168] sm:$0xff] %v426_v45 }
  0x30   : > { %429 = vst [vmem:[%s1577_s8 + $0x170] sm:$0xff] %v428_v46  ;;  %431 = vst [vmem:[%s1577_s8 + $0x178] sm:$0xff] %v430_v47  ;;  %v432_v48 = vld [vmem:[%s1572_s7 + $0x300] sm:$0xff]  ;;  %v434_v49 = vld [vmem:[%s1572_s7 + $0x310] sm:$0xff] }
  0x31   : > { %v436_v50 = vld [vmem:[%s1572_s7 + $0x320] sm:$0xff]  ;;  %433 = vst [vmem:[%s1577_s8 + $0x180] sm:$0xff] %v432_v48  ;;  %435 = vst [vmem:[%s1577_s8 + $0x188] sm:$0xff] %v434_v49  ;;  %v438_v51 = vld [vmem:[%s1572_s7 + $0x330] sm:$0xff] }
  0x32   : > { %437 = vst [vmem:[%s1577_s8 + $0x190] sm:$0xff] %v436_v50  ;;  %v440_v52 = vld [vmem:[%s1572_s7 + $0x340] sm:$0xff]  ;;  %v442_v53 = vld [vmem:[%s1572_s7 + $0x350] sm:$0xff]  ;;  %439 = vst [vmem:[%s1577_s8 + $0x198] sm:$0xff] %v438_v51 }
  0x33   : > { %441 = vst [vmem:[%s1577_s8 + $0x1a0] sm:$0xff] %v440_v52  ;;  %443 = vst [vmem:[%s1577_s8 + $0x1a8] sm:$0xff] %v442_v53  ;;  %v444_v54 = vld [vmem:[%s1572_s7 + $0x360] sm:$0xff]  ;;  %v446_v55 = vld [vmem:[%s1572_s7 + $0x370] sm:$0xff] }
  0x34   : > { %v448_v56 = vld [vmem:[%s1572_s7 + $0x380] sm:$0xff]  ;;  %445 = vst [vmem:[%s1577_s8 + $0x1b0] sm:$0xff] %v444_v54  ;;  %447 = vst [vmem:[%s1577_s8 + $0x1b8] sm:$0xff] %v446_v55  ;;  %v450_v57 = vld [vmem:[%s1572_s7 + $0x390] sm:$0xff] }
  0x35   : > { %449 = vst [vmem:[%s1577_s8 + $0x1c0] sm:$0xff] %v448_v56  ;;  %v452_v58 = vld [vmem:[%s1572_s7 + $0x3a0] sm:$0xff]  ;;  %v454_v59 = vld [vmem:[%s1572_s7 + $0x3b0] sm:$0xff]  ;;  %451 = vst [vmem:[%s1577_s8 + $0x1c8] sm:$0xff] %v450_v57 }
  0x36   : > { %453 = vst [vmem:[%s1577_s8 + $0x1d0] sm:$0xff] %v452_v58  ;;  %455 = vst [vmem:[%s1577_s8 + $0x1d8] sm:$0xff] %v454_v59  ;;  %v456_v60 = vld [vmem:[%s1572_s7 + $0x3c0] sm:$0xff]  ;;  %v458_v61 = vld [vmem:[%s1572_s7 + $0x3d0] sm:$0xff] }
  0x37   : > { %v460_v62 = vld [vmem:[%s1572_s7 + $0x3e0] sm:$0xff]  ;;  %457 = vst [vmem:[%s1577_s8 + $0x1e0] sm:$0xff] %v456_v60  ;;  %459 = vst [vmem:[%s1577_s8 + $0x1e8] sm:$0xff] %v458_v61  ;;  %v462_v63 = vld [vmem:[%s1572_s7 + $0x3f0] sm:$0xff] }
  0x38   : > { %461 = vst [vmem:[%s1577_s8 + $0x1f0] sm:$0xff] %v460_v62  ;;  %463 = vst [vmem:[%s1577_s8 + $0x1f8] sm:$0xff] %v462_v63 }
  0x39 PF: > { %p1198_p7 = scmp.ge.s32.totalorder %s1489_s18, 1  ;;  %p476_p8 = scmp.lt.s32.totalorder %s1489_s18, 11 }
  0x3b   : > { %p477_p9 = pnand %p1198_p7, %p476_p8 }
  0x3c   : > { %s483_s9 = sand.u32 (!%p477_p9), 1, %s1465_s12   ;;  %s1200_s10 = sshll.u32 (!%p477_p9), %s1473_s14, 2 }
  0x3d   : > { %480 = sbr.rel (%p477_p9) target bundleno = 372 (0x174), region = 66  ;;  %s1199_s11 = sshll.u32 (!%p477_p9), %s483_s9, 9 }
  0x3e   : > { %p526_p10 = scmp.lt.s32.totalorder (!%p477_p9), %s1200_s10, 19  ;;  %s1202_s21 = sshll.u32 (!%p477_p9), %s1477_s15, 1 }
  0x3f   : > { %p536_p11 = scmp.lt.s32.totalorder (!%p477_p9), %s1202_s21, 3  ;;  %s1726_s5 = scalar_lea.vmem (!%p477_p9), [#allocation3], %s1199_s11 }
  0x40   : > { %p1205_p12 = scmp.ne.s32.totalorder (!%p477_p9), %s1473_s14, 0 }
  0x44   : > { %s1841_s10 = smov (!%p526_p10, %s1200_s10), 19  ;;  %s1843_s21 = smov (!%p536_p11, %s1202_s21), 3 }
  0x45   : > { %s1201_s22 = sshll.u32 %s1841_s10, 2  ;;  %s538_s12 = scalar_lea.vmem %s1826_s2, %s1843_s21  ;;  %v1491_v0 = vmov (!%p1205_p12), 0.0  }
  0x46   : > { %s1712_s26 = scalar_lea.vmem %s1824_s0, %s1201_s22  ;;  %s1204_s29 = sshll.u32 %s1843_s21, 3  ;;  %554 = vst [vmem:[#allocation2] sm:$0xff] (!%p1205_p12), %v1491_v0  ;;  %555 = vst [vmem:[#allocation2 + $0x8] sm:$0xff] (!%p1205_p12), %v1491_v0 }
  0x47   : > { %s1724_s15 = scalar_lea.vmem %s1827_s3, %s1204_s29  ;;  %553 = sbr.rel (%p1205_p12) target bundleno = 78 (0x4e), region = 74 }
  0x4e PF: > { %v1335_v1 = vld [vmem:[%s1726_s5 + $0x4] ss:$8 sps:$4 sm:$0xff]   ;;  %v1339_v3 = vld [vmem:[%s1726_s5] ss:$8 sps:$4 sm:$0xff]   ;;  %v1341_v5 = vld [vmem:[%s1726_s5 + $0x14] ss:$8 sps:$4 sm:$0xff]  }
  0x4f   : > { %v1337_v2 = vld [vmem:[%s1726_s5 + $0x104] ss:$8 sps:$4 sm:$0xff]   ;;  %958 = vmatprep.subr.bf16.mxu0 %v1335_v1  ;;  %v1340_v4 = vld [vmem:[%s1726_s5 + $0x100] ss:$8 sps:$4 sm:$0xff]   ;;  %v1343_v6 = vld [vmem:[%s1726_s5 + $0x114] ss:$8 sps:$4 sm:$0xff]  }
  0x50   : > { %999 = vmatprep.subr.bf16.mxu1 %v1337_v2  ;;  %959 = vmatpush1.bf16.msra.mxu0 %v1339_v3  ;;  %v1345_v7 = vld [vmem:[%s1726_s5 + $0x10] ss:$8 sps:$4 sm:$0xff]   ;;  %v1347_v9 = vld [vmem:[%s1726_s5 + $0x24] ss:$8 sps:$4 sm:$0xff]   ;;  %v1351_v11 = vld [vmem:[%s1726_s5 + $0x20] ss:$8 sps:$4 sm:$0xff]  }
  0x51   : > { %1000 = vmatpush1.bf16.msra.mxu1 %v1340_v4  ;;  %960 = vmatprep.subr.bf16.mxu0 %v1341_v5  ;;  %v1346_v8 = vld [vmem:[%s1726_s5 + $0x110] ss:$8 sps:$4 sm:$0xff]   ;;  %v1349_v10 = vld [vmem:[%s1726_s5 + $0x124] ss:$8 sps:$4 sm:$0xff]   ;;  %v1352_v12 = vld [vmem:[%s1726_s5 + $0x120] ss:$8 sps:$4 sm:$0xff]  }
  0x52   : > { %1001 = vmatprep.subr.bf16.mxu1 %v1343_v6  ;;  %v1353_v13 = vld [vmem:[%s1726_s5 + $0x34] ss:$8 sps:$4 sm:$0xff]   ;;  %v1357_v15 = vld [vmem:[%s1726_s5 + $0x30] ss:$8 sps:$4 sm:$0xff]   ;;  %v1359_v17 = vld [vmem:[%s1726_s5 + $0x44] ss:$8 sps:$4 sm:$0xff]  }
  0x53   : > { %v1355_v14 = vld [vmem:[%s1726_s5 + $0x134] ss:$8 sps:$4 sm:$0xff]   ;;  %v1358_v16 = vld [vmem:[%s1726_s5 + $0x130] ss:$8 sps:$4 sm:$0xff]   ;;  %v1361_v18 = vld [vmem:[%s1726_s5 + $0x144] ss:$8 sps:$4 sm:$0xff]  }
  0x54   : > { %961 = vmatpush1.bf16.msra.mxu0 %v1345_v7  ;;  %v1363_v19 = vld [vmem:[%s1726_s5 + $0x40] ss:$8 sps:$4 sm:$0xff]   ;;  %v1365_v21 = vld [vmem:[%s1726_s5 + $0x54] ss:$8 sps:$4 sm:$0xff]   ;;  %v1369_v23 = vld [vmem:[%s1726_s5 + $0x50] ss:$8 sps:$4 sm:$0xff]  }
  0x55   : > { %1002 = vmatpush1.bf16.msra.mxu1 %v1346_v8  ;;  %962 = vmatprep.subr.bf16.mxu0 %v1347_v9  ;;  %v1364_v20 = vld [vmem:[%s1726_s5 + $0x140] ss:$8 sps:$4 sm:$0xff]   ;;  %v1367_v22 = vld [vmem:[%s1726_s5 + $0x154] ss:$8 sps:$4 sm:$0xff]   ;;  %v1370_v24 = vld [vmem:[%s1726_s5 + $0x150] ss:$8 sps:$4 sm:$0xff]  }
  0x56   : > { %1003 = vmatprep.subr.bf16.mxu1 %v1349_v10  ;;  %v1371_v25 = vld [vmem:[%s1726_s5 + $0x64] ss:$8 sps:$4 sm:$0xff]   ;;  %v1375_v27 = vld [vmem:[%s1726_s5 + $0x60] ss:$8 sps:$4 sm:$0xff]   ;;  %v1377_v29 = vld [vmem:[%s1726_s5 + $0x74] ss:$8 sps:$4 sm:$0xff]  }
  0x57   : > { %v1373_v26 = vld [vmem:[%s1726_s5 + $0x164] ss:$8 sps:$4 sm:$0xff]   ;;  %v1376_v28 = vld [vmem:[%s1726_s5 + $0x160] ss:$8 sps:$4 sm:$0xff]   ;;  %v1379_v30 = vld [vmem:[%s1726_s5 + $0x174] ss:$8 sps:$4 sm:$0xff]  }
  0x58   : > { %963 = vmatpush1.bf16.msra.mxu0 %v1351_v11  ;;  %v1381_v31 = vld [vmem:[%s1726_s5 + $0x70] ss:$8 sps:$4 sm:$0xff]   ;;  %v1383_v33 = vld [vmem:[%s1726_s5 + $0x84] ss:$8 sps:$4 sm:$0xff]   ;;  %v1387_v35 = vld [vmem:[%s1726_s5 + $0x80] ss:$8 sps:$4 sm:$0xff]  }
  0x59   : > { %1004 = vmatpush1.bf16.msra.mxu1 %v1352_v12  ;;  %964 = vmatprep.subr.bf16.mxu0 %v1353_v13  ;;  %v1382_v32 = vld [vmem:[%s1726_s5 + $0x170] ss:$8 sps:$4 sm:$0xff]   ;;  %v1385_v34 = vld [vmem:[%s1726_s5 + $0x184] ss:$8 sps:$4 sm:$0xff]   ;;  %v1388_v36 = vld [vmem:[%s1726_s5 + $0x180] ss:$8 sps:$4 sm:$0xff]  }
  0x5a   : > { %1005 = vmatprep.subr.bf16.mxu1 %v1355_v14  ;;  %v1389_v37 = vld [vmem:[%s1726_s5 + $0x94] ss:$8 sps:$4 sm:$0xff]   ;;  %v1393_v39 = vld [vmem:[%s1726_s5 + $0x90] ss:$8 sps:$4 sm:$0xff]   ;;  %v1395_v41 = vld [vmem:[%s1726_s5 + $0xa4] ss:$8 sps:$4 sm:$0xff]  }
  0x5b   : > { %v1391_v38 = vld [vmem:[%s1726_s5 + $0x194] ss:$8 sps:$4 sm:$0xff]   ;;  %v1394_v40 = vld [vmem:[%s1726_s5 + $0x190] ss:$8 sps:$4 sm:$0xff]   ;;  %v1397_v42 = vld [vmem:[%s1726_s5 + $0x1a4] ss:$8 sps:$4 sm:$0xff]  }
  0x5c   : > { %965 = vmatpush1.bf16.msra.mxu0 %v1357_v15  ;;  %v1399_v43 = vld [vmem:[%s1726_s5 + $0xa0] ss:$8 sps:$4 sm:$0xff]   ;;  %v1401_v45 = vld [vmem:[%s1726_s5 + $0xb4] ss:$8 sps:$4 sm:$0xff]   ;;  %v1405_v50 = vld [vmem:[%s1726_s5 + $0xb0] ss:$8 sps:$4 sm:$0xff]  }
  0x5d   : > { %1006 = vmatpush1.bf16.msra.mxu1 %v1358_v16  ;;  %966 = vmatprep.subr.bf16.mxu0 %v1359_v17  ;;  %v1400_v44 = vld [vmem:[%s1726_s5 + $0x1a0] ss:$8 sps:$4 sm:$0xff]   ;;  %v1403_v46 = vld [vmem:[%s1726_s5 + $0x1b4] ss:$8 sps:$4 sm:$0xff]   ;;  %v1406_v51 = vld [vmem:[%s1726_s5 + $0x1b0] ss:$8 sps:$4 sm:$0xff]  }
  0x5e   : > { %1007 = vmatprep.subr.bf16.mxu1 %v1361_v18  ;;  %v558_v47 = vld [vmem:[%s1712_s26] sm:$0xff]  ;;  %v559_v49 = vld [vmem:[%s1712_s26 + $0x8] sm:$0xff]  ;;  %v1407_v53 = vld [vmem:[%s1726_s5 + $0xc4] ss:$8 sps:$4 sm:$0xff]   ;;  %p1274_p13 = scmp.ne.s32.totalorder %s1473_s14, 4 }
  0x5f   : > { %v1207_v48 = vcombine.high %v558_v47, %v558_v47  ;;  %v1209_v52 = vcombine.high %v559_v49, %v559_v49  ;;  %v1409_v54 = vld [vmem:[%s1726_s5 + $0x1c4] ss:$8 sps:$4 sm:$0xff]   ;;  %v1411_v55 = vld [vmem:[%s1726_s5 + $0xc0] ss:$8 sps:$4 sm:$0xff]   ;;  %v1413_v57 = vld [vmem:[%s1726_s5 + $0xd4] ss:$8 sps:$4 sm:$0xff]   ;;  %v1206_v5 = vcombine.low %v558_v47, %v558_v47  ;;  %v1208_v6 = vcombine.low %v559_v49, %v559_v49 }
  0x60   : > { %967 = vmatpush1.bf16.msra.mxu0 %v1363_v19  ;;  %v1412_v56 = vld [vmem:[%s1726_s5 + $0x1c0] ss:$8 sps:$4 sm:$0xff]   ;;  %v1415_v58 = vld [vmem:[%s1726_s5 + $0x1d4] ss:$8 sps:$4 sm:$0xff]   ;;  %v1417_v59 = vld [vmem:[%s1726_s5 + $0xd0] ss:$8 sps:$4 sm:$0xff]  }
  0x61   : > { %1008 = vmatpush1.bf16.msra.mxu1 %v1364_v20  ;;  %968 = vmatprep.subr.bf16.mxu0 %v1365_v21  ;;  %v1418_v60 = vld [vmem:[%s1726_s5 + $0x1d0] ss:$8 sps:$4 sm:$0xff]   ;;  %v1419_v61 = vld [vmem:[%s1726_s5 + $0xe4] ss:$8 sps:$4 sm:$0xff]   ;;  %v1423_v63 = vld [vmem:[%s1726_s5 + $0xe0] ss:$8 sps:$4 sm:$0xff]   ;;  %v1052_v21 = vlaneseq (!%p1274_p13) }
  0x62   : > { %1009 = vmatprep.subr.bf16.mxu1 %v1367_v22  ;;  %990 = vmatprep.mubr.bf16.mxu0 %v1207_v48  ;;  %v1421_v62 = vld [vmem:[%s1726_s5 + $0x1e4] ss:$8 sps:$4 sm:$0xff]   ;;  %v1424_v0 = vld [vmem:[%s1726_s5 + $0x1e0] ss:$8 sps:$4 sm:$0xff]   ;;  %v1425_v1 = vld [vmem:[%s1726_s5 + $0xf4] ss:$8 sps:$4 sm:$0xff]  }
  0x63   : > { %1031 = vmatprep.mubr.bf16.mxu1 %v1209_v52  ;;  %v1427_v2 = vld [vmem:[%s1726_s5 + $0x1f4] ss:$8 sps:$4 sm:$0xff]   ;;  %v1429_v3 = vld [vmem:[%s1726_s5 + $0xf0] ss:$8 sps:$4 sm:$0xff]   ;;  %v1053_v22 = vshrl.u32 (!%p1274_p13), %v1052_v21, 7 }
  0x64   : > { %969 = vmatpush1.bf16.msra.mxu0 %v1369_v23  ;;  %v1430_v4 = vld [vmem:[%s1726_s5 + $0x1f0] ss:$8 sps:$4 sm:$0xff]  }
  0x65   : > { %1010 = vmatpush1.bf16.msra.mxu1 %v1370_v24  ;;  %970 = vmatprep.subr.bf16.mxu0 %v1371_v25  ;;  %v556_v8 = vld [vmem:[#allocation2] sm:$0xff]  ;;  %v557_v12 = vld [vmem:[#allocation2 + $0x8] sm:$0xff]  ;;  %v1054_v24 = vsub.s32 (!%p1274_p13), 0, %v1053_v22  ;;  %v1058_v25 = vsub.s32 (!%p1274_p13), 1, %v1053_v22 }
  0x66   : > { %1011 = vmatprep.subr.bf16.mxu1 %v1373_v26  ;;  %v1050_v23 = vld [vmem:[%s538_s12] sm:$0x3] (!%p1274_p13) }
  0x68   : > { %971 = vmatpush1.bf16.msra.mxu0 %v1375_v27 }
  0x69   : > { %1012 = vmatpush1.bf16.msra.mxu1 %v1376_v28  ;;  %972 = vmatprep.subr.bf16.mxu0 %v1377_v29  ;;  %v1055_v28 = vrot.slane (!%p1274_p13), %v1050_v23, %v1054_v24  ;;  %v1059_v29 = vrot.slane (!%p1274_p13), %v1050_v23, %v1058_v25 }
  0x6a   : > { %1013 = vmatprep.subr.bf16.mxu1 %v1379_v30 }
  0x6c   : > { %973 = vmatpush1.bf16.msra.mxu0 %v1381_v31 }
  0x6d   : > { %1014 = vmatpush1.bf16.msra.mxu1 %v1382_v32  ;;  %974 = vmatprep.subr.bf16.mxu0 %v1383_v33 }
  0x6e   : > { %1015 = vmatprep.subr.bf16.mxu1 %v1385_v34 }
  0x70   : > { %975 = vmatpush1.bf16.msra.mxu0 %v1387_v35 }
  0x71   : > { %1016 = vmatpush1.bf16.msra.mxu1 %v1388_v36  ;;  %976 = vmatprep.subr.bf16.mxu0 %v1389_v37 }
  0x72   : > { %1017 = vmatprep.subr.bf16.mxu1 %v1391_v38 }
  0x74   : > { %977 = vmatpush1.bf16.msra.mxu0 %v1393_v39 }
  0x75   : > { %1018 = vmatpush1.bf16.msra.mxu1 %v1394_v40  ;;  %978 = vmatprep.subr.bf16.mxu0 %v1395_v41 }
  0x76   : > { %1019 = vmatprep.subr.bf16.mxu1 %v1397_v42 }
  0x78   : > { %979 = vmatpush1.bf16.msra.mxu0 %v1399_v43 }
  0x79   : > { %1020 = vmatpush1.bf16.msra.mxu1 %v1400_v44  ;;  %980 = vmatprep.subr.bf16.mxu0 %v1401_v45 }
  0x7a   : > { %1021 = vmatprep.subr.bf16.mxu1 %v1403_v46 }
  0x7c   : > { %981 = vmatpush1.bf16.msra.mxu0 %v1405_v50 }
  0x7d   : > { %1022 = vmatpush1.bf16.msra.mxu1 %v1406_v51  ;;  %982 = vmatprep.subr.bf16.mxu0 %v1407_v53 }
  0x7e   : > { %1023 = vmatprep.subr.bf16.mxu1 %v1409_v54 }
  0x80   : > { %983 = vmatpush1.bf16.msra.mxu0 %v1411_v55 }
  0x81   : > { %1024 = vmatpush1.bf16.msra.mxu1 %v1412_v56  ;;  %984 = vmatprep.subr.bf16.mxu0 %v1413_v57 }
  0x82   : > { %1025 = vmatprep.subr.bf16.mxu1 %v1415_v58 }
  0x84   : > { %985 = vmatpush1.bf16.msra.mxu0 %v1417_v59 }
  0x85   : > { %1026 = vmatpush1.bf16.msra.mxu1 %v1418_v60  ;;  %986 = vmatprep.subr.bf16.mxu0 %v1419_v61 }
  0x86   : > { %1027 = vmatprep.subr.bf16.mxu1 %v1421_v62 }
  0x88   : > { %987 = vmatpush1.bf16.msra.mxu0 %v1423_v63 }
  0x89   : > { %1028 = vmatpush1.bf16.msra.mxu1 %v1424_v0  ;;  %988 = vmatprep.subr.bf16.mxu0 %v1425_v1 }
  0x8a   : > { %1029 = vmatprep.subr.bf16.mxu1 %v1427_v2 }
  0x8c   : > { %989 = vmatpush1.bf16.msra.mxu0 %v1429_v3 }
  0x8d   : > { %1030 = vmatpush1.bf16.msra.mxu1 %v1430_v4 }
  0x8f   : > { %991 = vmatmul.mubr.bf16.vlgmr.msra.gmra.mrb[0].mxu0 %v1206_v5 }
  0x90   : > { %1032 = vmatmul.mubr.bf16.vlgmr.msra.gmra.mrb[0].mxu1 %v1208_v6 }
 0x162   : > { %v992_v7 = vpop.f32.mrb[0].mxu0 }
 0x163   : > { %v1033_v9 = vpop.f32.mrb[0].mxu1  ;;  %v994_v11 = vpop.f32.mrb[1].mxu0  ;;  %1047 = sbr.rel (%p1274_p13) target bundleno = 372 (0x174), region = 78 }
 0x164   : > { %v1034_v10 = vadd.f32 %v1033_v9, %v992_v7  ;;  %v1035_v13 = vpop.f32.mrb[1].mxu1  ;;  %v996_v15 = vpop.f32.mrb[2].mxu0 }
 0x165   : > { %v1036_v14 = vadd.f32 %v1035_v13, %v994_v11  ;;  %v1037_v16 = vpop.f32.mrb[2].mxu1  ;;  %v997_v18 = vpop.f32.mrb[3].mxu0 }
 0x166   : > { %v1040_v17 = vadd.f32 %v1034_v10, %v556_v8  ;;  %v1038_v19 = vpop.f32.mrb[3].mxu1 }
 0x167   : > { %v1041_v20 = vadd.f32 %v1036_v14, %v557_v12 }
 0x168   : > { %1042 = vst [vmem:[#allocation2] sm:$0xff] %v1040_v17 }
 0x169   : > { %1043 = vst [vmem:[#allocation2 + $0x8] sm:$0xff] %v1041_v20 }
 0x16f   : > { %v1048_v26 = vld [vmem:[#allocation2] sm:$0xff] }
 0x170   : > { %v1049_v27 = vld [vmem:[#allocation2 + $0x8] sm:$0xff]  ;;  %v1062_v30 = vadd.f32 %v1055_v28, %v1048_v26 }
 0x171   : > { %v1063_v31 = vadd.f32 %v1059_v29, %v1049_v27 }
 0x172   : > { %1064 = vst [vmem:[%s1724_s15] sm:$0xff] %v1062_v30 }
 0x173   : > { %1065 = vst [vmem:[%s1724_s15 + $0x8] sm:$0xff] %v1063_v31 }
 0x174 PF: > { %s13_s18 = sadd.s32 1, %s1489_s18   ;;  %s1828_s12 = smov %s1469_s13 }
 0x175   : > { %p10_p0 = scmp.ge.s32.totalorder %s13_s18, 12   ;;  %s1829_s13 = smov %s1563_s25 }
 0x176   : > { %s1830_s14 = smov %s1481_s16  ;;  %s1831_s15 = smov %s1485_s17 }
 0x177   : > { %s1832_s16 = smov %s1835_s19  ;;  %s1833_s17 = smov %s1839_s20 }
 0x178   :  { %12 = sbr.rel (!%p10_p0) target bundleno = 4 (0x4), region = 119 }

// kernel: tile.28
= control target key start
LH: loop header
LB: loop body
LE: loop exit
PB: predicated region body
PF: predicated region fallthrough
CT: control target
= control target key end

     0   :  { %s22_s0 = inlined_call_operand.vmem [shape: f32[64], index: 0, kind: input, shape index: {}]   ;;  %s23_s1 = inlined_call_operand.vmem [shape: f32[4,64], index: 1, kind: output, shape index: {}]  }
   0x1   :  { %v4_v0 = vld [vmem:[%s22_s0] ss:$0 sm:$0xff] }
   0x2   :  { %5 = vst [vmem:[%s23_s1] sm:$0xf] %v4_v0 }

// kernel: tile.29
= control target key start
LH: loop header
LB: loop body
LE: loop exit
PB: predicated region body
PF: predicated region fallthrough
CT: control target
= control target key end

     0   :  { %s6_s8 = smov 3  ;;  %vm8_vm0 = vcmask 523264   ;;  %s30_s9 = smov 64   ;;  %vm15_vm1 = vcmask 1048064   ;;  %s50_s0 = inlined_call_operand.vmem [shape: f32[4,64], index: 0, kind: input, shape index: {}]   ;;  %s51_s1 = inlined_call_operand.vmem [shape: f32[1,256], index: 1, kind: output, shape index: {}]  }
   0x1   :  { %v4_v0 = vld [vmem:[%s50_s0] sm:$0xf]  ;;  %s11_s0 = smov 3 }
   0x2   :  { %5 = vst [vmem:[#allocation1] sm:$0xf] %v4_v0 }
   0x9   :  { %v12_v1 = vld [vmem:[#allocation1 + $0x1] ss:$2 sm:%s11_s0]   ;;  %v7_v2 = vld [vmem:[#allocation1] ss:$2 sm:%s6_s8]  }
   0xa   :  { %13 = vrot.lane.b32.xlu0 %v12_v1, %s30_s9  ;;  %9 = vst.msk [vmem:[#allocation0] ss:$8 sm:$0x3] %vm8_vm0, %v7_v2  }
  0x7c   :  { %v14_v3 = vpop.permute.xlu0 %13  }
  0x7d   :  { %16 = vst.msk [vmem:[#allocation0] ss:$8 sm:$0x3] %vm15_vm1, %v14_v3  }
  0x84   :  { %v20_v4 = vld [vmem:[#allocation0] sm:$0x1]  ;;  %v24_v5 = vld [vmem:[#allocation0 + $0x8] sm:$0x1] }
  0x85   :  { %22 = vst [vmem:[%s51_s1] sm:$0x1] %v20_v4  ;;  %28 = vst [vmem:[%s51_s1 + $0x1] sm:$0x1] %v24_v5 }

// kernel: forward.17
= control target key start
LH: loop header
LB: loop body
LE: loop exit
PB: predicated region body
PF: predicated region fallthrough
CT: control target
= control target key end

     0   :  { %s1710_s0 = inlined_call_operand.vmem [shape: bf16[32,1152], index: 0, kind: input, shape index: {}]   ;;  %s1711_s1 = inlined_call_operand.vmem [shape: bf16[1152,256], index: 1, kind: input, shape index: {}]   ;;  %s1712_s2 = inlined_call_operand.vmem [shape: f32[1,256], index: 2, kind: input, shape index: {}]   ;;  %s1713_s3 = inlined_call_operand.vmem [shape: f32[32,256], index: 3, kind: output, shape index: {}]  }
   0x1   :  { %1715 = sst [smem:[#allocation7_spill]] %s1710_s0 }
   0x2   :  { %1716 = sst [smem:[#allocation8_spill]] %s1711_s1 }
   0x3   :  { %s1393_s12 = smov 0   ;;  %s1395_s13 = smov 0  }
   0x4   :  { %s1397_s14 = smov 0   ;;  %s1399_s15 = smov 0  }
   0x5   :  { %s1401_s16 = smov 0   ;;  %s1403_s17 = smov 0  }
   0x6   :  { %s1405_s18 = smov 0   ;;  %s1407_s19 = smov 0  }
   0x7   :  { %s1409_s20 = smov 0   ;;  %s1411_s21 = smov 0  }
   0x8   :  { %s1413_s22 = smov 0  }
   0x9 LB: > { %s1045_s23 = sadd.s32 4294967295, %s1370_s22   ;;  %s25_s24 = sadd.s32 1, %s1362_s20  ;;  %s1370_s22 = sphi %s1413_s22, %s13_s22   ;;  %s1366_s21 = sphi %s1411_s21, %s1733_s21   ;;  %s1362_s20 = sphi %s1409_s20, %s1732_s20   ;;  %s1358_s19 = sphi %s1407_s19, %s1731_s19   ;;  %s1354_s18 = sphi %s1405_s18, %s1730_s18   ;;  %s1350_s17 = sphi %s1403_s17, %s1729_s17   ;;  %s1346_s16 = sphi %s1401_s16, %s1728_s16   ;;  %s1342_s15 = sphi %s1399_s15, %s1727_s15   ;;  %s1338_s14 = sphi %s1397_s14, %s1726_s14   ;;  %s1334_s13 = sphi %s1395_s13, %s1725_s13   ;;  %s1330_s12 = sphi %s1393_s12, %s1724_s12  }
   0xa   : > { %p26_p0 = scmp.ge.s32.totalorder %s25_s24, 3  ;;  %s28_s25 = sadd.s32 1, %s1366_s21 }
   0xb   : > { %s41_s26 = sadd.s32 1, %s1350_s17  ;;  %p48_p1 = scmp.ne.s32.totalorder %s1350_s17, %s1346_s16 }
   0xc   : > { %s1735_s24 = smov (%p26_p0, %s25_s24), 0  ;;  %s1737_s25 = smov (!%p26_p0, %s28_s25), %s1366_s21 }
   0xd   : > { %s37_s27 = ssub.s32 %s1362_s20, %s1735_s24  ;;  %p49_p2 = scmp.eq.s32.totalorder %s1370_s22, 0 }
   0xe   : > { %p30_p3 = scmp.ge.s32.totalorder %s1737_s25, 2  ;;  %p39_p4 = scmp.eq.s32.totalorder %s37_s27, 0 }
   0xf   : > { %p1460_p5 = por %p49_p2, %p48_p1  ;;  %s69_s29 = sadd.s32 1, %s1342_s15 }
  0x10   : > { %s1739_s25 = smov (%p30_p3, %s1737_s25), 0  ;;  %p76_p6 = scmp.ne.s32.totalorder %s1342_s15, %s1338_s14 }
  0x11   : > { %1718 = sst [smem:[#allocation6_spill]] %s1739_s25  ;;  %s65_s4 = ssub.s32 %s1366_s21, %s1739_s25 }
  0x12   : > { %s1468_s30 = scalar_select %p39_p4, %s1350_s17, %s41_s26  }
  0x13   : > { %s66_s5 = sor.u32 %s65_s4, %s37_s27  ;;  %p121_p7 = scmp.eq.s32.totalorder %s65_s4, 0 }
  0x14   : > { %p67_p8 = scmp.eq.s32.totalorder %s66_s5, 0  ;;  %p1474_p9 = por %p76_p6, %p49_p2 }
  0x15   : > { %s123_s7 = sadd.s32 1, %s1334_s13  ;;  %p133_p10 = scmp.ne.s32.totalorder %s1334_s13, %s1330_s12 }
  0x16   : > { %s1482_s8 = scalar_select %p67_p8, %s1342_s15, %s69_s29  }
  0x17   : > { %s1485_s9 = scalar_select %p121_p7, %s1334_s13, %s123_s7  }
  0x18   : > { %p134_p11 = scmp.eq.s32.totalorder %s1045_s23, 5  ;;  %p1048_p13 = scmp.ge.s32.totalorder %s1370_s22, 6 }
  0x1a   : > { %p1487_p12 = por %p134_p11, %p133_p10  ;;  %156 = sbr.rel (%p1048_p13) target bundleno = 87 (0x57), region = 16 }
  0x21   : > { %159 = sbr.rel (!%p1460_p5) target bundleno = 46 (0x2e), region = 20  ;;  %s161_s11 = sand.u32 (%p1460_p5), 1, %s1350_s17  }
  0x22   : > { %s1099_s26 = smul.u32 (%p1460_p5), 12, %s1362_s20  ;;  %s1721_s0 = sld [smem:[#allocation7_spill]] (%p1460_p5) }
  0x23   : > { %s1159_s27 = smul.u32 (%p1460_p5), 48, %s161_s11 }
  0x25   : > { %s163_s23 = scalar_lea.vmem (%p1460_p5), [#allocation3], %s1159_s27 }
  0x28   : > { %s169_s5 = scalar_lea.vmem %s1721_s0, %s1099_s26 }
  0x29   : > { %v184_v0 = vld [vmem:[%s169_s5] sm:$0xff]  ;;  %v188_v2 = vld [vmem:[%s169_s5 + $0x48] sm:$0xff]  ;;  %v1054_v6 = vld [vmem:[%s169_s5 + $0x50] sm:$0xf] }
  0x2a   : > { %v186_v1 = vld [vmem:[%s169_s5 + $0x24] sm:$0xff]  ;;  %185 = vst [vmem:[%s163_s23] sm:$0xff] %v184_v0  ;;  %189 = vst [vmem:[%s163_s23 + $0x18] sm:$0xff] %v188_v2  ;;  %v190_v3 = vld [vmem:[%s169_s5 + $0x6c] sm:$0xff] }
  0x2b   : > { %187 = vst [vmem:[%s163_s23 + $0xc] sm:$0xff] %v186_v1  ;;  %v1050_v4 = vld [vmem:[%s169_s5 + $0x8] sm:$0xf]  ;;  %v1052_v5 = vld [vmem:[%s169_s5 + $0x2c] sm:$0xf]  ;;  %191 = vst [vmem:[%s163_s23 + $0x24] sm:$0xff] %v190_v3 }
  0x2c   : > { %1051 = vst [vmem:[%s163_s23 + $0x8] sm:$0xf] %v1050_v4  ;;  %1053 = vst [vmem:[%s163_s23 + $0x14] sm:$0xf] %v1052_v5  ;;  %v1056_v7 = vld [vmem:[%s169_s5 + $0x74] sm:$0xf] }
  0x2d   : > { %1055 = vst [vmem:[%s163_s23 + $0x20] sm:$0xf] %v1054_v6  ;;  %1057 = vst [vmem:[%s163_s23 + $0x2c] sm:$0xf] %v1056_v7 }
  0x2e PF: > { %212 = sbr.rel (!%p1474_p9) target bundleno = 87 (0x57), region = 46  ;;  %s214_s28 = sand.u32 (%p1474_p9), 1, %s1342_s15  }
  0x2f   : > { %s1100_s7 = smul.u32 (%p1474_p9), 96, %s1362_s20  ;;  %s1722_s1 = sld [smem:[#allocation8_spill]] (%p1474_p9) }
  0x30   : > { %s1160_s11 = smul.u32 (%p1474_p9), 192, %s214_s28 }
  0x31   : > { %s219_s26 = sadd.s32 (%p1474_p9), %s1366_s21, %s1100_s7 }
  0x32   : > { %s1059_s27 = sshll.u32 (%p1474_p9), %s219_s26, 2  ;;  %s1512_s6 = scalar_lea.vmem (%p1474_p9), [#allocation4], %s1160_s11 }
  0x35   : > { %s1507_s0 = scalar_lea.vmem %s1722_s1, %s1059_s27 }
  0x36   : > { %v237_v8 = vld [vmem:[%s1507_s0] sm:$0xf]  ;;  %v239_v9 = vld [vmem:[%s1507_s0 + $0x8] sm:$0xf]  ;;  %v241_v10 = vld [vmem:[%s1507_s0 + $0x10] sm:$0xf] }
  0x37   : > { %238 = vst [vmem:[%s1512_s6] sm:$0xf] %v237_v8  ;;  %240 = vst [vmem:[%s1512_s6 + $0x4] sm:$0xf] %v239_v9  ;;  %v243_v11 = vld [vmem:[%s1507_s0 + $0x18] sm:$0xf] }
  0x38   : > { %242 = vst [vmem:[%s1512_s6 + $0x8] sm:$0xf] %v241_v10  ;;  %v245_v12 = vld [vmem:[%s1507_s0 + $0x20] sm:$0xf]  ;;  %v247_v13 = vld [vmem:[%s1507_s0 + $0x28] sm:$0xf] }
  0x39   : > { %244 = vst [vmem:[%s1512_s6 + $0xc] sm:$0xf] %v243_v11  ;;  %246 = vst [vmem:[%s1512_s6 + $0x10] sm:$0xf] %v245_v12  ;;  %v249_v14 = vld [vmem:[%s1507_s0 + $0x30] sm:$0xf] }
  0x3a   : > { %248 = vst [vmem:[%s1512_s6 + $0x14] sm:$0xf] %v247_v13  ;;  %v251_v15 = vld [vmem:[%s1507_s0 + $0x38] sm:$0xf]  ;;  %v253_v16 = vld [vmem:[%s1507_s0 + $0x40] sm:$0xf] }
  0x3b   : > { %250 = vst [vmem:[%s1512_s6 + $0x18] sm:$0xf] %v249_v14  ;;  %252 = vst [vmem:[%s1512_s6 + $0x1c] sm:$0xf] %v251_v15  ;;  %v255_v17 = vld [vmem:[%s1507_s0 + $0x48] sm:$0xf] }
  0x3c   : > { %254 = vst [vmem:[%s1512_s6 + $0x20] sm:$0xf] %v253_v16  ;;  %v257_v18 = vld [vmem:[%s1507_s0 + $0x50] sm:$0xf]  ;;  %v259_v19 = vld [vmem:[%s1507_s0 + $0x58] sm:$0xf] }
  0x3d   : > { %256 = vst [vmem:[%s1512_s6 + $0x24] sm:$0xf] %v255_v17  ;;  %258 = vst [vmem:[%s1512_s6 + $0x28] sm:$0xf] %v257_v18  ;;  %v261_v20 = vld [vmem:[%s1507_s0 + $0x60] sm:$0xf] }
  0x3e   : > { %260 = vst [vmem:[%s1512_s6 + $0x2c] sm:$0xf] %v259_v19  ;;  %v263_v21 = vld [vmem:[%s1507_s0 + $0x68] sm:$0xf]  ;;  %v265_v22 = vld [vmem:[%s1507_s0 + $0x70] sm:$0xf] }
  0x3f   : > { %262 = vst [vmem:[%s1512_s6 + $0x30] sm:$0xf] %v261_v20  ;;  %264 = vst [vmem:[%s1512_s6 + $0x34] sm:$0xf] %v263_v21  ;;  %v267_v23 = vld [vmem:[%s1507_s0 + $0x78] sm:$0xf] }
  0x40   : > { %266 = vst [vmem:[%s1512_s6 + $0x38] sm:$0xf] %v265_v22  ;;  %v269_v24 = vld [vmem:[%s1507_s0 + $0x80] sm:$0xf]  ;;  %v271_v25 = vld [vmem:[%s1507_s0 + $0x88] sm:$0xf] }
  0x41   : > { %268 = vst [vmem:[%s1512_s6 + $0x3c] sm:$0xf] %v267_v23  ;;  %270 = vst [vmem:[%s1512_s6 + $0x40] sm:$0xf] %v269_v24  ;;  %v273_v26 = vld [vmem:[%s1507_s0 + $0x90] sm:$0xf] }
  0x42   : > { %272 = vst [vmem:[%s1512_s6 + $0x44] sm:$0xf] %v271_v25  ;;  %v275_v27 = vld [vmem:[%s1507_s0 + $0x98] sm:$0xf]  ;;  %v277_v28 = vld [vmem:[%s1507_s0 + $0xa0] sm:$0xf] }
  0x43   : > { %274 = vst [vmem:[%s1512_s6 + $0x48] sm:$0xf] %v273_v26  ;;  %276 = vst [vmem:[%s1512_s6 + $0x4c] sm:$0xf] %v275_v27  ;;  %v279_v29 = vld [vmem:[%s1507_s0 + $0xa8] sm:$0xf] }
  0x44   : > { %278 = vst [vmem:[%s1512_s6 + $0x50] sm:$0xf] %v277_v28  ;;  %v281_v30 = vld [vmem:[%s1507_s0 + $0xb0] sm:$0xf]  ;;  %v283_v31 = vld [vmem:[%s1507_s0 + $0xb8] sm:$0xf] }
  0x45   : > { %280 = vst [vmem:[%s1512_s6 + $0x54] sm:$0xf] %v279_v29  ;;  %282 = vst [vmem:[%s1512_s6 + $0x58] sm:$0xf] %v281_v30  ;;  %v285_v32 = vld [vmem:[%s1507_s0 + $0xc0] sm:$0xf] }
  0x46   : > { %284 = vst [vmem:[%s1512_s6 + $0x5c] sm:$0xf] %v283_v31  ;;  %v287_v33 = vld [vmem:[%s1507_s0 + $0xc8] sm:$0xf]  ;;  %v289_v34 = vld [vmem:[%s1507_s0 + $0xd0] sm:$0xf] }
  0x47   : > { %286 = vst [vmem:[%s1512_s6 + $0x60] sm:$0xf] %v285_v32  ;;  %288 = vst [vmem:[%s1512_s6 + $0x64] sm:$0xf] %v287_v33  ;;  %v291_v35 = vld [vmem:[%s1507_s0 + $0xd8] sm:$0xf] }
  0x48   : > { %290 = vst [vmem:[%s1512_s6 + $0x68] sm:$0xf] %v289_v34  ;;  %v293_v36 = vld [vmem:[%s1507_s0 + $0xe0] sm:$0xf]  ;;  %v295_v37 = vld [vmem:[%s1507_s0 + $0xe8] sm:$0xf] }
  0x49   : > { %292 = vst [vmem:[%s1512_s6 + $0x6c] sm:$0xf] %v291_v35  ;;  %294 = vst [vmem:[%s1512_s6 + $0x70] sm:$0xf] %v293_v36  ;;  %v297_v38 = vld [vmem:[%s1507_s0 + $0xf0] sm:$0xf] }
  0x4a   : > { %296 = vst [vmem:[%s1512_s6 + $0x74] sm:$0xf] %v295_v37  ;;  %v299_v39 = vld [vmem:[%s1507_s0 + $0xf8] sm:$0xf]  ;;  %v301_v40 = vld [vmem:[%s1507_s0 + $0x100] sm:$0xf] }
  0x4b   : > { %298 = vst [vmem:[%s1512_s6 + $0x78] sm:$0xf] %v297_v38  ;;  %300 = vst [vmem:[%s1512_s6 + $0x7c] sm:$0xf] %v299_v39  ;;  %v303_v41 = vld [vmem:[%s1507_s0 + $0x108] sm:$0xf] }
  0x4c   : > { %302 = vst [vmem:[%s1512_s6 + $0x80] sm:$0xf] %v301_v40  ;;  %v305_v42 = vld [vmem:[%s1507_s0 + $0x110] sm:$0xf]  ;;  %v307_v43 = vld [vmem:[%s1507_s0 + $0x118] sm:$0xf] }
  0x4d   : > { %304 = vst [vmem:[%s1512_s6 + $0x84] sm:$0xf] %v303_v41  ;;  %306 = vst [vmem:[%s1512_s6 + $0x88] sm:$0xf] %v305_v42  ;;  %v309_v44 = vld [vmem:[%s1507_s0 + $0x120] sm:$0xf] }
  0x4e   : > { %308 = vst [vmem:[%s1512_s6 + $0x8c] sm:$0xf] %v307_v43  ;;  %v311_v45 = vld [vmem:[%s1507_s0 + $0x128] sm:$0xf]  ;;  %v313_v46 = vld [vmem:[%s1507_s0 + $0x130] sm:$0xf] }
  0x4f   : > { %310 = vst [vmem:[%s1512_s6 + $0x90] sm:$0xf] %v309_v44  ;;  %312 = vst [vmem:[%s1512_s6 + $0x94] sm:$0xf] %v311_v45  ;;  %v315_v47 = vld [vmem:[%s1507_s0 + $0x138] sm:$0xf] }
  0x50   : > { %314 = vst [vmem:[%s1512_s6 + $0x98] sm:$0xf] %v313_v46  ;;  %v317_v48 = vld [vmem:[%s1507_s0 + $0x140] sm:$0xf]  ;;  %v319_v49 = vld [vmem:[%s1507_s0 + $0x148] sm:$0xf] }
  0x51   : > { %316 = vst [vmem:[%s1512_s6 + $0x9c] sm:$0xf] %v315_v47  ;;  %318 = vst [vmem:[%s1512_s6 + $0xa0] sm:$0xf] %v317_v48  ;;  %v321_v50 = vld [vmem:[%s1507_s0 + $0x150] sm:$0xf] }
  0x52   : > { %320 = vst [vmem:[%s1512_s6 + $0xa4] sm:$0xf] %v319_v49  ;;  %v323_v51 = vld [vmem:[%s1507_s0 + $0x158] sm:$0xf]  ;;  %v325_v52 = vld [vmem:[%s1507_s0 + $0x160] sm:$0xf] }
  0x53   : > { %322 = vst [vmem:[%s1512_s6 + $0xa8] sm:$0xf] %v321_v50  ;;  %324 = vst [vmem:[%s1512_s6 + $0xac] sm:$0xf] %v323_v51  ;;  %v327_v53 = vld [vmem:[%s1507_s0 + $0x168] sm:$0xf] }
  0x54   : > { %326 = vst [vmem:[%s1512_s6 + $0xb0] sm:$0xf] %v325_v52  ;;  %v329_v54 = vld [vmem:[%s1507_s0 + $0x170] sm:$0xf]  ;;  %v331_v55 = vld [vmem:[%s1507_s0 + $0x178] sm:$0xf] }
  0x55   : > { %328 = vst [vmem:[%s1512_s6 + $0xb4] sm:$0xf] %v327_v53  ;;  %330 = vst [vmem:[%s1512_s6 + $0xb8] sm:$0xf] %v329_v54 }
  0x56   : > { %332 = vst [vmem:[%s1512_s6 + $0xbc] sm:$0xf] %v331_v55 }
  0x57 PF: > { %p1060_p0 = scmp.ge.s32.totalorder %s1370_s22, 1  ;;  %p456_p1 = scmp.lt.s32.totalorder %s1370_s22, 7 }
  0x59   : > { %p457_p2 = pnand %p1060_p0, %p456_p1 }
  0x5a   : > { %s463_s5 = sand.u32 (!%p457_p2), 1, %s1346_s16   ;;  %s470_s23 = sand.u32 (!%p457_p2), 1, %s1338_s14  }
  0x5b   : > { %460 = sbr.rel (%p457_p2) target bundleno = 387 (0x183), region = 91  ;;  %s496_s0 = sand.u32 (!%p457_p2), 1, %s1330_s12  }
  0x5c   : > { %s1161_s28 = smul.u32 (!%p457_p2), 48, %s463_s5  ;;  %s1061_s11 = sshll.u32 (!%p457_p2), %s496_s0, 5 }
  0x5d   : > { %s1162_s7 = smul.u32 (!%p457_p2), 192, %s470_s23  ;;  %p502_p3 = scmp.lt.s32.totalorder (!%p457_p2), %s1358_s19, 1 }
  0x5e   : > { %s1620_s6 = scalar_lea.vmem (!%p457_p2), [#allocation3], %s1161_s28  ;;  %s1624_s25 = scalar_lea.vmem (!%p457_p2), [#allocation5], %s1061_s11 }
  0x5f   : > { %s1622_s1 = scalar_lea.vmem (!%p457_p2), [#allocation4], %s1162_s7  ;;  %p1062_p4 = scmp.ne.s32.totalorder (!%p457_p2), %s1354_s18, 0 }
  0x62   : > { %s1614_s26 = scalar_select %p502_p3, %s1358_s19, 1 }
  0x63   : > { %510 = sbr.rel (%p1062_p4) target bundleno = 106 (0x6a), region = 103  ;;  %v1372_v56 = vmov (!%p1062_p4), 0.0  }
  0x64   : > { %s504_s4 = scalar_lea.vmem %s1712_s2, %s1614_s26  ;;  %511 = vst [vmem:[#allocation2] sm:$0xff] (!%p1062_p4), %v1372_v56  ;;  %512 = vst [vmem:[#allocation2 + $0x8] sm:$0xff] (!%p1062_p4), %v1372_v56 }
  0x65   : > { %513 = vst [vmem:[#allocation2 + $0x10] sm:$0xff] (!%p1062_p4), %v1372_v56  ;;  %514 = vst [vmem:[#allocation2 + $0x18] sm:$0xff] (!%p1062_p4), %v1372_v56 }
  0x6a PF: > { %v1252_v57 = vld [vmem:[%s1622_s1 + $0x40] sm:$0xff]   ;;  %v1255_v60 = vld [vmem:[%s1622_s1 + $0x48] sm:$0xff]   ;;  %v1258_v63 = vld [vmem:[%s1622_s1 + $0x50] sm:$0xff]   ;;  %p1093_p5 = scmp.ne.s32.totalorder %s1354_s18, 2 }
  0x6b   : > { %v1253_v58 = vld [vmem:[%s1622_s1] sm:$0xff]   ;;  %1101 = vmatprep.subr.bf16.mxu0 %v1252_v57  ;;  %v1256_v61 = vld [vmem:[%s1622_s1 + $0x8] sm:$0xff]   ;;  %v1259_v0 = vld [vmem:[%s1622_s1 + $0x10] sm:$0xff]  }
  0x6c   : > { %v1254_v59 = vld [vmem:[%s1622_s1 + $0x80] sm:$0xff]   ;;  %1102 = vmatpush3.bf16.msra.mxu0 %v1253_v58  ;;  %v1257_v62 = vld [vmem:[%s1622_s1 + $0x88] sm:$0xff]   ;;  %v1260_v1 = vld [vmem:[%s1622_s1 + $0x90] sm:$0xff]  }
  0x6d   : > { %1139 = vmatprep.subr.bf16.mxu1 %v1254_v59  ;;  %1103 = vmatprep.subr.bf16.mxu0 %v1255_v60  ;;  %v1261_v2 = vld [vmem:[%s1622_s1 + $0x58] sm:$0xff]   ;;  %v1264_v5 = vld [vmem:[%s1622_s1 + $0x60] sm:$0xff]   ;;  %v1267_v8 = vld [vmem:[%s1622_s1 + $0x68] sm:$0xff]  }
  0x6e   : > { %1140 = vmatpush3.bf16.msra.mxu1 %v1254_v59  ;;  %v1262_v3 = vld [vmem:[%s1622_s1 + $0x18] sm:$0xff]   ;;  %v1266_v6 = vld [vmem:[%s1622_s1 + $0xa0] sm:$0xff]   ;;  %v1269_v9 = vld [vmem:[%s1622_s1 + $0xa8] sm:$0xff]  }
  0x6f   : > { %1141 = vmatprep.subr.bf16.mxu1 %v1257_v62  ;;  %v1263_v4 = vld [vmem:[%s1622_s1 + $0x98] sm:$0xff]   ;;  %v1265_v7 = vld [vmem:[%s1622_s1 + $0x20] sm:$0xff]   ;;  %v1268_v10 = vld [vmem:[%s1622_s1 + $0x28] sm:$0xff]  }
  0x70   : > { %1104 = vmatpush3.bf16.msra.mxu0 %v1256_v61  ;;  %v1270_v11 = vld [vmem:[%s1622_s1 + $0x70] sm:$0xff]   ;;  %v1273_v14 = vld [vmem:[%s1622_s1 + $0x78] sm:$0xff]   ;;  %v515_v29 = vld [vmem:[#allocation2] sm:$0xff] }
  0x71   : > { %1105 = vmatprep.subr.bf16.mxu0 %v1258_v63  ;;  %v1271_v12 = vld [vmem:[%s1622_s1 + $0x30] sm:$0xff]   ;;  %v1275_v15 = vld [vmem:[%s1622_s1 + $0xb8] sm:$0xff]   ;;  %v516_v34 = vld [vmem:[#allocation2 + $0x8] sm:$0xff] }
  0x72   : > { %1142 = vmatpush3.bf16.msra.mxu1 %v1257_v62  ;;  %v1272_v13 = vld [vmem:[%s1622_s1 + $0xb0] sm:$0xff]   ;;  %v1274_v18 = vld [vmem:[%s1622_s1 + $0x38] sm:$0xff]   ;;  %v1094_v52 = vld [vmem:[%s504_s4] ss:$0 sm:$0xff] (!%p1093_p5) }
  0x73   : > { %1143 = vmatprep.subr.bf16.mxu1 %v1260_v1  ;;  %v1278_v16 = vld [vmem:[%s1620_s6 + $0x4] ss:$12 sps:$4 sm:$0xff]   ;;  %v1279_v17 = vld [vmem:[%s1620_s6 + $0x8] ss:$12 sps:$4 sm:$0xff]   ;;  %v1276_v19 = vld [vmem:[%s1620_s6] ss:$12 sps:$4 sm:$0xff]  }
  0x74   : > { %1106 = vmatpush3.bf16.msra.mxu0 %v1259_v0  ;;  %783 = vmatprep.mubr.bf16.mxu0 %v1278_v16  ;;  %v1281_v20 = vld [vmem:[%s1620_s6 + $0x1c] ss:$12 sps:$4 sm:$0xff]   ;;  %v1280_v21 = vld [vmem:[%s1620_s6 + $0x20] ss:$12 sps:$4 sm:$0xff]   ;;  %v1283_v22 = vld [vmem:[%s1620_s6 + $0x18] ss:$12 sps:$4 sm:$0xff]  }
  0x75   : > { %1107 = vmatprep.subr.bf16.mxu0 %v1261_v2  ;;  %1155 = vmatprep.mubr.bf16.mxu1 %v1279_v17  ;;  %v517_v43 = vld [vmem:[#allocation2 + $0x10] sm:$0xff]  ;;  %v518_v47 = vld [vmem:[#allocation2 + $0x18] sm:$0xff] }
  0x76   : > { %1144 = vmatpush3.bf16.msra.mxu1 %v1260_v1 }
  0x77   : > { %1145 = vmatprep.subr.bf16.mxu1 %v1263_v4 }
  0x78   : > { %1108 = vmatpush3.bf16.msra.mxu0 %v1262_v3 }
  0x79   : > { %1109 = vmatprep.subr.bf16.mxu0 %v1264_v5 }
  0x7a   : > { %1146 = vmatpush3.bf16.msra.mxu1 %v1263_v4 }
  0x7b   : > { %1147 = vmatprep.subr.bf16.mxu1 %v1266_v6 }
  0x7c   : > { %1110 = vmatpush3.bf16.msra.mxu0 %v1265_v7 }
  0x7d   : > { %1111 = vmatprep.subr.bf16.mxu0 %v1267_v8 }
  0x7e   : > { %1148 = vmatpush3.bf16.msra.mxu1 %v1266_v6 }
  0x7f   : > { %1149 = vmatprep.subr.bf16.mxu1 %v1269_v9 }
  0x80   : > { %1112 = vmatpush3.bf16.msra.mxu0 %v1268_v10 }
  0x81   : > { %1113 = vmatprep.subr.bf16.mxu0 %v1270_v11 }
  0x82   : > { %1150 = vmatpush3.bf16.msra.mxu1 %v1269_v9 }
  0x83   : > { %1151 = vmatprep.subr.bf16.mxu1 %v1272_v13 }
  0x84   : > { %1114 = vmatpush3.bf16.msra.mxu0 %v1271_v12 }
  0x85   : > { %1115 = vmatprep.subr.bf16.mxu0 %v1273_v14 }
  0x86   : > { %1152 = vmatpush3.bf16.msra.mxu1 %v1272_v13 }
  0x87   : > { %1153 = vmatprep.subr.bf16.mxu1 %v1275_v15 }
  0x88   : > { %1116 = vmatpush3.bf16.msra.mxu0 %v1274_v18 }
  0x8a   : > { %1154 = vmatpush3.bf16.msra.mxu1 %v1275_v15 }
  0x8b   : > { %784 = vmatmul.mubr.bf16.vlgmr.msra.gmra.mrb[0].mxu0 %v1276_v19 }
  0x8c   : > { %791 = vmatprep.mubr.bf16.mxu0 %v1281_v20 }
  0x8d   : > { %1156 = vmatmul.mubr.bf16.vlgmr.msra.gmra.mrb[0].mxu1 %v1280_v21 }
  0x93   : > { %792 = vmatmul.mubr.bf16.gmra.mrb[4].mxu0 %v1283_v22 }
 0x15e   : > { %v1117_v23 = vpop.f32.mrb[0].mxu0 }
 0x15f   : > { %v1118_v24 = vpop.f32.mrb[1].mxu0 }
 0x160   : > { %v1119_v25 = vadd.f32 %v1118_v24, %v1117_v23  ;;  %v1120_v26 = vpop.f32.mrb[2].mxu0  ;;  %v1157_v27 = vpop.f32.mrb[0].mxu1 }
 0x161   : > { %v1121_v28 = vpop.f32.mrb[3].mxu0  ;;  %v834_v30 = vpop.f32.mrb[1].mxu1 }
 0x162   : > { %v1122_v31 = vadd.f32 %v1121_v28, %v1120_v26  ;;  %v835_v32 = vadd.f32 %v1119_v25, %v834_v30  ;;  %v1158_v33 = vpop.f32.mrb[2].mxu1 }
 0x163   : > { %v837_v35 = vpop.f32.mrb[3].mxu1 }
 0x164   : > { %v849_v36 = vadd.f32 %v835_v32, %v515_v29  ;;  %v838_v37 = vadd.f32 %v1122_v31, %v837_v35 }
 0x166   : > { %853 = vst [vmem:[#allocation2] sm:$0xff] %v849_v36  ;;  %v850_v38 = vadd.f32 %v838_v37, %v516_v34  ;;  %v1123_v39 = vpop.f32.mrb[4].mxu0 }
 0x167   : > { %v1124_v40 = vpop.f32.mrb[5].mxu0 }
 0x168   : > { %854 = vst [vmem:[#allocation2 + $0x8] sm:$0xff] %v850_v38  ;;  %v1125_v41 = vadd.f32 %v1124_v40, %v1123_v39  ;;  %v1126_v42 = vpop.f32.mrb[6].mxu0 }
 0x169   : > { %v1127_v44 = vpop.f32.mrb[7].mxu0 }
 0x16a   : > { %v843_v45 = vadd.f32 %v1157_v27, %v1125_v41  ;;  %v1128_v46 = vadd.f32 %v1127_v44, %v1126_v42  ;;  %860 = sbr.rel (%p1093_p5) target bundleno = 379 (0x17b), region = 107 }
 0x16c   : > { %v851_v48 = vadd.f32 %v843_v45, %v517_v43  ;;  %v846_v49 = vadd.f32 %v1158_v33, %v1128_v46 }
 0x16d   : > { %v861_v51 = vld [vmem:[#allocation2] sm:$0xff] (!%p1093_p5) }
 0x16e   : > { %855 = vst [vmem:[#allocation2 + $0x10] sm:$0xff] %v851_v48  ;;  %v852_v50 = vadd.f32 %v846_v49, %v518_v47  ;;  %v872_v54 = vadd.f32 (!%p1093_p5), %v1094_v52, %v861_v51 }
 0x16f   : > { %v862_v53 = vld [vmem:[#allocation2 + $0x8] sm:$0xff] (!%p1093_p5) }
 0x170   : > { %856 = vst [vmem:[#allocation2 + $0x18] sm:$0xff] %v852_v50  ;;  %v873_v55 = vadd.f32 (!%p1093_p5), %v1094_v52, %v862_v53  ;;  %876 = vst [vmem:[%s1624_s25] sm:$0xff] (!%p1093_p5), %v872_v54 }
 0x172   : > { %877 = vst [vmem:[%s1624_s25 + $0x8] sm:$0xff] %v873_v55 }
 0x175   : > { %v863_v56 = vld [vmem:[#allocation2 + $0x10] sm:$0xff] }
 0x176   : > { %v874_v58 = vadd.f32 %v1094_v52, %v863_v56 }
 0x177   : > { %v864_v57 = vld [vmem:[#allocation2 + $0x18] sm:$0xff] }
 0x178   : > { %v875_v59 = vadd.f32 %v1094_v52, %v864_v57  ;;  %878 = vst [vmem:[%s1624_s25 + $0x10] sm:$0xff] %v874_v58 }
 0x17a   : > { %879 = vst [vmem:[%s1624_s25 + $0x18] sm:$0xff] %v875_v59 }
 0x17b PF: > { %886 = sbr.rel (!%p1487_p12) target bundleno = 387 (0x183), region = 111  ;;  %s1096_s14 = sshll.u32 (%p1487_p12), %s1358_s19, 3  ;;  %v927_v61 = vld [vmem:[%s1624_s25 + $0x8] sm:$0xff] (%p1487_p12) }
 0x17c   : > { %s891_s5 = scalar_lea.vmem (%p1487_p12), %s1713_s3, %s1096_s14 }
 0x17d   : > { %928 = vst [vmem:[%s891_s5 + $0x10] sm:$0xff] (%p1487_p12), %v927_v61 }
 0x17f   : > { %v929_v62 = vld [vmem:[%s1624_s25 + $0x10] sm:$0xff] (%p1487_p12) }
 0x180   : > { %930 = vst [vmem:[%s891_s5 + $0x20] sm:$0xff] (%p1487_p12), %v929_v62 }
 0x181   : > { %v925_v60 = vld [vmem:[%s1624_s25] sm:$0xff] (%p1487_p12)  ;;  %v931_v63 = vld [vmem:[%s1624_s25 + $0x18] sm:$0xff] (%p1487_p12) }
 0x182   : > { %926 = vst [vmem:[%s891_s5] sm:$0xff] %v925_v60  ;;  %932 = vst [vmem:[%s891_s5 + $0x30] sm:$0xff] %v931_v63 }
 0x183 PF: > { %s13_s22 = sadd.s32 1, %s1370_s22   ;;  %s1723_s10 = sld [smem:[#allocation6_spill]] }
 0x184   : > { %p10_p6 = scmp.ge.s32.totalorder %s13_s22, 8   ;;  %s1724_s12 = smov %s1334_s13 }
 0x185   : > { %s1725_s13 = smov %s1485_s9  ;;  %s1726_s14 = smov %s1342_s15 }
 0x186   : > { %s1727_s15 = smov %s1482_s8  ;;  %s1728_s16 = smov %s1350_s17 }
 0x187   : > { %s1729_s17 = smov %s1468_s30  ;;  %s1730_s18 = smov %s1362_s20 }
 0x188   : > { %s1731_s19 = smov %s1366_s21  ;;  %s1732_s20 = smov %s1735_s24 }
 0x189   : > { %s1733_s21 = smov %s1723_s10  ;;  %12 = sbr.rel (!%p10_p6) target bundleno = 9 (0x9), region = 197 }

</bundles_post_ra>
